<compile_context>
chip_gen: v5e
topology: v5e:2x2
jax: 0.10.0
libtpu: 0.0.40
codegen_flags: <defaults>
</compile_context>

<pallas_src>
import functools

import jax
import jax.numpy as jnp
from jax.experimental import pallas as pl
from jax.experimental.pallas import tpu as pltpu

# Small, deterministic problem sizes consistent with the module's __init__.
HIDDEN = 32        # hidden_size
VOCAB = 32         # output_size
MAX_LENGTH = 16    # max_length
N_LAYERS = 2       # n_layers
DROPOUT_P = 0.1    # dropout_p (identity at inference)
OUT_LANES = 128    # packed output row width (>= VOCAB + HIDDEN + MAX_LENGTH)


def _dot(a, b):
    # bf16 MXU operands, f32 accumulation (single-pass MXU, no f32 emulation).
    return jnp.dot(a, b, preferred_element_type=jnp.float32)


def attn_decoder_kernel(
    n_steps, n_layers, H, V, L,
    # ---- inputs ----
    emb_seq_ref,    # VMEM (T, H)    f32  : pre-gathered embedding per step
    hidden0_ref,    # VMEM (1, H)    f32  : initial hidden[0, 0, :]
    attn_fused_ref, # VMEM (2H, L+H) bf16 : [attn^T | (comb_emb^T over zeros)]
    enc_comb_ref,   # VMEM (L, H)    bf16 : encoder_outputs @ comb_att^T (precomputed)
    gru_w_ref,      # VMEM (2H, 4H)  bf16 : [[Wr_i|Wz_i|Wn_i|0],[Wr_h|Wz_h|0|Wn_h]] (transposed blocks)
    outw_ref,       # VMEM (H, V)    bf16 : out weight, transposed
    bias_ref,       # VMEM (8, 128)  f32  : packed biases (attn/comb/gru-packed/out)
    # ---- outputs ----
    out_ref,        # VMEM (T, 128)  f32  : packed [logp | hidden | attn_w | 0-pad] per step
):
    bf16 = jnp.bfloat16
    attn_b = bias_ref[0:1, 0:L]
    comb_b = bias_ref[1:2, 0:H]
    gru_b = bias_ref[2:3, 0:4 * H]       # [bih_r+bhh_r | bih_z+bhh_z | bih_n | bhh_n]
    out_b = bias_ref[3:4, 0:V]

    h = hidden0_ref[...]                                        # (1, H) f32, carried in regs
    pad = jnp.zeros((1, out_ref.shape[1] - (V + H + L)), jnp.float32)   # hoisted

    for t in range(n_steps):                                    # static unrolled decode loop
        embedded = emb_seq_ref[t:t + 1, :]                      # (1, H) f32
        # TODO(synk): nn.Dropout runs in eval mode -> identity (no RNG drop here).

        # One fused dot: cols 0:L = attn logits, cols L:L+H = embedded@comb_emb.
        cat_eh = jnp.concatenate([embedded, h], axis=-1).astype(bf16)   # (1, 2H)
        fused = _dot(cat_eh, attn_fused_ref[...])                       # (1, L+H) f32
        attn_logits = fused[:, 0:L] + attn_b
        emb_part = fused[:, L:L + H]

        # attn_weights = softmax(attn_logits); approx reciprocal => rows may not
        # sum to exactly 1 (EUP approximation, error << 1e-3).
        m = jnp.max(attn_logits, axis=-1, keepdims=True)
        e = jnp.exp(attn_logits - m)
        attn_w = e * pl.reciprocal(jnp.sum(e, axis=-1, keepdims=True), approx=True)

        # output = Linear_{2H->H}(cat(embedded, attn_applied))
        #        = embedded@comb_emb + attn_w@(enc@comb_att) + comb_b   (exact fold)
        x = emb_part + _dot(attn_w.astype(bf16), enc_comb_ref[...]) + comb_b   # (1, H)

        # NOTE: the same single-layer nn.GRU weights are reused for every one of
        # the n_layers iterations - exactly as in the tutorial module (it calls
        # the same nn.GRU n_layers times); this is NOT a stacked 2-layer GRU.
        for _ in range(n_layers):
            x = jnp.maximum(x, 0.0)                                     # relu
            cat_xh = jnp.concatenate([x, h], axis=-1).astype(bf16)      # (1, 2H)
            g = _dot(cat_xh, gru_w_ref[...]) + gru_b                    # (1, 4H = 128) f32
            r = jax.nn.sigmoid(g[:, 0:H])                               # gi_r + gh_r (+biases)
            z = jax.nn.sigmoid(g[:, H:2 * H])                           # gi_z + gh_z
            n = jnp.tanh(g[:, 2 * H:3 * H] + r * g[:, 3 * H:4 * H])     # gi_n + r * gh_n
            h = (1.0 - z) * n + z * h                                   # (1, H)
            x = h

        # output = log_softmax(Linear_{H->V}(output))
        out_logits = _dot(x.astype(bf16), outw_ref[...]) + out_b        # (1, V)
        m2 = jnp.max(out_logits, axis=-1, keepdims=True)
        lse = jnp.log(jnp.sum(jnp.exp(out_logits - m2), axis=-1, keepdims=True)) + m2
        logp = out_logits - lse

        # Single full-width lane-dense (128) unmasked store per step.
        out_ref[t:t + 1, :] = jnp.concatenate([logp, h, attn_w, pad], axis=-1)


def init_params(key, hidden=HIDDEN, vocab=VOCAB, max_length=MAX_LENGTH):
    """Deterministic parameter init (PyTorch-shaped, repacked for the kernel later)."""
    ks = jax.random.split(key, 12)
    s = 0.1
    p = {}
    p["embedding"] = s * jax.random.normal(ks[0], (vocab, hidden), jnp.float32)
    # nn.Linear(2H, L)
    p["attn_w"] = s * jax.random.normal(ks[1], (max_length, 2 * hidden), jnp.float32)
    p["attn_b"] = s * jax.random.normal(ks[2], (max_length,), jnp.float32)
    # nn.Linear(2H, H)
    p["comb_w"] = s * jax.random.normal(ks[3], (hidden, 2 * hidden), jnp.float32)
    p["comb_b"] = s * jax.random.normal(ks[4], (hidden,), jnp.float32)
    # nn.GRU(H, H): weight_ih_l0 (3H, H), weight_hh_l0 (3H, H), biases (3H,), gate order r,z,n
    p["gru_wih"] = s * jax.random.normal(ks[5], (3 * hidden, hidden), jnp.float32)
    p["gru_whh"] = s * jax.random.normal(ks[6], (3 * hidden, hidden), jnp.float32)
    p["gru_bih"] = s * jax.random.normal(ks[7], (3 * hidden,), jnp.float32)
    p["gru_bhh"] = s * jax.random.normal(ks[8], (3 * hidden,), jnp.float32)
    # nn.Linear(H, V)
    p["out_w"] = s * jax.random.normal(ks[9], (vocab, hidden), jnp.float32)
    p["out_b"] = s * jax.random.normal(ks[10], (vocab,), jnp.float32)
    return p


def _pack_kernel_weights(params):
    """Transpose / fuse PyTorch-shaped params into the kernel's packed layout."""
    f32, bf16 = jnp.float32, jnp.bfloat16
    H, L = HIDDEN, MAX_LENGTH

    attn_wT = jnp.transpose(params["attn_w"]).astype(f32)        # (2H, L)
    comb_wT = jnp.transpose(params["comb_w"]).astype(f32)        # (2H, H)
    comb_emb = comb_wT[0:H, :]                                   # rows multiplying `embedded`
    comb_att = comb_wT[H:2 * H, :]                               # rows multiplying attn_applied
    # Fused attn + combine-embedded weight: (2H, L+H).
    attn_fused = jnp.concatenate(
        [attn_wT, jnp.concatenate([comb_emb, jnp.zeros((H, H), f32)], axis=0)], axis=1)

    # Packed GRU weight (2H, 4H): column blocks r | z | n(input) | n(hidden).
    wih = params["gru_wih"].astype(f32)                          # (3H, H), gate rows r|z|n
    whh = params["gru_whh"].astype(f32)
    zHH = jnp.zeros((H, H), f32)
    top = jnp.concatenate([wih[0:H].T, wih[H:2 * H].T, wih[2 * H:3 * H].T, zHH], axis=1)
    bot = jnp.concatenate([whh[0:H].T, whh[H:2 * H].T, zHH, whh[2 * H:3 * H].T], axis=1)
    gru_packed = jnp.concatenate([top, bot], axis=0)             # (2H, 4H)

    out_wT = jnp.transpose(params["out_w"]).astype(f32)          # (H, V)

    bih, bhh = params["gru_bih"].astype(f32), params["gru_bhh"].astype(f32)
    gru_b = jnp.concatenate(
        [bih[0:H] + bhh[0:H], bih[H:2 * H] + bhh[H:2 * H],
         bih[2 * H:3 * H], bhh[2 * H:3 * H]])                    # (4H,) = (128,)

    def _row(v):
        v = v.reshape(1, -1).astype(f32)
        return jnp.pad(v, ((0, 0), (0, OUT_LANES - v.shape[1])))

    bias_slab = jnp.concatenate(
        [_row(params["attn_b"]), _row(params["comb_b"]), _row(gru_b),
         _row(params["out_b"]), jnp.zeros((4, OUT_LANES), f32)], axis=0)   # (8, 128)

    return (attn_fused.astype(bf16), comb_att, gru_packed.astype(bf16),
            out_wT.astype(bf16), bias_slab)


def attn_decoder_decode(params, tokens, hidden, encoder_outputs):
    """Run T teacher-forced decode steps inside ONE fused pallas_call.

    tokens: (T,) int32; hidden: (1,1,H) f32; encoder_outputs: (L,H) f32.
    Returns (log_probs (T,V), final hidden (1,1,H), attn_weights (T,L)).
    """
    H, V, L = HIDDEN, VOCAB, MAX_LENGTH
    f32, bf16 = jnp.float32, jnp.bfloat16
    T = int(tokens.shape[0])
    assert V + H + L <= OUT_LANES

    attn_fused, comb_att, gru_packed, out_wT, bias_slab = _pack_kernel_weights(params)
    # Loop-invariant fold: (attn_w @ enc) @ comb_att == attn_w @ (enc @ comb_att).
    enc_comb = (encoder_outputs.astype(f32) @ comb_att).astype(bf16)       # (L, H)
    # Pre-gather embeddings for the whole teacher-forced sequence (also removes the
    # in-kernel dynamic lookup and its OOB hazard).
    emb_seq = params["embedding"].astype(f32)[tokens.astype(jnp.int32)]    # (T, H)
    hidden_row = hidden.reshape(1, H).astype(f32)

    vmem = pl.BlockSpec(memory_space=pltpu.MemorySpace.VMEM)
    kernel = functools.partial(attn_decoder_kernel, T, N_LAYERS, H, V, L)
    packed = pl.pallas_call(
        kernel,
        out_shape=jax.ShapeDtypeStruct((T, OUT_LANES), f32),
        in_specs=[vmem] * 7,
        out_specs=vmem,
    )(emb_seq, hidden_row, attn_fused, enc_comb, gru_packed, out_wT, bias_slab)

    logp = packed[:, 0:V]                       # (T, V)
    hiddens = packed[:, V:V + H]                # (T, H), per-step hidden
    attn_w = packed[:, V + H:V + H + L]         # (T, L)
    return logp, hiddens[T - 1].reshape(1, 1, H), attn_w


def attn_decoder_forward(params, input_tok, hidden, encoder_output, encoder_outputs):
    """Single decode step matching the torch forward(input, hidden, encoder_output,
    encoder_outputs) signature. encoder_output (single step) is unused, as in the tutorial."""
    del encoder_output
    return attn_decoder_decode(params, input_tok.reshape(1), hidden, encoder_outputs)


# ------------------------- pure-JAX reference (f32) -------------------------
def reference_step(params, input_tok, hidden, encoder_outputs):
    """Mirrors the PyTorch forward (eval mode) for one step."""
    H = HIDDEN
    emb = params["embedding"][input_tok[0]].reshape(1, H)
    h = hidden.reshape(1, H)
    cat_eh = jnp.concatenate([emb, h], axis=1)
    logits = cat_eh @ params["attn_w"].T + params["attn_b"]
    attn_w = jax.nn.softmax(logits, axis=1)
    attn_applied = attn_w @ encoder_outputs
    x = jnp.concatenate([emb, attn_applied], axis=1) @ params["comb_w"].T + params["comb_b"]
    wih, whh, bih, bhh = (params["gru_wih"], params["gru_whh"],
                          params["gru_bih"], params["gru_bhh"])
    for _ in range(N_LAYERS):
        x = jnp.maximum(x, 0.0)
        gi = x @ wih.T + bih
        gh = h @ whh.T + bhh
        r = jax.nn.sigmoid(gi[:, :H] + gh[:, :H])
        z = jax.nn.sigmoid(gi[:, H:2 * H] + gh[:, H:2 * H])
        n = jnp.tanh(gi[:, 2 * H:] + r * gh[:, 2 * H:])
        h = (1.0 - z) * n + z * h
        x = h
    out_logits = x @ params["out_w"].T + params["out_b"]
    logp = jax.nn.log_softmax(out_logits, axis=1)
    return logp, h.reshape(1, 1, H), attn_w


def reference_decode(params, tokens, hidden, encoder_outputs):
    logps, attns = [], []
    h = hidden
    for t in range(tokens.shape[0]):
        logp, h, aw = reference_step(params, tokens[t:t + 1], h, encoder_outputs)
        logps.append(logp)
        attns.append(aw)
    return jnp.concatenate(logps, axis=0), h, jnp.concatenate(attns, axis=0)


if __name__ == "__main__":
    key = jax.random.PRNGKey(0)
    kp, kh, ke, kt = jax.random.split(key, 4)

    params = init_params(kp)
    T = 8
    tokens = jax.random.randint(kt, (T,), 0, VOCAB, dtype=jnp.int32)
    hidden0 = jax.random.normal(kh, (1, 1, HIDDEN), jnp.float32)
    encoder_outputs = jax.random.normal(ke, (MAX_LENGTH, HIDDEN), jnp.float32)

    # Fused multi-step decode: one pallas_call for all T steps.
    logp, h_new, attn_w = jax.block_until_ready(
        attn_decoder_decode(params, tokens, hidden0, encoder_outputs))

    ref_logp, ref_h, ref_attn = reference_decode(params, tokens, hidden0, encoder_outputs)
    # 2e-2 tolerance: MXU dots use bf16 operands (f32 accumulate) and the softmax
    # denominator uses pl.reciprocal(approx=True); the f32 reference is exact.
    TOL = dict(atol=2e-2, rtol=2e-2)
    assert jnp.allclose(logp, ref_logp, **TOL)
    assert jnp.allclose(h_new, ref_h, **TOL)
    assert jnp.allclose(attn_w, ref_attn, **TOL)

    # Single-step path (matches the torch forward signature; T=1 inside the kernel).
    logp1, h1, aw1 = jax.block_until_ready(
        attn_decoder_forward(params, tokens[:1], hidden0,
                             encoder_outputs[0:1], encoder_outputs))
    r_logp, r_h, r_aw = reference_step(params, tokens[:1], hidden0, encoder_outputs)
    assert jnp.allclose(logp1, r_logp, **TOL)
    assert jnp.allclose(h1, r_h, **TOL)
    assert jnp.allclose(aw1, r_aw, **TOL)

    print("KERNEL_OK")
</pallas_src>

<mosaic_0001>
module attributes {stable_mosaic.version = 11 : i64} {
  func.func @attn_decoder_kernel(%arg0: memref<8x32xf32, #tpu.memory_space<vmem>>, %arg1: memref<1x32xf32, #tpu.memory_space<vmem>>, %arg2: memref<64x48xbf16, #tpu.memory_space<vmem>>, %arg3: memref<16x32xbf16, #tpu.memory_space<vmem>>, %arg4: memref<64x128xbf16, #tpu.memory_space<vmem>>, %arg5: memref<32x32xbf16, #tpu.memory_space<vmem>>, %arg6: memref<8x128xf32, #tpu.memory_space<vmem>>, %arg7: memref<8x128xf32, #tpu.memory_space<vmem>>) attributes {dimension_semantics = [], scalar_prefetch = 0 : i64, scratch_operands = 0 : i64, tpu.core_type = #tpu.core_type<tc>} {
    %c0 = arith.constant 0 : index
    %c0_0 = arith.constant 0 : index
    %0 = vector.load %arg6[%c0, %c0_0] : memref<8x128xf32, #tpu.memory_space<vmem>>, vector<1x16xf32>
    %c1 = arith.constant 1 : index
    %c0_1 = arith.constant 0 : index
    %1 = vector.load %arg6[%c1, %c0_1] : memref<8x128xf32, #tpu.memory_space<vmem>>, vector<1x32xf32>
    %c2 = arith.constant 2 : index
    %c0_2 = arith.constant 0 : index
    %2 = vector.load %arg6[%c2, %c0_2] : memref<8x128xf32, #tpu.memory_space<vmem>>, vector<1x128xf32>
    %c3 = arith.constant 3 : index
    %c0_3 = arith.constant 0 : index
    %3 = vector.load %arg6[%c3, %c0_3] : memref<8x128xf32, #tpu.memory_space<vmem>>, vector<1x32xf32>
    %c0_4 = arith.constant 0 : index
    %c0_5 = arith.constant 0 : index
    %4 = vector.load %arg1[%c0_4, %c0_5] : memref<1x32xf32, #tpu.memory_space<vmem>>, vector<1x32xf32>
    %cst = arith.constant 0.000000e+00 : f32
    %5 = vector.broadcast %cst : f32 to vector<1x48xf32>
    %c0_6 = arith.constant 0 : index
    %c0_7 = arith.constant 0 : index
    %6 = vector.load %arg0[%c0_6, %c0_7] : memref<8x32xf32, #tpu.memory_space<vmem>>, vector<1x32xf32>
    %7 = tpu.concatenate %6, %4 in 1 : vector<1x32xf32>, vector<1x32xf32> -> vector<1x64xf32>
    %8 = arith.truncf %7 : vector<1x64xf32> to vector<1x64xbf16>
    %c0_8 = arith.constant 0 : index
    %c0_9 = arith.constant 0 : index
    %9 = vector.load %arg2[%c0_8, %c0_9] : memref<64x48xbf16, #tpu.memory_space<vmem>>, vector<64x48xbf16>
    %cst_10 = arith.constant dense<0.000000e+00> : vector<1x48xf32>
    %10 = tpu.matmul %8, %9, %cst_10 {dimension_numbers = #tpu.dot_dimension_numbers<[1], [0], [0], [1], [0, 0, 1, 1], [], []>} : vector<1x64xbf16>, vector<64x48xbf16>, vector<1x48xf32> -> vector<1x48xf32>
    %11 = vector.extract_strided_slice %10 {offsets = [0, 0], sizes = [1, 16], strides = [1, 1]} : vector<1x48xf32> to vector<1x16xf32>
    %12 = arith.addf %11, %0 : vector<1x16xf32>
    %13 = vector.extract_strided_slice %10 {offsets = [0, 16], sizes = [1, 32], strides = [1, 1]} : vector<1x48xf32> to vector<1x32xf32>
    %cst_11 = arith.constant dense<0xFF800000> : vector<1xf32>
    %14 = vector.multi_reduction <maximumf>, %12, %cst_11 [1] : vector<1x16xf32> to vector<1xf32>
    %15 = vector.shape_cast %14 : vector<1xf32> to vector<1x1xf32>
    %16 = vector.broadcast %15 : vector<1x1xf32> to vector<1x16xf32>
    %17 = arith.subf %12, %16 : vector<1x16xf32>
    %18 = math.exp %17 : vector<1x16xf32>
    %cst_12 = arith.constant dense<0.000000e+00> : vector<1xf32>
    %19 = vector.multi_reduction <add>, %18, %cst_12 [1] : vector<1x16xf32> to vector<1xf32>
    %20 = vector.shape_cast %19 : vector<1xf32> to vector<1x1xf32>
    %21 = tpu.reciprocal %20 {approx = true} : vector<1x1xf32> -> vector<1x1xf32>
    %22 = vector.broadcast %21 : vector<1x1xf32> to vector<1x16xf32>
    %23 = arith.mulf %18, %22 : vector<1x16xf32>
    %24 = arith.truncf %23 : vector<1x16xf32> to vector<1x16xbf16>
    %c0_13 = arith.constant 0 : index
    %c0_14 = arith.constant 0 : index
    %25 = vector.load %arg3[%c0_13, %c0_14] : memref<16x32xbf16, #tpu.memory_space<vmem>>, vector<16x32xbf16>
    %cst_15 = arith.constant dense<0.000000e+00> : vector<1x32xf32>
    %26 = tpu.matmul %24, %25, %cst_15 {dimension_numbers = #tpu.dot_dimension_numbers<[1], [0], [0], [1], [0, 0, 1, 1], [], []>} : vector<1x16xbf16>, vector<16x32xbf16>, vector<1x32xf32> -> vector<1x32xf32>
    %27 = arith.addf %13, %26 : vector<1x32xf32>
    %28 = arith.addf %27, %1 : vector<1x32xf32>
    %cst_16 = arith.constant 0.000000e+00 : f32
    %29 = vector.broadcast %cst_16 : f32 to vector<1x32xf32>
    %30 = arith.maximumf %28, %29 : vector<1x32xf32>
    %31 = tpu.concatenate %30, %4 in 1 : vector<1x32xf32>, vector<1x32xf32> -> vector<1x64xf32>
    %32 = arith.truncf %31 : vector<1x64xf32> to vector<1x64xbf16>
    %c0_17 = arith.constant 0 : index
    %c0_18 = arith.constant 0 : index
    %33 = vector.load %arg4[%c0_17, %c0_18] : memref<64x128xbf16, #tpu.memory_space<vmem>>, vector<64x128xbf16>
    %cst_19 = arith.constant dense<0.000000e+00> : vector<1x128xf32>
    %34 = tpu.matmul %32, %33, %cst_19 {dimension_numbers = #tpu.dot_dimension_numbers<[1], [0], [0], [1], [0, 0, 1, 1], [], []>} : vector<1x64xbf16>, vector<64x128xbf16>, vector<1x128xf32> -> vector<1x128xf32>
    %35 = arith.addf %34, %2 : vector<1x128xf32>
    %36 = vector.extract_strided_slice %35 {offsets = [0, 0], sizes = [1, 32], strides = [1, 1]} : vector<1x128xf32> to vector<1x32xf32>
    %37 = arith.negf %36 : vector<1x32xf32>
    %38 = math.exp %37 : vector<1x32xf32>
    %cst_20 = arith.constant 1.000000e+00 : f32
    %39 = vector.broadcast %cst_20 : f32 to vector<1x32xf32>
    %40 = arith.addf %39, %38 : vector<1x32xf32>
    %41 = arith.divf %39, %40 : vector<1x32xf32>
    %42 = vector.extract_strided_slice %35 {offsets = [0, 32], sizes = [1, 32], strides = [1, 1]} : vector<1x128xf32> to vector<1x32xf32>
    %43 = arith.negf %42 : vector<1x32xf32>
    %44 = math.exp %43 : vector<1x32xf32>
    %cst_21 = arith.constant 1.000000e+00 : f32
    %45 = vector.broadcast %cst_21 : f32 to vector<1x32xf32>
    %46 = arith.addf %45, %44 : vector<1x32xf32>
    %47 = arith.divf %45, %46 : vector<1x32xf32>
    %48 = vector.extract_strided_slice %35 {offsets = [0, 64], sizes = [1, 32], strides = [1, 1]} : vector<1x128xf32> to vector<1x32xf32>
    %49 = vector.extract_strided_slice %35 {offsets = [0, 96], sizes = [1, 32], strides = [1, 1]} : vector<1x128xf32> to vector<1x32xf32>
    %50 = arith.mulf %41, %49 : vector<1x32xf32>
    %51 = arith.addf %48, %50 : vector<1x32xf32>
    %52 = math.tanh %51 : vector<1x32xf32>
    %cst_22 = arith.constant 1.000000e+00 : f32
    %53 = vector.broadcast %cst_22 : f32 to vector<1x32xf32>
    %54 = arith.subf %53, %47 : vector<1x32xf32>
    %55 = arith.mulf %54, %52 : vector<1x32xf32>
    %56 = arith.mulf %47, %4 : vector<1x32xf32>
    %57 = arith.addf %55, %56 : vector<1x32xf32>
    %cst_23 = arith.constant 0.000000e+00 : f32
    %58 = vector.broadcast %cst_23 : f32 to vector<1x32xf32>
    %59 = arith.maximumf %57, %58 : vector<1x32xf32>
    %60 = tpu.concatenate %59, %57 in 1 : vector<1x32xf32>, vector<1x32xf32> -> vector<1x64xf32>
    %61 = arith.truncf %60 : vector<1x64xf32> to vector<1x64xbf16>
    %c0_24 = arith.constant 0 : index
    %c0_25 = arith.constant 0 : index
    %62 = vector.load %arg4[%c0_24, %c0_25] : memref<64x128xbf16, #tpu.memory_space<vmem>>, vector<64x128xbf16>
    %cst_26 = arith.constant dense<0.000000e+00> : vector<1x128xf32>
    %63 = tpu.matmul %61, %62, %cst_26 {dimension_numbers = #tpu.dot_dimension_numbers<[1], [0], [0], [1], [0, 0, 1, 1], [], []>} : vector<1x64xbf16>, vector<64x128xbf16>, vector<1x128xf32> -> vector<1x128xf32>
    %64 = arith.addf %63, %2 : vector<1x128xf32>
    %65 = vector.extract_strided_slice %64 {offsets = [0, 0], sizes = [1, 32], strides = [1, 1]} : vector<1x128xf32> to vector<1x32xf32>
    %66 = arith.negf %65 : vector<1x32xf32>
    %67 = math.exp %66 : vector<1x32xf32>
    %cst_27 = arith.constant 1.000000e+00 : f32
    %68 = vector.broadcast %cst_27 : f32 to vector<1x32xf32>
    %69 = arith.addf %68, %67 : vector<1x32xf32>
    %70 = arith.divf %68, %69 : vector<1x32xf32>
    %71 = vector.extract_strided_slice %64 {offsets = [0, 32], sizes = [1, 32], strides = [1, 1]} : vector<1x128xf32> to vector<1x32xf32>
    %72 = arith.negf %71 : vector<1x32xf32>
    %73 = math.exp %72 : vector<1x32xf32>
    %cst_28 = arith.constant 1.000000e+00 : f32
    %74 = vector.broadcast %cst_28 : f32 to vector<1x32xf32>
    %75 = arith.addf %74, %73 : vector<1x32xf32>
    %76 = arith.divf %74, %75 : vector<1x32xf32>
    %77 = vector.extract_strided_slice %64 {offsets = [0, 64], sizes = [1, 32], strides = [1, 1]} : vector<1x128xf32> to vector<1x32xf32>
    %78 = vector.extract_strided_slice %64 {offsets = [0, 96], sizes = [1, 32], strides = [1, 1]} : vector<1x128xf32> to vector<1x32xf32>
    %79 = arith.mulf %70, %78 : vector<1x32xf32>
    %80 = arith.addf %77, %79 : vector<1x32xf32>
    %81 = math.tanh %80 : vector<1x32xf32>
    %cst_29 = arith.constant 1.000000e+00 : f32
    %82 = vector.broadcast %cst_29 : f32 to vector<1x32xf32>
    %83 = arith.subf %82, %76 : vector<1x32xf32>
    %84 = arith.mulf %83, %81 : vector<1x32xf32>
    %85 = arith.mulf %76, %57 : vector<1x32xf32>
    %86 = arith.addf %84, %85 : vector<1x32xf32>
    %87 = arith.truncf %86 : vector<1x32xf32> to vector<1x32xbf16>
    %c0_30 = arith.constant 0 : index
    %c0_31 = arith.constant 0 : index
    %88 = vector.load %arg5[%c0_30, %c0_31] : memref<32x32xbf16, #tpu.memory_space<vmem>>, vector<32x32xbf16>
    %cst_32 = arith.constant dense<0.000000e+00> : vector<1x32xf32>
    %89 = tpu.matmul %87, %88, %cst_32 {dimension_numbers = #tpu.dot_dimension_numbers<[1], [0], [0], [1], [0, 0, 1, 1], [], []>} : vector<1x32xbf16>, vector<32x32xbf16>, vector<1x32xf32> -> vector<1x32xf32>
    %90 = arith.addf %89, %3 : vector<1x32xf32>
    %cst_33 = arith.constant dense<0xFF800000> : vector<1xf32>
    %91 = vector.multi_reduction <maximumf>, %90, %cst_33 [1] : vector<1x32xf32> to vector<1xf32>
    %92 = vector.shape_cast %91 : vector<1xf32> to vector<1x1xf32>
    %93 = vector.broadcast %92 : vector<1x1xf32> to vector<1x32xf32>
    %94 = arith.subf %90, %93 : vector<1x32xf32>
    %95 = math.exp %94 : vector<1x32xf32>
    %cst_34 = arith.constant dense<0.000000e+00> : vector<1xf32>
    %96 = vector.multi_reduction <add>, %95, %cst_34 [1] : vector<1x32xf32> to vector<1xf32>
    %97 = vector.shape_cast %96 : vector<1xf32> to vector<1x1xf32>
    %98 = math.log %97 : vector<1x1xf32>
    %99 = arith.addf %98, %92 : vector<1x1xf32>
    %100 = vector.broadcast %99 : vector<1x1xf32> to vector<1x32xf32>
    %101 = arith.subf %90, %100 : vector<1x32xf32>
    %102 = tpu.concatenate %101, %86, %23, %5 in 1 : vector<1x32xf32>, vector<1x32xf32>, vector<1x16xf32>, vector<1x48xf32> -> vector<1x128xf32>
    %c0_35 = arith.constant 0 : index
    %c0_36 = arith.constant 0 : index
    %103 = vector.load %arg7[%c0_35, %c0_36] : memref<8x128xf32, #tpu.memory_space<vmem>>, vector<1x128xf32>
    tpu.vector_store %arg7[%c0_35, %c0_36], %102 {strides = array<i32>} : memref<8x128xf32, #tpu.memory_space<vmem>>, vector<1x128xf32>,
    %c1_37 = arith.constant 1 : index
    %c0_38 = arith.constant 0 : index
    %104 = vector.load %arg0[%c1_37, %c0_38] : memref<8x32xf32, #tpu.memory_space<vmem>>, vector<1x32xf32>
    %105 = tpu.concatenate %104, %86 in 1 : vector<1x32xf32>, vector<1x32xf32> -> vector<1x64xf32>
    %106 = arith.truncf %105 : vector<1x64xf32> to vector<1x64xbf16>
    %c0_39 = arith.constant 0 : index
    %c0_40 = arith.constant 0 : index
    %107 = vector.load %arg2[%c0_39, %c0_40] : memref<64x48xbf16, #tpu.memory_space<vmem>>, vector<64x48xbf16>
    %cst_41 = arith.constant dense<0.000000e+00> : vector<1x48xf32>
    %108 = tpu.matmul %106, %107, %cst_41 {dimension_numbers = #tpu.dot_dimension_numbers<[1], [0], [0], [1], [0, 0, 1, 1], [], []>} : vector<1x64xbf16>, vector<64x48xbf16>, vector<1x48xf32> -> vector<1x48xf32>
    %109 = vector.extract_strided_slice %108 {offsets = [0, 0], sizes = [1, 16], strides = [1, 1]} : vector<1x48xf32> to vector<1x16xf32>
    %110 = arith.addf %109, %0 : vector<1x16xf32>
    %111 = vector.extract_strided_slice %108 {offsets = [0, 16], sizes = [1, 32], strides = [1, 1]} : vector<1x48xf32> to vector<1x32xf32>
    %cst_42 = arith.constant dense<0xFF800000> : vector<1xf32>
    %112 = vector.multi_reduction <maximumf>, %110, %cst_42 [1] : vector<1x16xf32> to vector<1xf32>
    %113 = vector.shape_cast %112 : vector<1xf32> to vector<1x1xf32>
    %114 = vector.broadcast %113 : vector<1x1xf32> to vector<1x16xf32>
    %115 = arith.subf %110, %114 : vector<1x16xf32>
    %116 = math.exp %115 : vector<1x16xf32>
    %cst_43 = arith.constant dense<0.000000e+00> : vector<1xf32>
    %117 = vector.multi_reduction <add>, %116, %cst_43 [1] : vector<1x16xf32> to vector<1xf32>
    %118 = vector.shape_cast %117 : vector<1xf32> to vector<1x1xf32>
    %119 = tpu.reciprocal %118 {approx = true} : vector<1x1xf32> -> vector<1x1xf32>
    %120 = vector.broadcast %119 : vector<1x1xf32> to vector<1x16xf32>
    %121 = arith.mulf %116, %120 : vector<1x16xf32>
    %122 = arith.truncf %121 : vector<1x16xf32> to vector<1x16xbf16>
    %c0_44 = arith.constant 0 : index
    %c0_45 = arith.constant 0 : index
    %123 = vector.load %arg3[%c0_44, %c0_45] : memref<16x32xbf16, #tpu.memory_space<vmem>>, vector<16x32xbf16>
    %cst_46 = arith.constant dense<0.000000e+00> : vector<1x32xf32>
    %124 = tpu.matmul %122, %123, %cst_46 {dimension_numbers = #tpu.dot_dimension_numbers<[1], [0], [0], [1], [0, 0, 1, 1], [], []>} : vector<1x16xbf16>, vector<16x32xbf16>, vector<1x32xf32> -> vector<1x32xf32>
    %125 = arith.addf %111, %124 : vector<1x32xf32>
    %126 = arith.addf %125, %1 : vector<1x32xf32>
    %cst_47 = arith.constant 0.000000e+00 : f32
    %127 = vector.broadcast %cst_47 : f32 to vector<1x32xf32>
    %128 = arith.maximumf %126, %127 : vector<1x32xf32>
    %129 = tpu.concatenate %128, %86 in 1 : vector<1x32xf32>, vector<1x32xf32> -> vector<1x64xf32>
    %130 = arith.truncf %129 : vector<1x64xf32> to vector<1x64xbf16>
    %c0_48 = arith.constant 0 : index
    %c0_49 = arith.constant 0 : index
    %131 = vector.load %arg4[%c0_48, %c0_49] : memref<64x128xbf16, #tpu.memory_space<vmem>>, vector<64x128xbf16>
    %cst_50 = arith.constant dense<0.000000e+00> : vector<1x128xf32>
    %132 = tpu.matmul %130, %131, %cst_50 {dimension_numbers = #tpu.dot_dimension_numbers<[1], [0], [0], [1], [0, 0, 1, 1], [], []>} : vector<1x64xbf16>, vector<64x128xbf16>, vector<1x128xf32> -> vector<1x128xf32>
    %133 = arith.addf %132, %2 : vector<1x128xf32>
    %134 = vector.extract_strided_slice %133 {offsets = [0, 0], sizes = [1, 32], strides = [1, 1]} : vector<1x128xf32> to vector<1x32xf32>
    %135 = arith.negf %134 : vector<1x32xf32>
    %136 = math.exp %135 : vector<1x32xf32>
    %cst_51 = arith.constant 1.000000e+00 : f32
    %137 = vector.broadcast %cst_51 : f32 to vector<1x32xf32>
    %138 = arith.addf %137, %136 : vector<1x32xf32>
    %139 = arith.divf %137, %138 : vector<1x32xf32>
    %140 = vector.extract_strided_slice %133 {offsets = [0, 32], sizes = [1, 32], strides = [1, 1]} : vector<1x128xf32> to vector<1x32xf32>
    %141 = arith.negf %140 : vector<1x32xf32>
    %142 = math.exp %141 : vector<1x32xf32>
    %cst_52 = arith.constant 1.000000e+00 : f32
    %143 = vector.broadcast %cst_52 : f32 to vector<1x32xf32>
    %144 = arith.addf %143, %142 : vector<1x32xf32>
    %145 = arith.divf %143, %144 : vector<1x32xf32>
    %146 = vector.extract_strided_slice %133 {offsets = [0, 64], sizes = [1, 32], strides = [1, 1]} : vector<1x128xf32> to vector<1x32xf32>
    %147 = vector.extract_strided_slice %133 {offsets = [0, 96], sizes = [1, 32], strides = [1, 1]} : vector<1x128xf32> to vector<1x32xf32>
    %148 = arith.mulf %139, %147 : vector<1x32xf32>
    %149 = arith.addf %146, %148 : vector<1x32xf32>
    %150 = math.tanh %149 : vector<1x32xf32>
    %cst_53 = arith.constant 1.000000e+00 : f32
    %151 = vector.broadcast %cst_53 : f32 to vector<1x32xf32>
    %152 = arith.subf %151, %145 : vector<1x32xf32>
    %153 = arith.mulf %152, %150 : vector<1x32xf32>
    %154 = arith.mulf %145, %86 : vector<1x32xf32>
    %155 = arith.addf %153, %154 : vector<1x32xf32>
    %cst_54 = arith.constant 0.000000e+00 : f32
    %156 = vector.broadcast %cst_54 : f32 to vector<1x32xf32>
    %157 = arith.maximumf %155, %156 : vector<1x32xf32>
    %158 = tpu.concatenate %157, %155 in 1 : vector<1x32xf32>, vector<1x32xf32> -> vector<1x64xf32>
    %159 = arith.truncf %158 : vector<1x64xf32> to vector<1x64xbf16>
    %c0_55 = arith.constant 0 : index
    %c0_56 = arith.constant 0 : index
    %160 = vector.load %arg4[%c0_55, %c0_56] : memref<64x128xbf16, #tpu.memory_space<vmem>>, vector<64x128xbf16>
    %cst_57 = arith.constant dense<0.000000e+00> : vector<1x128xf32>
    %161 = tpu.matmul %159, %160, %cst_57 {dimension_numbers = #tpu.dot_dimension_numbers<[1], [0], [0], [1], [0, 0, 1, 1], [], []>} : vector<1x64xbf16>, vector<64x128xbf16>, vector<1x128xf32> -> vector<1x128xf32>
    %162 = arith.addf %161, %2 : vector<1x128xf32>
    %163 = vector.extract_strided_slice %162 {offsets = [0, 0], sizes = [1, 32], strides = [1, 1]} : vector<1x128xf32> to vector<1x32xf32>
    %164 = arith.negf %163 : vector<1x32xf32>
    %165 = math.exp %164 : vector<1x32xf32>
    %cst_58 = arith.constant 1.000000e+00 : f32
    %166 = vector.broadcast %cst_58 : f32 to vector<1x32xf32>
    %167 = arith.addf %166, %165 : vector<1x32xf32>
    %168 = arith.divf %166, %167 : vector<1x32xf32>
    %169 = vector.extract_strided_slice %162 {offsets = [0, 32], sizes = [1, 32], strides = [1, 1]} : vector<1x128xf32> to vector<1x32xf32>
    %170 = arith.negf %169 : vector<1x32xf32>
    %171 = math.exp %170 : vector<1x32xf32>
    %cst_59 = arith.constant 1.000000e+00 : f32
    %172 = vector.broadcast %cst_59 : f32 to vector<1x32xf32>
    %173 = arith.addf %172, %171 : vector<1x32xf32>
    %174 = arith.divf %172, %173 : vector<1x32xf32>
    %175 = vector.extract_strided_slice %162 {offsets = [0, 64], sizes = [1, 32], strides = [1, 1]} : vector<1x128xf32> to vector<1x32xf32>
    %176 = vector.extract_strided_slice %162 {offsets = [0, 96], sizes = [1, 32], strides = [1, 1]} : vector<1x128xf32> to vector<1x32xf32>
    %177 = arith.mulf %168, %176 : vector<1x32xf32>
    %178 = arith.addf %175, %177 : vector<1x32xf32>
    %179 = math.tanh %178 : vector<1x32xf32>
    %cst_60 = arith.constant 1.000000e+00 : f32
    %180 = vector.broadcast %cst_60 : f32 to vector<1x32xf32>
    %181 = arith.subf %180, %174 : vector<1x32xf32>
    %182 = arith.mulf %181, %179 : vector<1x32xf32>
    %183 = arith.mulf %174, %155 : vector<1x32xf32>
    %184 = arith.addf %182, %183 : vector<1x32xf32>
    %185 = arith.truncf %184 : vector<1x32xf32> to vector<1x32xbf16>
    %c0_61 = arith.constant 0 : index
    %c0_62 = arith.constant 0 : index
    %186 = vector.load %arg5[%c0_61, %c0_62] : memref<32x32xbf16, #tpu.memory_space<vmem>>, vector<32x32xbf16>
    %cst_63 = arith.constant dense<0.000000e+00> : vector<1x32xf32>
    %187 = tpu.matmul %185, %186, %cst_63 {dimension_numbers = #tpu.dot_dimension_numbers<[1], [0], [0], [1], [0, 0, 1, 1], [], []>} : vector<1x32xbf16>, vector<32x32xbf16>, vector<1x32xf32> -> vector<1x32xf32>
    %188 = arith.addf %187, %3 : vector<1x32xf32>
    %cst_64 = arith.constant dense<0xFF800000> : vector<1xf32>
    %189 = vector.multi_reduction <maximumf>, %188, %cst_64 [1] : vector<1x32xf32> to vector<1xf32>
    %190 = vector.shape_cast %189 : vector<1xf32> to vector<1x1xf32>
    %191 = vector.broadcast %190 : vector<1x1xf32> to vector<1x32xf32>
    %192 = arith.subf %188, %191 : vector<1x32xf32>
    %193 = math.exp %192 : vector<1x32xf32>
    %cst_65 = arith.constant dense<0.000000e+00> : vector<1xf32>
    %194 = vector.multi_reduction <add>, %193, %cst_65 [1] : vector<1x32xf32> to vector<1xf32>
    %195 = vector.shape_cast %194 : vector<1xf32> to vector<1x1xf32>
    %196 = math.log %195 : vector<1x1xf32>
    %197 = arith.addf %196, %190 : vector<1x1xf32>
    %198 = vector.broadcast %197 : vector<1x1xf32> to vector<1x32xf32>
    %199 = arith.subf %188, %198 : vector<1x32xf32>
    %200 = tpu.concatenate %199, %184, %121, %5 in 1 : vector<1x32xf32>, vector<1x32xf32>, vector<1x16xf32>, vector<1x48xf32> -> vector<1x128xf32>
    %c1_66 = arith.constant 1 : index
    %c0_67 = arith.constant 0 : index
    %201 = vector.load %arg7[%c1_66, %c0_67] : memref<8x128xf32, #tpu.memory_space<vmem>>, vector<1x128xf32>
    tpu.vector_store %arg7[%c1_66, %c0_67], %200 {strides = array<i32>} : memref<8x128xf32, #tpu.memory_space<vmem>>, vector<1x128xf32>,
    %c2_68 = arith.constant 2 : index
    %c0_69 = arith.constant 0 : index
    %202 = vector.load %arg0[%c2_68, %c0_69] : memref<8x32xf32, #tpu.memory_space<vmem>>, vector<1x32xf32>
    %203 = tpu.concatenate %202, %184 in 1 : vector<1x32xf32>, vector<1x32xf32> -> vector<1x64xf32>
    %204 = arith.truncf %203 : vector<1x64xf32> to vector<1x64xbf16>
    %c0_70 = arith.constant 0 : index
    %c0_71 = arith.constant 0 : index
    %205 = vector.load %arg2[%c0_70, %c0_71] : memref<64x48xbf16, #tpu.memory_space<vmem>>, vector<64x48xbf16>
    %cst_72 = arith.constant dense<0.000000e+00> : vector<1x48xf32>
    %206 = tpu.matmul %204, %205, %cst_72 {dimension_numbers = #tpu.dot_dimension_numbers<[1], [0], [0], [1], [0, 0, 1, 1], [], []>} : vector<1x64xbf16>, vector<64x48xbf16>, vector<1x48xf32> -> vector<1x48xf32>
    %207 = vector.extract_strided_slice %206 {offsets = [0, 0], sizes = [1, 16], strides = [1, 1]} : vector<1x48xf32> to vector<1x16xf32>
    %208 = arith.addf %207, %0 : vector<1x16xf32>
    %209 = vector.extract_strided_slice %206 {offsets = [0, 16], sizes = [1, 32], strides = [1, 1]} : vector<1x48xf32> to vector<1x32xf32>
    %cst_73 = arith.constant dense<0xFF800000> : vector<1xf32>
    %210 = vector.multi_reduction <maximumf>, %208, %cst_73 [1] : vector<1x16xf32> to vector<1xf32>
    %211 = vector.shape_cast %210 : vector<1xf32> to vector<1x1xf32>
    %212 = vector.broadcast %211 : vector<1x1xf32> to vector<1x16xf32>
    %213 = arith.subf %208, %212 : vector<1x16xf32>
    %214 = math.exp %213 : vector<1x16xf32>
    %cst_74 = arith.constant dense<0.000000e+00> : vector<1xf32>
    %215 = vector.multi_reduction <add>, %214, %cst_74 [1] : vector<1x16xf32> to vector<1xf32>
    %216 = vector.shape_cast %215 : vector<1xf32> to vector<1x1xf32>
    %217 = tpu.reciprocal %216 {approx = true} : vector<1x1xf32> -> vector<1x1xf32>
    %218 = vector.broadcast %217 : vector<1x1xf32> to vector<1x16xf32>
    %219 = arith.mulf %214, %218 : vector<1x16xf32>
    %220 = arith.truncf %219 : vector<1x16xf32> to vector<1x16xbf16>
    %c0_75 = arith.constant 0 : index
    %c0_76 = arith.constant 0 : index
    %221 = vector.load %arg3[%c0_75, %c0_76] : memref<16x32xbf16, #tpu.memory_space<vmem>>, vector<16x32xbf16>
    %cst_77 = arith.constant dense<0.000000e+00> : vector<1x32xf32>
    %222 = tpu.matmul %220, %221, %cst_77 {dimension_numbers = #tpu.dot_dimension_numbers<[1], [0], [0], [1], [0, 0, 1, 1], [], []>} : vector<1x16xbf16>, vector<16x32xbf16>, vector<1x32xf32> -> vector<1x32xf32>
    %223 = arith.addf %209, %222 : vector<1x32xf32>
    %224 = arith.addf %223, %1 : vector<1x32xf32>
    %cst_78 = arith.constant 0.000000e+00 : f32
    %225 = vector.broadcast %cst_78 : f32 to vector<1x32xf32>
    %226 = arith.maximumf %224, %225 : vector<1x32xf32>
    %227 = tpu.concatenate %226, %184 in 1 : vector<1x32xf32>, vector<1x32xf32> -> vector<1x64xf32>
    %228 = arith.truncf %227 : vector<1x64xf32> to vector<1x64xbf16>
    %c0_79 = arith.constant 0 : index
    %c0_80 = arith.constant 0 : index
    %229 = vector.load %arg4[%c0_79, %c0_80] : memref<64x128xbf16, #tpu.memory_space<vmem>>, vector<64x128xbf16>
    %cst_81 = arith.constant dense<0.000000e+00> : vector<1x128xf32>
    %230 = tpu.matmul %228, %229, %cst_81 {dimension_numbers = #tpu.dot_dimension_numbers<[1], [0], [0], [1], [0, 0, 1, 1], [], []>} : vector<1x64xbf16>, vector<64x128xbf16>, vector<1x128xf32> -> vector<1x128xf32>
    %231 = arith.addf %230, %2 : vector<1x128xf32>
    %232 = vector.extract_strided_slice %231 {offsets = [0, 0], sizes = [1, 32], strides = [1, 1]} : vector<1x128xf32> to vector<1x32xf32>
    %233 = arith.negf %232 : vector<1x32xf32>
    %234 = math.exp %233 : vector<1x32xf32>
    %cst_82 = arith.constant 1.000000e+00 : f32
    %235 = vector.broadcast %cst_82 : f32 to vector<1x32xf32>
    %236 = arith.addf %235, %234 : vector<1x32xf32>
    %237 = arith.divf %235, %236 : vector<1x32xf32>
    %238 = vector.extract_strided_slice %231 {offsets = [0, 32], sizes = [1, 32], strides = [1, 1]} : vector<1x128xf32> to vector<1x32xf32>
    %239 = arith.negf %238 : vector<1x32xf32>
    %240 = math.exp %239 : vector<1x32xf32>
    %cst_83 = arith.constant 1.000000e+00 : f32
    %241 = vector.broadcast %cst_83 : f32 to vector<1x32xf32>
    %242 = arith.addf %241, %240 : vector<1x32xf32>
    %243 = arith.divf %241, %242 : vector<1x32xf32>
    %244 = vector.extract_strided_slice %231 {offsets = [0, 64], sizes = [1, 32], strides = [1, 1]} : vector<1x128xf32> to vector<1x32xf32>
    %245 = vector.extract_strided_slice %231 {offsets = [0, 96], sizes = [1, 32], strides = [1, 1]} : vector<1x128xf32> to vector<1x32xf32>
    %246 = arith.mulf %237, %245 : vector<1x32xf32>
    %247 = arith.addf %244, %246 : vector<1x32xf32>
    %248 = math.tanh %247 : vector<1x32xf32>
    %cst_84 = arith.constant 1.000000e+00 : f32
    %249 = vector.broadcast %cst_84 : f32 to vector<1x32xf32>
    %250 = arith.subf %249, %243 : vector<1x32xf32>
    %251 = arith.mulf %250, %248 : vector<1x32xf32>
    %252 = arith.mulf %243, %184 : vector<1x32xf32>
    %253 = arith.addf %251, %252 : vector<1x32xf32>
    %cst_85 = arith.constant 0.000000e+00 : f32
    %254 = vector.broadcast %cst_85 : f32 to vector<1x32xf32>
    %255 = arith.maximumf %253, %254 : vector<1x32xf32>
    %256 = tpu.concatenate %255, %253 in 1 : vector<1x32xf32>, vector<1x32xf32> -> vector<1x64xf32>
    %257 = arith.truncf %256 : vector<1x64xf32> to vector<1x64xbf16>
    %c0_86 = arith.constant 0 : index
    %c0_87 = arith.constant 0 : index
    %258 = vector.load %arg4[%c0_86, %c0_87] : memref<64x128xbf16, #tpu.memory_space<vmem>>, vector<64x128xbf16>
    %cst_88 = arith.constant dense<0.000000e+00> : vector<1x128xf32>
    %259 = tpu.matmul %257, %258, %cst_88 {dimension_numbers = #tpu.dot_dimension_numbers<[1], [0], [0], [1], [0, 0, 1, 1], [], []>} : vector<1x64xbf16>, vector<64x128xbf16>, vector<1x128xf32> -> vector<1x128xf32>
    %260 = arith.addf %259, %2 : vector<1x128xf32>
    %261 = vector.extract_strided_slice %260 {offsets = [0, 0], sizes = [1, 32], strides = [1, 1]} : vector<1x128xf32> to vector<1x32xf32>
    %262 = arith.negf %261 : vector<1x32xf32>
    %263 = math.exp %262 : vector<1x32xf32>
    %cst_89 = arith.constant 1.000000e+00 : f32
    %264 = vector.broadcast %cst_89 : f32 to vector<1x32xf32>
    %265 = arith.addf %264, %263 : vector<1x32xf32>
    %266 = arith.divf %264, %265 : vector<1x32xf32>
    %267 = vector.extract_strided_slice %260 {offsets = [0, 32], sizes = [1, 32], strides = [1, 1]} : vector<1x128xf32> to vector<1x32xf32>
    %268 = arith.negf %267 : vector<1x32xf32>
    %269 = math.exp %268 : vector<1x32xf32>
    %cst_90 = arith.constant 1.000000e+00 : f32
    %270 = vector.broadcast %cst_90 : f32 to vector<1x32xf32>
    %271 = arith.addf %270, %269 : vector<1x32xf32>
    %272 = arith.divf %270, %271 : vector<1x32xf32>
    %273 = vector.extract_strided_slice %260 {offsets = [0, 64], sizes = [1, 32], strides = [1, 1]} : vector<1x128xf32> to vector<1x32xf32>
    %274 = vector.extract_strided_slice %260 {offsets = [0, 96], sizes = [1, 32], strides = [1, 1]} : vector<1x128xf32> to vector<1x32xf32>
    %275 = arith.mulf %266, %274 : vector<1x32xf32>
    %276 = arith.addf %273, %275 : vector<1x32xf32>
    %277 = math.tanh %276 : vector<1x32xf32>
    %cst_91 = arith.constant 1.000000e+00 : f32
    %278 = vector.broadcast %cst_91 : f32 to vector<1x32xf32>
    %279 = arith.subf %278, %272 : vector<1x32xf32>
    %280 = arith.mulf %279, %277 : vector<1x32xf32>
    %281 = arith.mulf %272, %253 : vector<1x32xf32>
    %282 = arith.addf %280, %281 : vector<1x32xf32>
    %283 = arith.truncf %282 : vector<1x32xf32> to vector<1x32xbf16>
    %c0_92 = arith.constant 0 : index
    %c0_93 = arith.constant 0 : index
    %284 = vector.load %arg5[%c0_92, %c0_93] : memref<32x32xbf16, #tpu.memory_space<vmem>>, vector<32x32xbf16>
    %cst_94 = arith.constant dense<0.000000e+00> : vector<1x32xf32>
    %285 = tpu.matmul %283, %284, %cst_94 {dimension_numbers = #tpu.dot_dimension_numbers<[1], [0], [0], [1], [0, 0, 1, 1], [], []>} : vector<1x32xbf16>, vector<32x32xbf16>, vector<1x32xf32> -> vector<1x32xf32>
    %286 = arith.addf %285, %3 : vector<1x32xf32>
    %cst_95 = arith.constant dense<0xFF800000> : vector<1xf32>
    %287 = vector.multi_reduction <maximumf>, %286, %cst_95 [1] : vector<1x32xf32> to vector<1xf32>
    %288 = vector.shape_cast %287 : vector<1xf32> to vector<1x1xf32>
    %289 = vector.broadcast %288 : vector<1x1xf32> to vector<1x32xf32>
    %290 = arith.subf %286, %289 : vector<1x32xf32>
    %291 = math.exp %290 : vector<1x32xf32>
    %cst_96 = arith.constant dense<0.000000e+00> : vector<1xf32>
    %292 = vector.multi_reduction <add>, %291, %cst_96 [1] : vector<1x32xf32> to vector<1xf32>
    %293 = vector.shape_cast %292 : vector<1xf32> to vector<1x1xf32>
    %294 = math.log %293 : vector<1x1xf32>
    %295 = arith.addf %294, %288 : vector<1x1xf32>
    %296 = vector.broadcast %295 : vector<1x1xf32> to vector<1x32xf32>
    %297 = arith.subf %286, %296 : vector<1x32xf32>
    %298 = tpu.concatenate %297, %282, %219, %5 in 1 : vector<1x32xf32>, vector<1x32xf32>, vector<1x16xf32>, vector<1x48xf32> -> vector<1x128xf32>
    %c2_97 = arith.constant 2 : index
    %c0_98 = arith.constant 0 : index
    %299 = vector.load %arg7[%c2_97, %c0_98] : memref<8x128xf32, #tpu.memory_space<vmem>>, vector<1x128xf32>
    tpu.vector_store %arg7[%c2_97, %c0_98], %298 {strides = array<i32>} : memref<8x128xf32, #tpu.memory_space<vmem>>, vector<1x128xf32>,
    %c3_99 = arith.constant 3 : index
    %c0_100 = arith.constant 0 : index
    %300 = vector.load %arg0[%c3_99, %c0_100] : memref<8x32xf32, #tpu.memory_space<vmem>>, vector<1x32xf32>
    %301 = tpu.concatenate %300, %282 in 1 : vector<1x32xf32>, vector<1x32xf32> -> vector<1x64xf32>
    %302 = arith.truncf %301 : vector<1x64xf32> to vector<1x64xbf16>
    %c0_101 = arith.constant 0 : index
    %c0_102 = arith.constant 0 : index
    %303 = vector.load %arg2[%c0_101, %c0_102] : memref<64x48xbf16, #tpu.memory_space<vmem>>, vector<64x48xbf16>
    %cst_103 = arith.constant dense<0.000000e+00> : vector<1x48xf32>
    %304 = tpu.matmul %302, %303, %cst_103 {dimension_numbers = #tpu.dot_dimension_numbers<[1], [0], [0], [1], [0, 0, 1, 1], [], []>} : vector<1x64xbf16>, vector<64x48xbf16>, vector<1x48xf32> -> vector<1x48xf32>
    %305 = vector.extract_strided_slice %304 {offsets = [0, 0], sizes = [1, 16], strides = [1, 1]} : vector<1x48xf32> to vector<1x16xf32>
    %306 = arith.addf %305, %0 : vector<1x16xf32>
    %307 = vector.extract_strided_slice %304 {offsets = [0, 16], sizes = [1, 32], strides = [1, 1]} : vector<1x48xf32> to vector<1x32xf32>
    %cst_104 = arith.constant dense<0xFF800000> : vector<1xf32>
    %308 = vector.multi_reduction <maximumf>, %306, %cst_104 [1] : vector<1x16xf32> to vector<1xf32>
    %309 = vector.shape_cast %308 : vector<1xf32> to vector<1x1xf32>
    %310 = vector.broadcast %309 : vector<1x1xf32> to vector<1x16xf32>
    %311 = arith.subf %306, %310 : vector<1x16xf32>
    %312 = math.exp %311 : vector<1x16xf32>
    %cst_105 = arith.constant dense<0.000000e+00> : vector<1xf32>
    %313 = vector.multi_reduction <add>, %312, %cst_105 [1] : vector<1x16xf32> to vector<1xf32>
    %314 = vector.shape_cast %313 : vector<1xf32> to vector<1x1xf32>
    %315 = tpu.reciprocal %314 {approx = true} : vector<1x1xf32> -> vector<1x1xf32>
    %316 = vector.broadcast %315 : vector<1x1xf32> to vector<1x16xf32>
    %317 = arith.mulf %312, %316 : vector<1x16xf32>
    %318 = arith.truncf %317 : vector<1x16xf32> to vector<1x16xbf16>
    %c0_106 = arith.constant 0 : index
    %c0_107 = arith.constant 0 : index
    %319 = vector.load %arg3[%c0_106, %c0_107] : memref<16x32xbf16, #tpu.memory_space<vmem>>, vector<16x32xbf16>
    %cst_108 = arith.constant dense<0.000000e+00> : vector<1x32xf32>
    %320 = tpu.matmul %318, %319, %cst_108 {dimension_numbers = #tpu.dot_dimension_numbers<[1], [0], [0], [1], [0, 0, 1, 1], [], []>} : vector<1x16xbf16>, vector<16x32xbf16>, vector<1x32xf32> -> vector<1x32xf32>
    %321 = arith.addf %307, %320 : vector<1x32xf32>
    %322 = arith.addf %321, %1 : vector<1x32xf32>
    %cst_109 = arith.constant 0.000000e+00 : f32
    %323 = vector.broadcast %cst_109 : f32 to vector<1x32xf32>
    %324 = arith.maximumf %322, %323 : vector<1x32xf32>
    %325 = tpu.concatenate %324, %282 in 1 : vector<1x32xf32>, vector<1x32xf32> -> vector<1x64xf32>
    %326 = arith.truncf %325 : vector<1x64xf32> to vector<1x64xbf16>
    %c0_110 = arith.constant 0 : index
    %c0_111 = arith.constant 0 : index
    %327 = vector.load %arg4[%c0_110, %c0_111] : memref<64x128xbf16, #tpu.memory_space<vmem>>, vector<64x128xbf16>
    %cst_112 = arith.constant dense<0.000000e+00> : vector<1x128xf32>
    %328 = tpu.matmul %326, %327, %cst_112 {dimension_numbers = #tpu.dot_dimension_numbers<[1], [0], [0], [1], [0, 0, 1, 1], [], []>} : vector<1x64xbf16>, vector<64x128xbf16>, vector<1x128xf32> -> vector<1x128xf32>
    %329 = arith.addf %328, %2 : vector<1x128xf32>
    %330 = vector.extract_strided_slice %329 {offsets = [0, 0], sizes = [1, 32], strides = [1, 1]} : vector<1x128xf32> to vector<1x32xf32>
    %331 = arith.negf %330 : vector<1x32xf32>
    %332 = math.exp %331 : vector<1x32xf32>
    %cst_113 = arith.constant 1.000000e+00 : f32
    %333 = vector.broadcast %cst_113 : f32 to vector<1x32xf32>
    %334 = arith.addf %333, %332 : vector<1x32xf32>
    %335 = arith.divf %333, %334 : vector<1x32xf32>
    %336 = vector.extract_strided_slice %329 {offsets = [0, 32], sizes = [1, 32], strides = [1, 1]} : vector<1x128xf32> to vector<1x32xf32>
    %337 = arith.negf %336 : vector<1x32xf32>
    %338 = math.exp %337 : vector<1x32xf32>
    %cst_114 = arith.constant 1.000000e+00 : f32
    %339 = vector.broadcast %cst_114 : f32 to vector<1x32xf32>
    %340 = arith.addf %339, %338 : vector<1x32xf32>
    %341 = arith.divf %339, %340 : vector<1x32xf32>
    %342 = vector.extract_strided_slice %329 {offsets = [0, 64], sizes = [1, 32], strides = [1, 1]} : vector<1x128xf32> to vector<1x32xf32>
    %343 = vector.extract_strided_slice %329 {offsets = [0, 96], sizes = [1, 32], strides = [1, 1]} : vector<1x128xf32> to vector<1x32xf32>
    %344 = arith.mulf %335, %343 : vector<1x32xf32>
    %345 = arith.addf %342, %344 : vector<1x32xf32>
    %346 = math.tanh %345 : vector<1x32xf32>
    %cst_115 = arith.constant 1.000000e+00 : f32
    %347 = vector.broadcast %cst_115 : f32 to vector<1x32xf32>
    %348 = arith.subf %347, %341 : vector<1x32xf32>
    %349 = arith.mulf %348, %346 : vector<1x32xf32>
    %350 = arith.mulf %341, %282 : vector<1x32xf32>
    %351 = arith.addf %349, %350 : vector<1x32xf32>
    %cst_116 = arith.constant 0.000000e+00 : f32
    %352 = vector.broadcast %cst_116 : f32 to vector<1x32xf32>
    %353 = arith.maximumf %351, %352 : vector<1x32xf32>
    %354 = tpu.concatenate %353, %351 in 1 : vector<1x32xf32>, vector<1x32xf32> -> vector<1x64xf32>
    %355 = arith.truncf %354 : vector<1x64xf32> to vector<1x64xbf16>
    %c0_117 = arith.constant 0 : index
    %c0_118 = arith.constant 0 : index
    %356 = vector.load %arg4[%c0_117, %c0_118] : memref<64x128xbf16, #tpu.memory_space<vmem>>, vector<64x128xbf16>
    %cst_119 = arith.constant dense<0.000000e+00> : vector<1x128xf32>
    %357 = tpu.matmul %355, %356, %cst_119 {dimension_numbers = #tpu.dot_dimension_numbers<[1], [0], [0], [1], [0, 0, 1, 1], [], []>} : vector<1x64xbf16>, vector<64x128xbf16>, vector<1x128xf32> -> vector<1x128xf32>
    %358 = arith.addf %357, %2 : vector<1x128xf32>
    %359 = vector.extract_strided_slice %358 {offsets = [0, 0], sizes = [1, 32], strides = [1, 1]} : vector<1x128xf32> to vector<1x32xf32>
    %360 = arith.negf %359 : vector<1x32xf32>
    %361 = math.exp %360 : vector<1x32xf32>
    %cst_120 = arith.constant 1.000000e+00 : f32
    %362 = vector.broadcast %cst_120 : f32 to vector<1x32xf32>
    %363 = arith.addf %362, %361 : vector<1x32xf32>
    %364 = arith.divf %362, %363 : vector<1x32xf32>
    %365 = vector.extract_strided_slice %358 {offsets = [0, 32], sizes = [1, 32], strides = [1, 1]} : vector<1x128xf32> to vector<1x32xf32>
    %366 = arith.negf %365 : vector<1x32xf32>
    %367 = math.exp %366 : vector<1x32xf32>
    %cst_121 = arith.constant 1.000000e+00 : f32
    %368 = vector.broadcast %cst_121 : f32 to vector<1x32xf32>
    %369 = arith.addf %368, %367 : vector<1x32xf32>
    %370 = arith.divf %368, %369 : vector<1x32xf32>
    %371 = vector.extract_strided_slice %358 {offsets = [0, 64], sizes = [1, 32], strides = [1, 1]} : vector<1x128xf32> to vector<1x32xf32>
    %372 = vector.extract_strided_slice %358 {offsets = [0, 96], sizes = [1, 32], strides = [1, 1]} : vector<1x128xf32> to vector<1x32xf32>
    %373 = arith.mulf %364, %372 : vector<1x32xf32>
    %374 = arith.addf %371, %373 : vector<1x32xf32>
    %375 = math.tanh %374 : vector<1x32xf32>
    %cst_122 = arith.constant 1.000000e+00 : f32
    %376 = vector.broadcast %cst_122 : f32 to vector<1x32xf32>
    %377 = arith.subf %376, %370 : vector<1x32xf32>
    %378 = arith.mulf %377, %375 : vector<1x32xf32>
    %379 = arith.mulf %370, %351 : vector<1x32xf32>
    %380 = arith.addf %378, %379 : vector<1x32xf32>
    %381 = arith.truncf %380 : vector<1x32xf32> to vector<1x32xbf16>
    %c0_123 = arith.constant 0 : index
    %c0_124 = arith.constant 0 : index
    %382 = vector.load %arg5[%c0_123, %c0_124] : memref<32x32xbf16, #tpu.memory_space<vmem>>, vector<32x32xbf16>
    %cst_125 = arith.constant dense<0.000000e+00> : vector<1x32xf32>
    %383 = tpu.matmul %381, %382, %cst_125 {dimension_numbers = #tpu.dot_dimension_numbers<[1], [0], [0], [1], [0, 0, 1, 1], [], []>} : vector<1x32xbf16>, vector<32x32xbf16>, vector<1x32xf32> -> vector<1x32xf32>
    %384 = arith.addf %383, %3 : vector<1x32xf32>
    %cst_126 = arith.constant dense<0xFF800000> : vector<1xf32>
    %385 = vector.multi_reduction <maximumf>, %384, %cst_126 [1] : vector<1x32xf32> to vector<1xf32>
    %386 = vector.shape_cast %385 : vector<1xf32> to vector<1x1xf32>
    %387 = vector.broadcast %386 : vector<1x1xf32> to vector<1x32xf32>
    %388 = arith.subf %384, %387 : vector<1x32xf32>
    %389 = math.exp %388 : vector<1x32xf32>
    %cst_127 = arith.constant dense<0.000000e+00> : vector<1xf32>
    %390 = vector.multi_reduction <add>, %389, %cst_127 [1] : vector<1x32xf32> to vector<1xf32>
    %391 = vector.shape_cast %390 : vector<1xf32> to vector<1x1xf32>
    %392 = math.log %391 : vector<1x1xf32>
    %393 = arith.addf %392, %386 : vector<1x1xf32>
    %394 = vector.broadcast %393 : vector<1x1xf32> to vector<1x32xf32>
    %395 = arith.subf %384, %394 : vector<1x32xf32>
    %396 = tpu.concatenate %395, %380, %317, %5 in 1 : vector<1x32xf32>, vector<1x32xf32>, vector<1x16xf32>, vector<1x48xf32> -> vector<1x128xf32>
    %c3_128 = arith.constant 3 : index
    %c0_129 = arith.constant 0 : index
    %397 = vector.load %arg7[%c3_128, %c0_129] : memref<8x128xf32, #tpu.memory_space<vmem>>, vector<1x128xf32>
    tpu.vector_store %arg7[%c3_128, %c0_129], %396 {strides = array<i32>} : memref<8x128xf32, #tpu.memory_space<vmem>>, vector<1x128xf32>,
    %c4 = arith.constant 4 : index
    %c0_130 = arith.constant 0 : index
    %398 = vector.load %arg0[%c4, %c0_130] : memref<8x32xf32, #tpu.memory_space<vmem>>, vector<1x32xf32>
    %399 = tpu.concatenate %398, %380 in 1 : vector<1x32xf32>, vector<1x32xf32> -> vector<1x64xf32>
    %400 = arith.truncf %399 : vector<1x64xf32> to vector<1x64xbf16>
    %c0_131 = arith.constant 0 : index
    %c0_132 = arith.constant 0 : index
    %401 = vector.load %arg2[%c0_131, %c0_132] : memref<64x48xbf16, #tpu.memory_space<vmem>>, vector<64x48xbf16>
    %cst_133 = arith.constant dense<0.000000e+00> : vector<1x48xf32>
    %402 = tpu.matmul %400, %401, %cst_133 {dimension_numbers = #tpu.dot_dimension_numbers<[1], [0], [0], [1], [0, 0, 1, 1], [], []>} : vector<1x64xbf16>, vector<64x48xbf16>, vector<1x48xf32> -> vector<1x48xf32>
    %403 = vector.extract_strided_slice %402 {offsets = [0, 0], sizes = [1, 16], strides = [1, 1]} : vector<1x48xf32> to vector<1x16xf32>
    %404 = arith.addf %403, %0 : vector<1x16xf32>
    %405 = vector.extract_strided_slice %402 {offsets = [0, 16], sizes = [1, 32], strides = [1, 1]} : vector<1x48xf32> to vector<1x32xf32>
    %cst_134 = arith.constant dense<0xFF800000> : vector<1xf32>
    %406 = vector.multi_reduction <maximumf>, %404, %cst_134 [1] : vector<1x16xf32> to vector<1xf32>
    %407 = vector.shape_cast %406 : vector<1xf32> to vector<1x1xf32>
    %408 = vector.broadcast %407 : vector<1x1xf32> to vector<1x16xf32>
    %409 = arith.subf %404, %408 : vector<1x16xf32>
    %410 = math.exp %409 : vector<1x16xf32>
    %cst_135 = arith.constant dense<0.000000e+00> : vector<1xf32>
    %411 = vector.multi_reduction <add>, %410, %cst_135 [1] : vector<1x16xf32> to vector<1xf32>
    %412 = vector.shape_cast %411 : vector<1xf32> to vector<1x1xf32>
    %413 = tpu.reciprocal %412 {approx = true} : vector<1x1xf32> -> vector<1x1xf32>
    %414 = vector.broadcast %413 : vector<1x1xf32> to vector<1x16xf32>
    %415 = arith.mulf %410, %414 : vector<1x16xf32>
    %416 = arith.truncf %415 : vector<1x16xf32> to vector<1x16xbf16>
    %c0_136 = arith.constant 0 : index
    %c0_137 = arith.constant 0 : index
    %417 = vector.load %arg3[%c0_136, %c0_137] : memref<16x32xbf16, #tpu.memory_space<vmem>>, vector<16x32xbf16>
    %cst_138 = arith.constant dense<0.000000e+00> : vector<1x32xf32>
    %418 = tpu.matmul %416, %417, %cst_138 {dimension_numbers = #tpu.dot_dimension_numbers<[1], [0], [0], [1], [0, 0, 1, 1], [], []>} : vector<1x16xbf16>, vector<16x32xbf16>, vector<1x32xf32> -> vector<1x32xf32>
    %419 = arith.addf %405, %418 : vector<1x32xf32>
    %420 = arith.addf %419, %1 : vector<1x32xf32>
    %cst_139 = arith.constant 0.000000e+00 : f32
    %421 = vector.broadcast %cst_139 : f32 to vector<1x32xf32>
    %422 = arith.maximumf %420, %421 : vector<1x32xf32>
    %423 = tpu.concatenate %422, %380 in 1 : vector<1x32xf32>, vector<1x32xf32> -> vector<1x64xf32>
    %424 = arith.truncf %423 : vector<1x64xf32> to vector<1x64xbf16>
    %c0_140 = arith.constant 0 : index
    %c0_141 = arith.constant 0 : index
    %425 = vector.load %arg4[%c0_140, %c0_141] : memref<64x128xbf16, #tpu.memory_space<vmem>>, vector<64x128xbf16>
    %cst_142 = arith.constant dense<0.000000e+00> : vector<1x128xf32>
    %426 = tpu.matmul %424, %425, %cst_142 {dimension_numbers = #tpu.dot_dimension_numbers<[1], [0], [0], [1], [0, 0, 1, 1], [], []>} : vector<1x64xbf16>, vector<64x128xbf16>, vector<1x128xf32> -> vector<1x128xf32>
    %427 = arith.addf %426, %2 : vector<1x128xf32>
    %428 = vector.extract_strided_slice %427 {offsets = [0, 0], sizes = [1, 32], strides = [1, 1]} : vector<1x128xf32> to vector<1x32xf32>
    %429 = arith.negf %428 : vector<1x32xf32>
    %430 = math.exp %429 : vector<1x32xf32>
    %cst_143 = arith.constant 1.000000e+00 : f32
    %431 = vector.broadcast %cst_143 : f32 to vector<1x32xf32>
    %432 = arith.addf %431, %430 : vector<1x32xf32>
    %433 = arith.divf %431, %432 : vector<1x32xf32>
    %434 = vector.extract_strided_slice %427 {offsets = [0, 32], sizes = [1, 32], strides = [1, 1]} : vector<1x128xf32> to vector<1x32xf32>
    %435 = arith.negf %434 : vector<1x32xf32>
    %436 = math.exp %435 : vector<1x32xf32>
    %cst_144 = arith.constant 1.000000e+00 : f32
    %437 = vector.broadcast %cst_144 : f32 to vector<1x32xf32>
    %438 = arith.addf %437, %436 : vector<1x32xf32>
    %439 = arith.divf %437, %438 : vector<1x32xf32>
    %440 = vector.extract_strided_slice %427 {offsets = [0, 64], sizes = [1, 32], strides = [1, 1]} : vector<1x128xf32> to vector<1x32xf32>
    %441 = vector.extract_strided_slice %427 {offsets = [0, 96], sizes = [1, 32], strides = [1, 1]} : vector<1x128xf32> to vector<1x32xf32>
    %442 = arith.mulf %433, %441 : vector<1x32xf32>
    %443 = arith.addf %440, %442 : vector<1x32xf32>
    %444 = math.tanh %443 : vector<1x32xf32>
    %cst_145 = arith.constant 1.000000e+00 : f32
    %445 = vector.broadcast %cst_145 : f32 to vector<1x32xf32>
    %446 = arith.subf %445, %439 : vector<1x32xf32>
    %447 = arith.mulf %446, %444 : vector<1x32xf32>
    %448 = arith.mulf %439, %380 : vector<1x32xf32>
    %449 = arith.addf %447, %448 : vector<1x32xf32>
    %cst_146 = arith.constant 0.000000e+00 : f32
    %450 = vector.broadcast %cst_146 : f32 to vector<1x32xf32>
    %451 = arith.maximumf %449, %450 : vector<1x32xf32>
    %452 = tpu.concatenate %451, %449 in 1 : vector<1x32xf32>, vector<1x32xf32> -> vector<1x64xf32>
    %453 = arith.truncf %452 : vector<1x64xf32> to vector<1x64xbf16>
    %c0_147 = arith.constant 0 : index
    %c0_148 = arith.constant 0 : index
    %454 = vector.load %arg4[%c0_147, %c0_148] : memref<64x128xbf16, #tpu.memory_space<vmem>>, vector<64x128xbf16>
    %cst_149 = arith.constant dense<0.000000e+00> : vector<1x128xf32>
    %455 = tpu.matmul %453, %454, %cst_149 {dimension_numbers = #tpu.dot_dimension_numbers<[1], [0], [0], [1], [0, 0, 1, 1], [], []>} : vector<1x64xbf16>, vector<64x128xbf16>, vector<1x128xf32> -> vector<1x128xf32>
    %456 = arith.addf %455, %2 : vector<1x128xf32>
    %457 = vector.extract_strided_slice %456 {offsets = [0, 0], sizes = [1, 32], strides = [1, 1]} : vector<1x128xf32> to vector<1x32xf32>
    %458 = arith.negf %457 : vector<1x32xf32>
    %459 = math.exp %458 : vector<1x32xf32>
    %cst_150 = arith.constant 1.000000e+00 : f32
    %460 = vector.broadcast %cst_150 : f32 to vector<1x32xf32>
    %461 = arith.addf %460, %459 : vector<1x32xf32>
    %462 = arith.divf %460, %461 : vector<1x32xf32>
    %463 = vector.extract_strided_slice %456 {offsets = [0, 32], sizes = [1, 32], strides = [1, 1]} : vector<1x128xf32> to vector<1x32xf32>
    %464 = arith.negf %463 : vector<1x32xf32>
    %465 = math.exp %464 : vector<1x32xf32>
    %cst_151 = arith.constant 1.000000e+00 : f32
    %466 = vector.broadcast %cst_151 : f32 to vector<1x32xf32>
    %467 = arith.addf %466, %465 : vector<1x32xf32>
    %468 = arith.divf %466, %467 : vector<1x32xf32>
    %469 = vector.extract_strided_slice %456 {offsets = [0, 64], sizes = [1, 32], strides = [1, 1]} : vector<1x128xf32> to vector<1x32xf32>
    %470 = vector.extract_strided_slice %456 {offsets = [0, 96], sizes = [1, 32], strides = [1, 1]} : vector<1x128xf32> to vector<1x32xf32>
    %471 = arith.mulf %462, %470 : vector<1x32xf32>
    %472 = arith.addf %469, %471 : vector<1x32xf32>
    %473 = math.tanh %472 : vector<1x32xf32>
    %cst_152 = arith.constant 1.000000e+00 : f32
    %474 = vector.broadcast %cst_152 : f32 to vector<1x32xf32>
    %475 = arith.subf %474, %468 : vector<1x32xf32>
    %476 = arith.mulf %475, %473 : vector<1x32xf32>
    %477 = arith.mulf %468, %449 : vector<1x32xf32>
    %478 = arith.addf %476, %477 : vector<1x32xf32>
    %479 = arith.truncf %478 : vector<1x32xf32> to vector<1x32xbf16>
    %c0_153 = arith.constant 0 : index
    %c0_154 = arith.constant 0 : index
    %480 = vector.load %arg5[%c0_153, %c0_154] : memref<32x32xbf16, #tpu.memory_space<vmem>>, vector<32x32xbf16>
    %cst_155 = arith.constant dense<0.000000e+00> : vector<1x32xf32>
    %481 = tpu.matmul %479, %480, %cst_155 {dimension_numbers = #tpu.dot_dimension_numbers<[1], [0], [0], [1], [0, 0, 1, 1], [], []>} : vector<1x32xbf16>, vector<32x32xbf16>, vector<1x32xf32> -> vector<1x32xf32>
    %482 = arith.addf %481, %3 : vector<1x32xf32>
    %cst_156 = arith.constant dense<0xFF800000> : vector<1xf32>
    %483 = vector.multi_reduction <maximumf>, %482, %cst_156 [1] : vector<1x32xf32> to vector<1xf32>
    %484 = vector.shape_cast %483 : vector<1xf32> to vector<1x1xf32>
    %485 = vector.broadcast %484 : vector<1x1xf32> to vector<1x32xf32>
    %486 = arith.subf %482, %485 : vector<1x32xf32>
    %487 = math.exp %486 : vector<1x32xf32>
    %cst_157 = arith.constant dense<0.000000e+00> : vector<1xf32>
    %488 = vector.multi_reduction <add>, %487, %cst_157 [1] : vector<1x32xf32> to vector<1xf32>
    %489 = vector.shape_cast %488 : vector<1xf32> to vector<1x1xf32>
    %490 = math.log %489 : vector<1x1xf32>
    %491 = arith.addf %490, %484 : vector<1x1xf32>
    %492 = vector.broadcast %491 : vector<1x1xf32> to vector<1x32xf32>
    %493 = arith.subf %482, %492 : vector<1x32xf32>
    %494 = tpu.concatenate %493, %478, %415, %5 in 1 : vector<1x32xf32>, vector<1x32xf32>, vector<1x16xf32>, vector<1x48xf32> -> vector<1x128xf32>
    %c4_158 = arith.constant 4 : index
    %c0_159 = arith.constant 0 : index
    %495 = vector.load %arg7[%c4_158, %c0_159] : memref<8x128xf32, #tpu.memory_space<vmem>>, vector<1x128xf32>
    tpu.vector_store %arg7[%c4_158, %c0_159], %494 {strides = array<i32>} : memref<8x128xf32, #tpu.memory_space<vmem>>, vector<1x128xf32>,
    %c5 = arith.constant 5 : index
    %c0_160 = arith.constant 0 : index
    %496 = vector.load %arg0[%c5, %c0_160] : memref<8x32xf32, #tpu.memory_space<vmem>>, vector<1x32xf32>
    %497 = tpu.concatenate %496, %478 in 1 : vector<1x32xf32>, vector<1x32xf32> -> vector<1x64xf32>
    %498 = arith.truncf %497 : vector<1x64xf32> to vector<1x64xbf16>
    %c0_161 = arith.constant 0 : index
    %c0_162 = arith.constant 0 : index
    %499 = vector.load %arg2[%c0_161, %c0_162] : memref<64x48xbf16, #tpu.memory_space<vmem>>, vector<64x48xbf16>
    %cst_163 = arith.constant dense<0.000000e+00> : vector<1x48xf32>
    %500 = tpu.matmul %498, %499, %cst_163 {dimension_numbers = #tpu.dot_dimension_numbers<[1], [0], [0], [1], [0, 0, 1, 1], [], []>} : vector<1x64xbf16>, vector<64x48xbf16>, vector<1x48xf32> -> vector<1x48xf32>
    %501 = vector.extract_strided_slice %500 {offsets = [0, 0], sizes = [1, 16], strides = [1, 1]} : vector<1x48xf32> to vector<1x16xf32>
    %502 = arith.addf %501, %0 : vector<1x16xf32>
    %503 = vector.extract_strided_slice %500 {offsets = [0, 16], sizes = [1, 32], strides = [1, 1]} : vector<1x48xf32> to vector<1x32xf32>
    %cst_164 = arith.constant dense<0xFF800000> : vector<1xf32>
    %504 = vector.multi_reduction <maximumf>, %502, %cst_164 [1] : vector<1x16xf32> to vector<1xf32>
    %505 = vector.shape_cast %504 : vector<1xf32> to vector<1x1xf32>
    %506 = vector.broadcast %505 : vector<1x1xf32> to vector<1x16xf32>
    %507 = arith.subf %502, %506 : vector<1x16xf32>
    %508 = math.exp %507 : vector<1x16xf32>
    %cst_165 = arith.constant dense<0.000000e+00> : vector<1xf32>
    %509 = vector.multi_reduction <add>, %508, %cst_165 [1] : vector<1x16xf32> to vector<1xf32>
    %510 = vector.shape_cast %509 : vector<1xf32> to vector<1x1xf32>
    %511 = tpu.reciprocal %510 {approx = true} : vector<1x1xf32> -> vector<1x1xf32>
    %512 = vector.broadcast %511 : vector<1x1xf32> to vector<1x16xf32>
    %513 = arith.mulf %508, %512 : vector<1x16xf32>
    %514 = arith.truncf %513 : vector<1x16xf32> to vector<1x16xbf16>
    %c0_166 = arith.constant 0 : index
    %c0_167 = arith.constant 0 : index
    %515 = vector.load %arg3[%c0_166, %c0_167] : memref<16x32xbf16, #tpu.memory_space<vmem>>, vector<16x32xbf16>
    %cst_168 = arith.constant dense<0.000000e+00> : vector<1x32xf32>
    %516 = tpu.matmul %514, %515, %cst_168 {dimension_numbers = #tpu.dot_dimension_numbers<[1], [0], [0], [1], [0, 0, 1, 1], [], []>} : vector<1x16xbf16>, vector<16x32xbf16>, vector<1x32xf32> -> vector<1x32xf32>
    %517 = arith.addf %503, %516 : vector<1x32xf32>
    %518 = arith.addf %517, %1 : vector<1x32xf32>
    %cst_169 = arith.constant 0.000000e+00 : f32
    %519 = vector.broadcast %cst_169 : f32 to vector<1x32xf32>
    %520 = arith.maximumf %518, %519 : vector<1x32xf32>
    %521 = tpu.concatenate %520, %478 in 1 : vector<1x32xf32>, vector<1x32xf32> -> vector<1x64xf32>
    %522 = arith.truncf %521 : vector<1x64xf32> to vector<1x64xbf16>
    %c0_170 = arith.constant 0 : index
    %c0_171 = arith.constant 0 : index
    %523 = vector.load %arg4[%c0_170, %c0_171] : memref<64x128xbf16, #tpu.memory_space<vmem>>, vector<64x128xbf16>
    %cst_172 = arith.constant dense<0.000000e+00> : vector<1x128xf32>
    %524 = tpu.matmul %522, %523, %cst_172 {dimension_numbers = #tpu.dot_dimension_numbers<[1], [0], [0], [1], [0, 0, 1, 1], [], []>} : vector<1x64xbf16>, vector<64x128xbf16>, vector<1x128xf32> -> vector<1x128xf32>
    %525 = arith.addf %524, %2 : vector<1x128xf32>
    %526 = vector.extract_strided_slice %525 {offsets = [0, 0], sizes = [1, 32], strides = [1, 1]} : vector<1x128xf32> to vector<1x32xf32>
    %527 = arith.negf %526 : vector<1x32xf32>
    %528 = math.exp %527 : vector<1x32xf32>
    %cst_173 = arith.constant 1.000000e+00 : f32
    %529 = vector.broadcast %cst_173 : f32 to vector<1x32xf32>
    %530 = arith.addf %529, %528 : vector<1x32xf32>
    %531 = arith.divf %529, %530 : vector<1x32xf32>
    %532 = vector.extract_strided_slice %525 {offsets = [0, 32], sizes = [1, 32], strides = [1, 1]} : vector<1x128xf32> to vector<1x32xf32>
    %533 = arith.negf %532 : vector<1x32xf32>
    %534 = math.exp %533 : vector<1x32xf32>
    %cst_174 = arith.constant 1.000000e+00 : f32
    %535 = vector.broadcast %cst_174 : f32 to vector<1x32xf32>
    %536 = arith.addf %535, %534 : vector<1x32xf32>
    %537 = arith.divf %535, %536 : vector<1x32xf32>
    %538 = vector.extract_strided_slice %525 {offsets = [0, 64], sizes = [1, 32], strides = [1, 1]} : vector<1x128xf32> to vector<1x32xf32>
    %539 = vector.extract_strided_slice %525 {offsets = [0, 96], sizes = [1, 32], strides = [1, 1]} : vector<1x128xf32> to vector<1x32xf32>
    %540 = arith.mulf %531, %539 : vector<1x32xf32>
    %541 = arith.addf %538, %540 : vector<1x32xf32>
    %542 = math.tanh %541 : vector<1x32xf32>
    %cst_175 = arith.constant 1.000000e+00 : f32
    %543 = vector.broadcast %cst_175 : f32 to vector<1x32xf32>
    %544 = arith.subf %543, %537 : vector<1x32xf32>
    %545 = arith.mulf %544, %542 : vector<1x32xf32>
    %546 = arith.mulf %537, %478 : vector<1x32xf32>
    %547 = arith.addf %545, %546 : vector<1x32xf32>
    %cst_176 = arith.constant 0.000000e+00 : f32
    %548 = vector.broadcast %cst_176 : f32 to vector<1x32xf32>
    %549 = arith.maximumf %547, %548 : vector<1x32xf32>
    %550 = tpu.concatenate %549, %547 in 1 : vector<1x32xf32>, vector<1x32xf32> -> vector<1x64xf32>
    %551 = arith.truncf %550 : vector<1x64xf32> to vector<1x64xbf16>
    %c0_177 = arith.constant 0 : index
    %c0_178 = arith.constant 0 : index
    %552 = vector.load %arg4[%c0_177, %c0_178] : memref<64x128xbf16, #tpu.memory_space<vmem>>, vector<64x128xbf16>
    %cst_179 = arith.constant dense<0.000000e+00> : vector<1x128xf32>
    %553 = tpu.matmul %551, %552, %cst_179 {dimension_numbers = #tpu.dot_dimension_numbers<[1], [0], [0], [1], [0, 0, 1, 1], [], []>} : vector<1x64xbf16>, vector<64x128xbf16>, vector<1x128xf32> -> vector<1x128xf32>
    %554 = arith.addf %553, %2 : vector<1x128xf32>
    %555 = vector.extract_strided_slice %554 {offsets = [0, 0], sizes = [1, 32], strides = [1, 1]} : vector<1x128xf32> to vector<1x32xf32>
    %556 = arith.negf %555 : vector<1x32xf32>
    %557 = math.exp %556 : vector<1x32xf32>
    %cst_180 = arith.constant 1.000000e+00 : f32
    %558 = vector.broadcast %cst_180 : f32 to vector<1x32xf32>
    %559 = arith.addf %558, %557 : vector<1x32xf32>
    %560 = arith.divf %558, %559 : vector<1x32xf32>
    %561 = vector.extract_strided_slice %554 {offsets = [0, 32], sizes = [1, 32], strides = [1, 1]} : vector<1x128xf32> to vector<1x32xf32>
    %562 = arith.negf %561 : vector<1x32xf32>
    %563 = math.exp %562 : vector<1x32xf32>
    %cst_181 = arith.constant 1.000000e+00 : f32
    %564 = vector.broadcast %cst_181 : f32 to vector<1x32xf32>
    %565 = arith.addf %564, %563 : vector<1x32xf32>
    %566 = arith.divf %564, %565 : vector<1x32xf32>
    %567 = vector.extract_strided_slice %554 {offsets = [0, 64], sizes = [1, 32], strides = [1, 1]} : vector<1x128xf32> to vector<1x32xf32>
    %568 = vector.extract_strided_slice %554 {offsets = [0, 96], sizes = [1, 32], strides = [1, 1]} : vector<1x128xf32> to vector<1x32xf32>
    %569 = arith.mulf %560, %568 : vector<1x32xf32>
    %570 = arith.addf %567, %569 : vector<1x32xf32>
    %571 = math.tanh %570 : vector<1x32xf32>
    %cst_182 = arith.constant 1.000000e+00 : f32
    %572 = vector.broadcast %cst_182 : f32 to vector<1x32xf32>
    %573 = arith.subf %572, %566 : vector<1x32xf32>
    %574 = arith.mulf %573, %571 : vector<1x32xf32>
    %575 = arith.mulf %566, %547 : vector<1x32xf32>
    %576 = arith.addf %574, %575 : vector<1x32xf32>
    %577 = arith.truncf %576 : vector<1x32xf32> to vector<1x32xbf16>
    %c0_183 = arith.constant 0 : index
    %c0_184 = arith.constant 0 : index
    %578 = vector.load %arg5[%c0_183, %c0_184] : memref<32x32xbf16, #tpu.memory_space<vmem>>, vector<32x32xbf16>
    %cst_185 = arith.constant dense<0.000000e+00> : vector<1x32xf32>
    %579 = tpu.matmul %577, %578, %cst_185 {dimension_numbers = #tpu.dot_dimension_numbers<[1], [0], [0], [1], [0, 0, 1, 1], [], []>} : vector<1x32xbf16>, vector<32x32xbf16>, vector<1x32xf32> -> vector<1x32xf32>
    %580 = arith.addf %579, %3 : vector<1x32xf32>
    %cst_186 = arith.constant dense<0xFF800000> : vector<1xf32>
    %581 = vector.multi_reduction <maximumf>, %580, %cst_186 [1] : vector<1x32xf32> to vector<1xf32>
    %582 = vector.shape_cast %581 : vector<1xf32> to vector<1x1xf32>
    %583 = vector.broadcast %582 : vector<1x1xf32> to vector<1x32xf32>
    %584 = arith.subf %580, %583 : vector<1x32xf32>
    %585 = math.exp %584 : vector<1x32xf32>
    %cst_187 = arith.constant dense<0.000000e+00> : vector<1xf32>
    %586 = vector.multi_reduction <add>, %585, %cst_187 [1] : vector<1x32xf32> to vector<1xf32>
    %587 = vector.shape_cast %586 : vector<1xf32> to vector<1x1xf32>
    %588 = math.log %587 : vector<1x1xf32>
    %589 = arith.addf %588, %582 : vector<1x1xf32>
    %590 = vector.broadcast %589 : vector<1x1xf32> to vector<1x32xf32>
    %591 = arith.subf %580, %590 : vector<1x32xf32>
    %592 = tpu.concatenate %591, %576, %513, %5 in 1 : vector<1x32xf32>, vector<1x32xf32>, vector<1x16xf32>, vector<1x48xf32> -> vector<1x128xf32>
    %c5_188 = arith.constant 5 : index
    %c0_189 = arith.constant 0 : index
    %593 = vector.load %arg7[%c5_188, %c0_189] : memref<8x128xf32, #tpu.memory_space<vmem>>, vector<1x128xf32>
    tpu.vector_store %arg7[%c5_188, %c0_189], %592 {strides = array<i32>} : memref<8x128xf32, #tpu.memory_space<vmem>>, vector<1x128xf32>,
    %c6 = arith.constant 6 : index
    %c0_190 = arith.constant 0 : index
    %594 = vector.load %arg0[%c6, %c0_190] : memref<8x32xf32, #tpu.memory_space<vmem>>, vector<1x32xf32>
    %595 = tpu.concatenate %594, %576 in 1 : vector<1x32xf32>, vector<1x32xf32> -> vector<1x64xf32>
    %596 = arith.truncf %595 : vector<1x64xf32> to vector<1x64xbf16>
    %c0_191 = arith.constant 0 : index
    %c0_192 = arith.constant 0 : index
    %597 = vector.load %arg2[%c0_191, %c0_192] : memref<64x48xbf16, #tpu.memory_space<vmem>>, vector<64x48xbf16>
    %cst_193 = arith.constant dense<0.000000e+00> : vector<1x48xf32>
    %598 = tpu.matmul %596, %597, %cst_193 {dimension_numbers = #tpu.dot_dimension_numbers<[1], [0], [0], [1], [0, 0, 1, 1], [], []>} : vector<1x64xbf16>, vector<64x48xbf16>, vector<1x48xf32> -> vector<1x48xf32>
    %599 = vector.extract_strided_slice %598 {offsets = [0, 0], sizes = [1, 16], strides = [1, 1]} : vector<1x48xf32> to vector<1x16xf32>
    %600 = arith.addf %599, %0 : vector<1x16xf32>
    %601 = vector.extract_strided_slice %598 {offsets = [0, 16], sizes = [1, 32], strides = [1, 1]} : vector<1x48xf32> to vector<1x32xf32>
    %cst_194 = arith.constant dense<0xFF800000> : vector<1xf32>
    %602 = vector.multi_reduction <maximumf>, %600, %cst_194 [1] : vector<1x16xf32> to vector<1xf32>
    %603 = vector.shape_cast %602 : vector<1xf32> to vector<1x1xf32>
    %604 = vector.broadcast %603 : vector<1x1xf32> to vector<1x16xf32>
    %605 = arith.subf %600, %604 : vector<1x16xf32>
    %606 = math.exp %605 : vector<1x16xf32>
    %cst_195 = arith.constant dense<0.000000e+00> : vector<1xf32>
    %607 = vector.multi_reduction <add>, %606, %cst_195 [1] : vector<1x16xf32> to vector<1xf32>
    %608 = vector.shape_cast %607 : vector<1xf32> to vector<1x1xf32>
    %609 = tpu.reciprocal %608 {approx = true} : vector<1x1xf32> -> vector<1x1xf32>
    %610 = vector.broadcast %609 : vector<1x1xf32> to vector<1x16xf32>
    %611 = arith.mulf %606, %610 : vector<1x16xf32>
    %612 = arith.truncf %611 : vector<1x16xf32> to vector<1x16xbf16>
    %c0_196 = arith.constant 0 : index
    %c0_197 = arith.constant 0 : index
    %613 = vector.load %arg3[%c0_196, %c0_197] : memref<16x32xbf16, #tpu.memory_space<vmem>>, vector<16x32xbf16>
    %cst_198 = arith.constant dense<0.000000e+00> : vector<1x32xf32>
    %614 = tpu.matmul %612, %613, %cst_198 {dimension_numbers = #tpu.dot_dimension_numbers<[1], [0], [0], [1], [0, 0, 1, 1], [], []>} : vector<1x16xbf16>, vector<16x32xbf16>, vector<1x32xf32> -> vector<1x32xf32>
    %615 = arith.addf %601, %614 : vector<1x32xf32>
    %616 = arith.addf %615, %1 : vector<1x32xf32>
    %cst_199 = arith.constant 0.000000e+00 : f32
    %617 = vector.broadcast %cst_199 : f32 to vector<1x32xf32>
    %618 = arith.maximumf %616, %617 : vector<1x32xf32>
    %619 = tpu.concatenate %618, %576 in 1 : vector<1x32xf32>, vector<1x32xf32> -> vector<1x64xf32>
    %620 = arith.truncf %619 : vector<1x64xf32> to vector<1x64xbf16>
    %c0_200 = arith.constant 0 : index
    %c0_201 = arith.constant 0 : index
    %621 = vector.load %arg4[%c0_200, %c0_201] : memref<64x128xbf16, #tpu.memory_space<vmem>>, vector<64x128xbf16>
    %cst_202 = arith.constant dense<0.000000e+00> : vector<1x128xf32>
    %622 = tpu.matmul %620, %621, %cst_202 {dimension_numbers = #tpu.dot_dimension_numbers<[1], [0], [0], [1], [0, 0, 1, 1], [], []>} : vector<1x64xbf16>, vector<64x128xbf16>, vector<1x128xf32> -> vector<1x128xf32>
    %623 = arith.addf %622, %2 : vector<1x128xf32>
    %624 = vector.extract_strided_slice %623 {offsets = [0, 0], sizes = [1, 32], strides = [1, 1]} : vector<1x128xf32> to vector<1x32xf32>
    %625 = arith.negf %624 : vector<1x32xf32>
    %626 = math.exp %625 : vector<1x32xf32>
    %cst_203 = arith.constant 1.000000e+00 : f32
    %627 = vector.broadcast %cst_203 : f32 to vector<1x32xf32>
    %628 = arith.addf %627, %626 : vector<1x32xf32>
    %629 = arith.divf %627, %628 : vector<1x32xf32>
    %630 = vector.extract_strided_slice %623 {offsets = [0, 32], sizes = [1, 32], strides = [1, 1]} : vector<1x128xf32> to vector<1x32xf32>
    %631 = arith.negf %630 : vector<1x32xf32>
    %632 = math.exp %631 : vector<1x32xf32>
    %cst_204 = arith.constant 1.000000e+00 : f32
    %633 = vector.broadcast %cst_204 : f32 to vector<1x32xf32>
    %634 = arith.addf %633, %632 : vector<1x32xf32>
    %635 = arith.divf %633, %634 : vector<1x32xf32>
    %636 = vector.extract_strided_slice %623 {offsets = [0, 64], sizes = [1, 32], strides = [1, 1]} : vector<1x128xf32> to vector<1x32xf32>
    %637 = vector.extract_strided_slice %623 {offsets = [0, 96], sizes = [1, 32], strides = [1, 1]} : vector<1x128xf32> to vector<1x32xf32>
    %638 = arith.mulf %629, %637 : vector<1x32xf32>
    %639 = arith.addf %636, %638 : vector<1x32xf32>
    %640 = math.tanh %639 : vector<1x32xf32>
    %cst_205 = arith.constant 1.000000e+00 : f32
    %641 = vector.broadcast %cst_205 : f32 to vector<1x32xf32>
    %642 = arith.subf %641, %635 : vector<1x32xf32>
    %643 = arith.mulf %642, %640 : vector<1x32xf32>
    %644 = arith.mulf %635, %576 : vector<1x32xf32>
    %645 = arith.addf %643, %644 : vector<1x32xf32>
    %cst_206 = arith.constant 0.000000e+00 : f32
    %646 = vector.broadcast %cst_206 : f32 to vector<1x32xf32>
    %647 = arith.maximumf %645, %646 : vector<1x32xf32>
    %648 = tpu.concatenate %647, %645 in 1 : vector<1x32xf32>, vector<1x32xf32> -> vector<1x64xf32>
    %649 = arith.truncf %648 : vector<1x64xf32> to vector<1x64xbf16>
    %c0_207 = arith.constant 0 : index
    %c0_208 = arith.constant 0 : index
    %650 = vector.load %arg4[%c0_207, %c0_208] : memref<64x128xbf16, #tpu.memory_space<vmem>>, vector<64x128xbf16>
    %cst_209 = arith.constant dense<0.000000e+00> : vector<1x128xf32>
    %651 = tpu.matmul %649, %650, %cst_209 {dimension_numbers = #tpu.dot_dimension_numbers<[1], [0], [0], [1], [0, 0, 1, 1], [], []>} : vector<1x64xbf16>, vector<64x128xbf16>, vector<1x128xf32> -> vector<1x128xf32>
    %652 = arith.addf %651, %2 : vector<1x128xf32>
    %653 = vector.extract_strided_slice %652 {offsets = [0, 0], sizes = [1, 32], strides = [1, 1]} : vector<1x128xf32> to vector<1x32xf32>
    %654 = arith.negf %653 : vector<1x32xf32>
    %655 = math.exp %654 : vector<1x32xf32>
    %cst_210 = arith.constant 1.000000e+00 : f32
    %656 = vector.broadcast %cst_210 : f32 to vector<1x32xf32>
    %657 = arith.addf %656, %655 : vector<1x32xf32>
    %658 = arith.divf %656, %657 : vector<1x32xf32>
    %659 = vector.extract_strided_slice %652 {offsets = [0, 32], sizes = [1, 32], strides = [1, 1]} : vector<1x128xf32> to vector<1x32xf32>
    %660 = arith.negf %659 : vector<1x32xf32>
    %661 = math.exp %660 : vector<1x32xf32>
    %cst_211 = arith.constant 1.000000e+00 : f32
    %662 = vector.broadcast %cst_211 : f32 to vector<1x32xf32>
    %663 = arith.addf %662, %661 : vector<1x32xf32>
    %664 = arith.divf %662, %663 : vector<1x32xf32>
    %665 = vector.extract_strided_slice %652 {offsets = [0, 64], sizes = [1, 32], strides = [1, 1]} : vector<1x128xf32> to vector<1x32xf32>
    %666 = vector.extract_strided_slice %652 {offsets = [0, 96], sizes = [1, 32], strides = [1, 1]} : vector<1x128xf32> to vector<1x32xf32>
    %667 = arith.mulf %658, %666 : vector<1x32xf32>
    %668 = arith.addf %665, %667 : vector<1x32xf32>
    %669 = math.tanh %668 : vector<1x32xf32>
    %cst_212 = arith.constant 1.000000e+00 : f32
    %670 = vector.broadcast %cst_212 : f32 to vector<1x32xf32>
    %671 = arith.subf %670, %664 : vector<1x32xf32>
    %672 = arith.mulf %671, %669 : vector<1x32xf32>
    %673 = arith.mulf %664, %645 : vector<1x32xf32>
    %674 = arith.addf %672, %673 : vector<1x32xf32>
    %675 = arith.truncf %674 : vector<1x32xf32> to vector<1x32xbf16>
    %c0_213 = arith.constant 0 : index
    %c0_214 = arith.constant 0 : index
    %676 = vector.load %arg5[%c0_213, %c0_214] : memref<32x32xbf16, #tpu.memory_space<vmem>>, vector<32x32xbf16>
    %cst_215 = arith.constant dense<0.000000e+00> : vector<1x32xf32>
    %677 = tpu.matmul %675, %676, %cst_215 {dimension_numbers = #tpu.dot_dimension_numbers<[1], [0], [0], [1], [0, 0, 1, 1], [], []>} : vector<1x32xbf16>, vector<32x32xbf16>, vector<1x32xf32> -> vector<1x32xf32>
    %678 = arith.addf %677, %3 : vector<1x32xf32>
    %cst_216 = arith.constant dense<0xFF800000> : vector<1xf32>
    %679 = vector.multi_reduction <maximumf>, %678, %cst_216 [1] : vector<1x32xf32> to vector<1xf32>
    %680 = vector.shape_cast %679 : vector<1xf32> to vector<1x1xf32>
    %681 = vector.broadcast %680 : vector<1x1xf32> to vector<1x32xf32>
    %682 = arith.subf %678, %681 : vector<1x32xf32>
    %683 = math.exp %682 : vector<1x32xf32>
    %cst_217 = arith.constant dense<0.000000e+00> : vector<1xf32>
    %684 = vector.multi_reduction <add>, %683, %cst_217 [1] : vector<1x32xf32> to vector<1xf32>
    %685 = vector.shape_cast %684 : vector<1xf32> to vector<1x1xf32>
    %686 = math.log %685 : vector<1x1xf32>
    %687 = arith.addf %686, %680 : vector<1x1xf32>
    %688 = vector.broadcast %687 : vector<1x1xf32> to vector<1x32xf32>
    %689 = arith.subf %678, %688 : vector<1x32xf32>
    %690 = tpu.concatenate %689, %674, %611, %5 in 1 : vector<1x32xf32>, vector<1x32xf32>, vector<1x16xf32>, vector<1x48xf32> -> vector<1x128xf32>
    %c6_218 = arith.constant 6 : index
    %c0_219 = arith.constant 0 : index
    %691 = vector.load %arg7[%c6_218, %c0_219] : memref<8x128xf32, #tpu.memory_space<vmem>>, vector<1x128xf32>
    tpu.vector_store %arg7[%c6_218, %c0_219], %690 {strides = array<i32>} : memref<8x128xf32, #tpu.memory_space<vmem>>, vector<1x128xf32>,
    %c7 = arith.constant 7 : index
    %c0_220 = arith.constant 0 : index
    %692 = vector.load %arg0[%c7, %c0_220] : memref<8x32xf32, #tpu.memory_space<vmem>>, vector<1x32xf32>
    %693 = tpu.concatenate %692, %674 in 1 : vector<1x32xf32>, vector<1x32xf32> -> vector<1x64xf32>
    %694 = arith.truncf %693 : vector<1x64xf32> to vector<1x64xbf16>
    %c0_221 = arith.constant 0 : index
    %c0_222 = arith.constant 0 : index
    %695 = vector.load %arg2[%c0_221, %c0_222] : memref<64x48xbf16, #tpu.memory_space<vmem>>, vector<64x48xbf16>
    %cst_223 = arith.constant dense<0.000000e+00> : vector<1x48xf32>
    %696 = tpu.matmul %694, %695, %cst_223 {dimension_numbers = #tpu.dot_dimension_numbers<[1], [0], [0], [1], [0, 0, 1, 1], [], []>} : vector<1x64xbf16>, vector<64x48xbf16>, vector<1x48xf32> -> vector<1x48xf32>
    %697 = vector.extract_strided_slice %696 {offsets = [0, 0], sizes = [1, 16], strides = [1, 1]} : vector<1x48xf32> to vector<1x16xf32>
    %698 = arith.addf %697, %0 : vector<1x16xf32>
    %699 = vector.extract_strided_slice %696 {offsets = [0, 16], sizes = [1, 32], strides = [1, 1]} : vector<1x48xf32> to vector<1x32xf32>
    %cst_224 = arith.constant dense<0xFF800000> : vector<1xf32>
    %700 = vector.multi_reduction <maximumf>, %698, %cst_224 [1] : vector<1x16xf32> to vector<1xf32>
    %701 = vector.shape_cast %700 : vector<1xf32> to vector<1x1xf32>
    %702 = vector.broadcast %701 : vector<1x1xf32> to vector<1x16xf32>
    %703 = arith.subf %698, %702 : vector<1x16xf32>
    %704 = math.exp %703 : vector<1x16xf32>
    %cst_225 = arith.constant dense<0.000000e+00> : vector<1xf32>
    %705 = vector.multi_reduction <add>, %704, %cst_225 [1] : vector<1x16xf32> to vector<1xf32>
    %706 = vector.shape_cast %705 : vector<1xf32> to vector<1x1xf32>
    %707 = tpu.reciprocal %706 {approx = true} : vector<1x1xf32> -> vector<1x1xf32>
    %708 = vector.broadcast %707 : vector<1x1xf32> to vector<1x16xf32>
    %709 = arith.mulf %704, %708 : vector<1x16xf32>
    %710 = arith.truncf %709 : vector<1x16xf32> to vector<1x16xbf16>
    %c0_226 = arith.constant 0 : index
    %c0_227 = arith.constant 0 : index
    %711 = vector.load %arg3[%c0_226, %c0_227] : memref<16x32xbf16, #tpu.memory_space<vmem>>, vector<16x32xbf16>
    %cst_228 = arith.constant dense<0.000000e+00> : vector<1x32xf32>
    %712 = tpu.matmul %710, %711, %cst_228 {dimension_numbers = #tpu.dot_dimension_numbers<[1], [0], [0], [1], [0, 0, 1, 1], [], []>} : vector<1x16xbf16>, vector<16x32xbf16>, vector<1x32xf32> -> vector<1x32xf32>
    %713 = arith.addf %699, %712 : vector<1x32xf32>
    %714 = arith.addf %713, %1 : vector<1x32xf32>
    %cst_229 = arith.constant 0.000000e+00 : f32
    %715 = vector.broadcast %cst_229 : f32 to vector<1x32xf32>
    %716 = arith.maximumf %714, %715 : vector<1x32xf32>
    %717 = tpu.concatenate %716, %674 in 1 : vector<1x32xf32>, vector<1x32xf32> -> vector<1x64xf32>
    %718 = arith.truncf %717 : vector<1x64xf32> to vector<1x64xbf16>
    %c0_230 = arith.constant 0 : index
    %c0_231 = arith.constant 0 : index
    %719 = vector.load %arg4[%c0_230, %c0_231] : memref<64x128xbf16, #tpu.memory_space<vmem>>, vector<64x128xbf16>
    %cst_232 = arith.constant dense<0.000000e+00> : vector<1x128xf32>
    %720 = tpu.matmul %718, %719, %cst_232 {dimension_numbers = #tpu.dot_dimension_numbers<[1], [0], [0], [1], [0, 0, 1, 1], [], []>} : vector<1x64xbf16>, vector<64x128xbf16>, vector<1x128xf32> -> vector<1x128xf32>
    %721 = arith.addf %720, %2 : vector<1x128xf32>
    %722 = vector.extract_strided_slice %721 {offsets = [0, 0], sizes = [1, 32], strides = [1, 1]} : vector<1x128xf32> to vector<1x32xf32>
    %723 = arith.negf %722 : vector<1x32xf32>
    %724 = math.exp %723 : vector<1x32xf32>
    %cst_233 = arith.constant 1.000000e+00 : f32
    %725 = vector.broadcast %cst_233 : f32 to vector<1x32xf32>
    %726 = arith.addf %725, %724 : vector<1x32xf32>
    %727 = arith.divf %725, %726 : vector<1x32xf32>
    %728 = vector.extract_strided_slice %721 {offsets = [0, 32], sizes = [1, 32], strides = [1, 1]} : vector<1x128xf32> to vector<1x32xf32>
    %729 = arith.negf %728 : vector<1x32xf32>
    %730 = math.exp %729 : vector<1x32xf32>
    %cst_234 = arith.constant 1.000000e+00 : f32
    %731 = vector.broadcast %cst_234 : f32 to vector<1x32xf32>
    %732 = arith.addf %731, %730 : vector<1x32xf32>
    %733 = arith.divf %731, %732 : vector<1x32xf32>
    %734 = vector.extract_strided_slice %721 {offsets = [0, 64], sizes = [1, 32], strides = [1, 1]} : vector<1x128xf32> to vector<1x32xf32>
    %735 = vector.extract_strided_slice %721 {offsets = [0, 96], sizes = [1, 32], strides = [1, 1]} : vector<1x128xf32> to vector<1x32xf32>
    %736 = arith.mulf %727, %735 : vector<1x32xf32>
    %737 = arith.addf %734, %736 : vector<1x32xf32>
    %738 = math.tanh %737 : vector<1x32xf32>
    %cst_235 = arith.constant 1.000000e+00 : f32
    %739 = vector.broadcast %cst_235 : f32 to vector<1x32xf32>
    %740 = arith.subf %739, %733 : vector<1x32xf32>
    %741 = arith.mulf %740, %738 : vector<1x32xf32>
    %742 = arith.mulf %733, %674 : vector<1x32xf32>
    %743 = arith.addf %741, %742 : vector<1x32xf32>
    %cst_236 = arith.constant 0.000000e+00 : f32
    %744 = vector.broadcast %cst_236 : f32 to vector<1x32xf32>
    %745 = arith.maximumf %743, %744 : vector<1x32xf32>
    %746 = tpu.concatenate %745, %743 in 1 : vector<1x32xf32>, vector<1x32xf32> -> vector<1x64xf32>
    %747 = arith.truncf %746 : vector<1x64xf32> to vector<1x64xbf16>
    %c0_237 = arith.constant 0 : index
    %c0_238 = arith.constant 0 : index
    %748 = vector.load %arg4[%c0_237, %c0_238] : memref<64x128xbf16, #tpu.memory_space<vmem>>, vector<64x128xbf16>
    %cst_239 = arith.constant dense<0.000000e+00> : vector<1x128xf32>
    %749 = tpu.matmul %747, %748, %cst_239 {dimension_numbers = #tpu.dot_dimension_numbers<[1], [0], [0], [1], [0, 0, 1, 1], [], []>} : vector<1x64xbf16>, vector<64x128xbf16>, vector<1x128xf32> -> vector<1x128xf32>
    %750 = arith.addf %749, %2 : vector<1x128xf32>
    %751 = vector.extract_strided_slice %750 {offsets = [0, 0], sizes = [1, 32], strides = [1, 1]} : vector<1x128xf32> to vector<1x32xf32>
    %752 = arith.negf %751 : vector<1x32xf32>
    %753 = math.exp %752 : vector<1x32xf32>
    %cst_240 = arith.constant 1.000000e+00 : f32
    %754 = vector.broadcast %cst_240 : f32 to vector<1x32xf32>
    %755 = arith.addf %754, %753 : vector<1x32xf32>
    %756 = arith.divf %754, %755 : vector<1x32xf32>
    %757 = vector.extract_strided_slice %750 {offsets = [0, 32], sizes = [1, 32], strides = [1, 1]} : vector<1x128xf32> to vector<1x32xf32>
    %758 = arith.negf %757 : vector<1x32xf32>
    %759 = math.exp %758 : vector<1x32xf32>
    %cst_241 = arith.constant 1.000000e+00 : f32
    %760 = vector.broadcast %cst_241 : f32 to vector<1x32xf32>
    %761 = arith.addf %760, %759 : vector<1x32xf32>
    %762 = arith.divf %760, %761 : vector<1x32xf32>
    %763 = vector.extract_strided_slice %750 {offsets = [0, 64], sizes = [1, 32], strides = [1, 1]} : vector<1x128xf32> to vector<1x32xf32>
    %764 = vector.extract_strided_slice %750 {offsets = [0, 96], sizes = [1, 32], strides = [1, 1]} : vector<1x128xf32> to vector<1x32xf32>
    %765 = arith.mulf %756, %764 : vector<1x32xf32>
    %766 = arith.addf %763, %765 : vector<1x32xf32>
    %767 = math.tanh %766 : vector<1x32xf32>
    %cst_242 = arith.constant 1.000000e+00 : f32
    %768 = vector.broadcast %cst_242 : f32 to vector<1x32xf32>
    %769 = arith.subf %768, %762 : vector<1x32xf32>
    %770 = arith.mulf %769, %767 : vector<1x32xf32>
    %771 = arith.mulf %762, %743 : vector<1x32xf32>
    %772 = arith.addf %770, %771 : vector<1x32xf32>
    %773 = arith.truncf %772 : vector<1x32xf32> to vector<1x32xbf16>
    %c0_243 = arith.constant 0 : index
    %c0_244 = arith.constant 0 : index
    %774 = vector.load %arg5[%c0_243, %c0_244] : memref<32x32xbf16, #tpu.memory_space<vmem>>, vector<32x32xbf16>
    %cst_245 = arith.constant dense<0.000000e+00> : vector<1x32xf32>
    %775 = tpu.matmul %773, %774, %cst_245 {dimension_numbers = #tpu.dot_dimension_numbers<[1], [0], [0], [1], [0, 0, 1, 1], [], []>} : vector<1x32xbf16>, vector<32x32xbf16>, vector<1x32xf32> -> vector<1x32xf32>
    %776 = arith.addf %775, %3 : vector<1x32xf32>
    %cst_246 = arith.constant dense<0xFF800000> : vector<1xf32>
    %777 = vector.multi_reduction <maximumf>, %776, %cst_246 [1] : vector<1x32xf32> to vector<1xf32>
    %778 = vector.shape_cast %777 : vector<1xf32> to vector<1x1xf32>
    %779 = vector.broadcast %778 : vector<1x1xf32> to vector<1x32xf32>
    %780 = arith.subf %776, %779 : vector<1x32xf32>
    %781 = math.exp %780 : vector<1x32xf32>
    %cst_247 = arith.constant dense<0.000000e+00> : vector<1xf32>
    %782 = vector.multi_reduction <add>, %781, %cst_247 [1] : vector<1x32xf32> to vector<1xf32>
    %783 = vector.shape_cast %782 : vector<1xf32> to vector<1x1xf32>
    %784 = math.log %783 : vector<1x1xf32>
    %785 = arith.addf %784, %778 : vector<1x1xf32>
    %786 = vector.broadcast %785 : vector<1x1xf32> to vector<1x32xf32>
    %787 = arith.subf %776, %786 : vector<1x32xf32>
    %788 = tpu.concatenate %787, %772, %709, %5 in 1 : vector<1x32xf32>, vector<1x32xf32>, vector<1x16xf32>, vector<1x48xf32> -> vector<1x128xf32>
    %c7_248 = arith.constant 7 : index
    %c0_249 = arith.constant 0 : index
    %789 = vector.load %arg7[%c7_248, %c0_249] : memref<8x128xf32, #tpu.memory_space<vmem>>, vector<1x128xf32>
    tpu.vector_store %arg7[%c7_248, %c0_249], %788 {strides = array<i32>} : memref<8x128xf32, #tpu.memory_space<vmem>>, vector<1x128xf32>,
    return
  }
}

</mosaic_0001>

<bundles_post_ra>
// kernel: tpu_custom_call.1
= control target key start
LH: loop header
LB: loop body
LE: loop exit
PB: predicated region body
PF: predicated region fallthrough
CT: control target
= control target key end

     0   :  { %12 = vsyncpa [#allocation3], 0  ;;  %s4053_s0 = inlined_call_operand.vmem [shape: f32[8,32], index: 0, kind: input, shape index: {}]   ;;  %s4054_s1 = inlined_call_operand.vmem [shape: f32[1,32], index: 1, kind: input, shape index: {}]   ;;  %s4055_s2 = inlined_call_operand.vmem [shape: bf16[64,48], index: 2, kind: input, shape index: {}]   ;;  %s4056_s3 = inlined_call_operand.hbm [shape: bf16[16,32], index: 3, kind: input, shape index: {}]   ;;  %s4057_s4 = inlined_call_operand.vmem [shape: bf16[64,128], index: 4, kind: input, shape index: {}]   ;;  %s4058_s5 = inlined_call_operand.vmem [shape: bf16[32,32], index: 5, kind: input, shape index: {}]   ;;  %s4059_s6 = inlined_call_operand.hbm [shape: f32[8,128], index: 6, kind: input, shape index: {}]   ;;  %s4060_s7 = inlined_call_operand.hbm [shape: f32[8,128], index: 7, kind: output, shape index: {}]  }
   0x1   :  { %13 = vsyncpa [#allocation6], 0 }
   0x2   :  { %14 = vsyncpa [#allocation4], 0  ;;  %s25_s26 = sshll.u32 %s4056_s3, 4  ;;  %s3282_s27 = smov [#allocation2]   ;;  %s26_s26 = int_to_ptr.hbm [resolvable:$true] %s25_s26 }
   0x3   :  { %s27_s28 = sshll.u32 %s3282_s27, 4  ;;  %s43_s8 = sshll.u32 %s4059_s6, 4  ;;  %s28_s28 = int_to_ptr.vmem [resolvable:$true] %s27_s28  ;;  %s44_s8 = int_to_ptr.hbm [resolvable:$true] %s43_s8 }
   0x4   :  { %s3283_s9 = smov 64   ;;  %s3284_s10 = smov 4  }
   0x5   :  { %33 = dma.hbm_to_vmem [thread:$0]  %s26_s26, 128, %s28_s28, [#allocation3], %s3283_s9, %s3283_s9, %s3284_s10  }
   0x6   :  { %s3285_s11 = smov [#allocation5]  }
   0x7   :  { %s45_s12 = sshll.u32 %s3285_s11, 4  ;;  %s46_s12 = int_to_ptr.vmem [resolvable:$true] %s45_s12 }
   0x8   :  { %48 = dma.hbm_to_vmem [thread:$0]  %s44_s8, 128, %s46_s12, [#allocation6]  }
   0x9   :  { %3276 = dma.done.wait [#allocation3], 128  }
   0xa   :  { %3277 = vsyncadd [#allocation3], 4294967168 }
   0xb   :  { %3278 = dma.done.wait [#allocation6], 128  }
   0xc   :  { %3279 = vsyncadd [#allocation6], 4294967168  ;;  %v3041_v0 = vld [vmem:[%s4054_s1] ss:$0 sm:$0xff]  ;;  %v2947_v1 = vld [vmem:[%s4055_s2 + $0x18] sm:$0xff]  ;;  %s3286_s15 = smov 32  }
   0xd   :  { %66 = vrot.lane.b32.xlu0 %v3041_v0, %s3286_s15  ;;  %112 = vmatpush.bf16.msra.mxu0 %v2947_v1  ;;  %v2946_v2 = vld [vmem:[%s4055_s2 + $0x10] sm:$0xff]  ;;  %v2945_v3 = vld [vmem:[%s4055_s2 + $0x8] sm:$0xff]  ;;  %v2944_v4 = vld [vmem:[%s4055_s2] sm:$0xff]  ;;  %vm69_vm0 = vcmask 261120   ;;  %vm104_vm1 = vcmask 523264   ;;  %vm122_vm2 = vcmask 122880  }
   0xe   :  { %v63_v5 = vld [vmem:[%s4053_s0] sm:$0x1]  ;;  %v3363_v9 = vld [vmem:[#allocation5] sm:$0x1]  ;;  %vm143_vm3 = vcmask 130048   ;;  %s3287_s23 = smov 16  }
   0xf   :  { %v2948_v19 = vld [vmem:[#allocation2] sm:$0xff]  ;;  %v59_v24 = vld [vmem:[#allocation5 + $0x1] sm:$0x1]  ;;  %v2952_v27 = vld [vmem:[%s4057_s4 + $0x18] sm:$0xff]  ;;  %s3288_s30 = smov 112   ;;  %s3289_s11 = smov 96  }
  0x10   :  { %154 = vmatpush.bf16.msra.mxu1 %v2948_v19  ;;  %166 = vrot.lane.b32.xlu2 %v59_v24, %s3287_s23  ;;  %v2951_v28 = vld [vmem:[%s4057_s4 + $0x10] sm:$0xff]  ;;  %v2950_v29 = vld [vmem:[%s4057_s4 + $0x8] sm:$0xff]  ;;  %v2949_v35 = vld [vmem:[%s4057_s4] sm:$0xff]  ;;  %s2525_s17 = sshll.u32 %s4060_s7, 4  ;;  %s2526_s17 = int_to_ptr.hbm [resolvable:$true] %s2525_s17 }
  0x11   :  { %113 = vmatpush.bf16.msra.mxu0 %v2946_v2  ;;  %216 = vmatpush.bf16.msra.mxu2 %v2952_v27  ;;  %v3394_v39 = vld [vmem:[#allocation5 + $0x2] sm:$0x1] }
  0x12   :  { %277 = vmatpush.bf16.msra.mxu3 %v2952_v27  ;;  %v2957_v27 = vld [vmem:[%s4055_s2 + $0x10] sm:$0xff] }
  0x15   :  { %114 = vmatpush.bf16.msra.mxu0 %v2945_v3  ;;  %217 = vmatpush.bf16.msra.mxu2 %v2951_v28 }
  0x16   :  { %278 = vmatpush.bf16.msra.mxu3 %v2951_v28  ;;  %v2956_v28 = vld [vmem:[%s4055_s2 + $0x8] sm:$0xff] }
  0x19   :  { %115 = vmatpush.bf16.msra.mxu0 %v2944_v4  ;;  %218 = vmatpush.bf16.msra.mxu2 %v2950_v29 }
  0x1a   :  { %279 = vmatpush.bf16.msra.mxu3 %v2950_v29 }
  0x1d   :  { %219 = vmatpush.bf16.msra.mxu2 %v2949_v35 }
  0x1e   :  { %280 = vmatpush.bf16.msra.mxu3 %v2949_v35 }
  0x6a   :  { %v3384_v31 = vpop.permute.xlu2 %166 }
  0x7f   :  { %v3358_v6 = vpop.permute.xlu0 %66 }
  0x80   :  { %v70_v7 = vsel %vm69_vm0, %v63_v5, %v3358_v6 }
  0x81   :  { %v71_v8 = vpack.c.bf16 %v70_v7, %v70_v7 }
  0x83   :  { %2552 = vmatmul.msk.bf16.vlgmr.msra.gmra.mxu0 %vm104_vm1, %v71_v8 }
 0x100   :  { %v117_v10 = vpop.f32.mrf.mxu0 }
 0x101   :  { %v121_v11 = vadd.f32 %v117_v10, %v3363_v9 }
 0x103   :  { %v123_v12 = vsel %vm122_vm2, %v121_v11, -inf }
 0x104   :  { %124 = vmax.xlane.f32.xlu0 %v123_v12 }
 0x108   :  { %v119_v13 = vpop.f32.mrf.mxu0 }
 0x177   :  { %v125_v14 = vpop.xlane.xlu0 %124 }
 0x178   :  { %v126_v15 = vsub.f32 %v121_v11, %v125_v14 }
 0x17a   :  { %v127_v16 = vmul.f32 1.442695, %v126_v15 }
 0x17c   :  { %3042 = vpow2.f32 %v127_v16 }
 0x182   :  { %v3043_v17 = vpop.eup %3042 }
 0x183   :  { %v129_v18 = vsel %vm122_vm2, %v3043_v17, 0.0 }
 0x184   :  { %130 = vadd.xlane.f32.xlu1 %v129_v18 }
 0x1f7   :  { %v131_v20 = vpop.xlane.xlu1 %130 }
 0x1f8   :  { %3044 = vrcp.f32 %v131_v20 }
 0x1fe   :  { %v3045_v21 = vpop.eup %3044 }
 0x1ff   :  { %v3368_v22 = vmul.f32 %v3045_v21, %v3043_v17 }
 0x201   :  { %v134_v23 = vpack.c.bf16 %v3368_v22, %v3368_v22 }
 0x203   :  { %2557 = vmatmul.msk.bf16.vlgmr.msra.gmra.mxu1 %vm143_vm3, %v134_v23 }
 0x280   :  { %v156_v25 = vpop.f32.mrf.mxu1 }
 0x281   :  { %161 = vrot.lane.b32.xlu1 %v156_v25, %s3287_s23 }
 0x288   :  { %v158_v26 = vpop.f32.mrf.mxu1 }
 0x289   :  { %v2958_v26 = vld [vmem:[%s4055_s2 + $0x18] sm:$0xff] }
 0x28a   :  { %425 = vmatpush.bf16.msrb.mxu0 %v2958_v26 }
 0x28e   :  { %426 = vmatpush.bf16.msrb.mxu0 %v2957_v27  ;;  %v2954_v27 = vld [vmem:[%s4058_s5 + $0x8] sm:$0xff] }
 0x28f   :  { %353 = vmatpush.bf16.msrb.mxu1 %v2954_v27 }
 0x292   :  { %427 = vmatpush.bf16.msrb.mxu0 %v2956_v28  ;;  %v2953_v28 = vld [vmem:[%s4058_s5] sm:$0xff] }
 0x293   :  { %354 = vmatpush.bf16.msrb.mxu1 %v2953_v28 }
 0x2f3   :  { %v162_v30 = vpop.permute.xlu1 %161 }
 0x2f4   :  { %v164_v32 = vadd.f32 %v162_v30, %v117_v10 }
 0x2f6   :  { %v169_v33 = vadd.f32 %v3384_v31, %v164_v32 }
 0x2f8   :  { %v170_v34 = vmax.f32 %v169_v33, 0.0  ;;  %v2955_v33 = vld [vmem:[%s4055_s2] sm:$0xff] }
 0x2f9   :  { %428 = vmatpush.bf16.msrb.mxu0 %v2955_v33 }
 0x2fa   :  { %172 = vrot.lane.b32.xlu2 %v170_v34, %s3288_s30 }
 0x354   :  { %v173_v36 = vpop.permute.xlu2 %172 }
 0x355   :  { %v175_v37 = vsel %vm69_vm0, %v173_v36, %v3358_v6 }
 0x356   :  { %v176_v38 = vpack.c.bf16 %v175_v37, %v175_v37 }
 0x358   :  { %2574 = vmatmul.msk.bf16.vlgmr.msra.gmra.mxu2 %vm104_vm1, %v176_v38  ;;  %v383_v38 = vld [vmem:[%s4053_s0 + $0x1] sm:$0x1] }
 0x3db   :  { %v221_v40 = vpop.f32.mrf.mxu2 }
 0x3dc   :  { %v222_v41 = vadd.f32 %v221_v40, %v3394_v39 }
 0x3de   :  { %245 = vrot.lane.b32.xlu2 %v222_v41, %s3286_s15  ;;  %v2575_v43 = vmul.f32 -1.442695, %v222_v41 }
 0x3e0   :  { %3046 = vpow2.f32 %v2575_v43 }
 0x3e3   :  { %v223_v42 = vpop.f32.mrf.mxu2 }
 0x3e6   :  { %v3047_v44 = vpop.eup %3046 }
 0x3e7   :  { %v228_v45 = vadd.f32 1.0, %v3047_v44 }
 0x3e9   :  { %3048 = vrcp.f32 %v228_v45  ;;  %v240_v51 = vand.u32 2147483648, %v228_v45  ;;  %vm234_vm5 = vweird.f32 %v228_v45  ;;  %v238_v52 = vand.u32 2147483647, %v228_v45 }
 0x3eb   :  { %v241_v54 = vor.u32 1.1754944e-38, %v240_v51  ;;  %vm239_vm7 = vcmp.eq.f32.partialorder %v238_v52, 8.507059e+37 }
 0x3ef   :  { %v3049_v46 = vpop.eup %3048 }
 0x3f0   :  { %v230_v47 = vmul.f32 %v3049_v46, %v228_v45  ;;  %vm235_vm4 = vweird.f32 %v3049_v46 }
 0x3f1   :  { %vm236_vm6 = vmor %vm234_vm5, %vm235_vm4 }
 0x3f2   :  { %v231_v48 = vsub.f32 1.0, %v230_v47  ;;  %v2959_v47 = vld [vmem:[#allocation2] sm:$0xff] }
 0x3f3   :  { %465 = vmatpush.bf16.msrb.mxu2 %v2959_v47 }
 0x3f4   :  { %v232_v49 = vmul.f32 %v3049_v46, %v231_v48 }
 0x3f6   :  { %v233_v50 = vadd.f32 %v3049_v46, %v232_v49 }
 0x3f8   :  { %v237_v53 = vsel %vm236_vm6, %v3049_v46, %v233_v50 }
 0x3f9   :  { %v242_v56 = vsel %vm239_vm7, %v241_v54, %v237_v53 }
 0x3fa   :  { %v255_v61 = vsub.f32 1.0, %v242_v56  ;;  %v261_v63 = vmul.f32 %v242_v56, %v3358_v6 }
 0x438   :  { %v246_v55 = vpop.permute.xlu2 %245 }
 0x439   :  { %v248_v57 = vmul.f32 %v246_v55, %v242_v56 }
 0x43b   :  { %250 = vrot.lane.b32.xlu2 %v248_v57, %s3283_s9 }
 0x495   :  { %v251_v58 = vpop.permute.xlu2 %250 }
 0x496   :  { %v253_v59 = vadd.f32 %v251_v58, %v222_v41 }
 0x498   :  { %3050 = vtanh.f32 %v253_v59  ;;  %v2963_v59 = vld [vmem:[%s4057_s4 + $0x18] sm:$0xff] }
 0x499   :  { %523 = vmatpush.bf16.msrb.mxu3 %v2963_v59  ;;  %584 = vmatpush.bf16.msra.mxu1 %v2963_v59 }
 0x49e   :  { %v3051_v60 = vpop.eup %3050 }
 0x49f   :  { %257 = vrot.lane.b32.xlu2 %v3051_v60, %s3289_s11  ;;  %v2962_v60 = vld [vmem:[%s4057_s4 + $0x10] sm:$0xff] }
 0x4a0   :  { %524 = vmatpush.bf16.msrb.mxu3 %v2962_v60  ;;  %585 = vmatpush.bf16.msra.mxu1 %v2962_v60 }
 0x4f9   :  { %v258_v62 = vpop.permute.xlu2 %257 }
 0x4fa   :  { %v260_v0 = vmul.f32 %v258_v62, %v255_v61  ;;  %v2961_v61 = vld [vmem:[%s4057_s4 + $0x8] sm:$0xff]  ;;  %v2960_v62 = vld [vmem:[%s4057_s4] sm:$0xff] }
 0x4fb   :  { %525 = vmatpush.bf16.msrb.mxu3 %v2961_v61  ;;  %586 = vmatpush.bf16.msra.mxu1 %v2961_v61 }
 0x4fc   :  { %v262_v1 = vadd.f32 %v261_v63, %v260_v0 }
 0x4fe   :  { %v263_v2 = vmax.f32 %v262_v1, 0.0 }
 0x4ff   :  { %526 = vmatpush.bf16.msrb.mxu3 %v2960_v62  ;;  %587 = vmatpush.bf16.msra.mxu1 %v2960_v62 }
 0x500   :  { %265 = vrot.lane.b32.xlu1 %v263_v2, %s3289_s11 }
 0x572   :  { %v266_v3 = vpop.permute.xlu1 %265 }
 0x573   :  { %v268_v4 = vsel %vm69_vm0, %v266_v3, %v262_v1 }
 0x574   :  { %v269_v5 = vpack.c.bf16 %v268_v4, %v268_v4 }
 0x576   :  { %2576 = vmatmul.msk.bf16.vlgmr.msra.gmra.mxu3 %vm104_vm1, %v269_v5 }
 0x5f9   :  { %v282_v7 = vpop.f32.mrf.mxu3 }
 0x5fa   :  { %v283_v8 = vadd.f32 %v282_v7, %v3394_v39 }
 0x5fc   :  { %306 = vrot.lane.b32.xlu2 %v283_v8, %s3286_s15  ;;  %v2577_v11 = vmul.f32 -1.442695, %v283_v8 }
 0x5fe   :  { %3052 = vpow2.f32 %v2577_v11 }
 0x601   :  { %v284_v10 = vpop.f32.mrf.mxu3 }
 0x604   :  { %v3053_v6 = vpop.eup %3052 }
 0x605   :  { %v289_v12 = vadd.f32 1.0, %v3053_v6 }
 0x607   :  { %3054 = vrcp.f32 %v289_v12  ;;  %v301_v18 = vand.u32 2147483648, %v289_v12  ;;  %vm295_vm9 = vweird.f32 %v289_v12  ;;  %v299_v19 = vand.u32 2147483647, %v289_v12 }
 0x609   :  { %v302_v21 = vor.u32 1.1754944e-38, %v301_v18  ;;  %vm300_vm11 = vcmp.eq.f32.partialorder %v299_v19, 8.507059e+37 }
 0x60d   :  { %v3055_v13 = vpop.eup %3054 }
 0x60e   :  { %v291_v14 = vmul.f32 %v3055_v13, %v289_v12  ;;  %vm296_vm8 = vweird.f32 %v3055_v13 }
 0x60f   :  { %vm297_vm10 = vmor %vm295_vm9, %vm296_vm8 }
 0x610   :  { %v292_v15 = vsub.f32 1.0, %v291_v14 }
 0x612   :  { %v293_v16 = vmul.f32 %v3055_v13, %v292_v15 }
 0x614   :  { %v294_v17 = vadd.f32 %v3055_v13, %v293_v16 }
 0x616   :  { %v298_v20 = vsel %vm297_vm10, %v3055_v13, %v294_v17 }
 0x617   :  { %v303_v24 = vsel %vm300_vm11, %v302_v21, %v298_v20 }
 0x618   :  { %v316_v34 = vsub.f32 1.0, %v303_v24  ;;  %v322_v36 = vmul.f32 %v303_v24, %v262_v1 }
 0x656   :  { %v307_v23 = vpop.permute.xlu2 %306 }
 0x657   :  { %v309_v25 = vmul.f32 %v307_v23, %v303_v24 }
 0x659   :  { %311 = vrot.lane.b32.xlu1 %v309_v25, %s3283_s9 }
 0x6cb   :  { %v312_v29 = vpop.permute.xlu1 %311 }
 0x6cc   :  { %v314_v30 = vadd.f32 %v312_v29, %v283_v8 }
 0x6ce   :  { %3056 = vtanh.f32 %v314_v30 }
 0x6d4   :  { %v3057_v32 = vpop.eup %3056 }
 0x6d5   :  { %318 = vrot.lane.b32.xlu2 %v3057_v32, %s3289_s11 }
 0x72f   :  { %v319_v35 = vpop.permute.xlu2 %318 }
 0x730   :  { %v321_v37 = vmul.f32 %v319_v35, %v316_v34 }
 0x732   :  { %v3423_v40 = vadd.f32 %v322_v36, %v321_v37 }
 0x734   :  { %v384_v41 = vsel %vm69_vm0, %v383_v38, %v3423_v40  ;;  %v324_v26 = vpack.c.bf16 %v3423_v40, %v3423_v40 }
 0x735   :  { %v385_v42 = vpack.c.bf16 %v384_v41, %v384_v41 }
 0x737   :  { %2603 = vmatmul.msk.bf16.vlgmr.msrb.gmra.mxu0 %vm104_vm1, %v385_v42 }
 0x7b4   :  { %v430_v43 = vpop.f32.mrf.mxu0 }
 0x7b5   :  { %v434_v44 = vadd.f32 %v430_v43, %v3363_v9 }
 0x7b7   :  { %v435_v45 = vsel %vm122_vm2, %v434_v44, -inf }
 0x7b8   :  { %436 = vmax.xlane.f32.xlu1 %v435_v45 }
 0x7bc   :  { %v432_v46 = vpop.f32.mrf.mxu0 }
 0x82b   :  { %v437_v48 = vpop.xlane.xlu1 %436 }
 0x82c   :  { %v438_v49 = vsub.f32 %v434_v44, %v437_v48 }
 0x82e   :  { %v439_v50 = vmul.f32 1.442695, %v438_v49 }
 0x830   :  { %3058 = vpow2.f32 %v439_v50 }
 0x836   :  { %v3059_v51 = vpop.eup %3058 }
 0x837   :  { %v441_v52 = vsel %vm122_vm2, %v3059_v51, 0.0 }
 0x838   :  { %442 = vadd.xlane.f32.xlu0 %v441_v52 }
 0x8ab   :  { %v443_v53 = vpop.xlane.xlu0 %442 }
 0x8ac   :  { %3060 = vrcp.f32 %v443_v53 }
 0x8b2   :  { %v3061_v54 = vpop.eup %3060 }
 0x8b3   :  { %v3431_v55 = vmul.f32 %v3061_v54, %v3059_v51 }
 0x8b5   :  { %v446_v56 = vpack.c.bf16 %v3431_v55, %v3431_v55 }
 0x8b7   :  { %2608 = vmatmul.msk.bf16.vlgmr.msrb.gmra.mxu2 %vm143_vm3, %v446_v56 }
 0x93a   :  { %v467_v57 = vpop.f32.mrf.mxu2 }
 0x93b   :  { %472 = vrot.lane.b32.xlu2 %v467_v57, %s3287_s23 }
 0x942   :  { %v469_v58 = vpop.f32.mrf.mxu2 }
 0x995   :  { %v473_v63 = vpop.permute.xlu2 %472 }
 0x996   :  { %v475_v0 = vadd.f32 %v473_v63, %v430_v43 }
 0x998   :  { %v476_v1 = vadd.f32 %v475_v0, %v3384_v31 }
 0x99a   :  { %v477_v2 = vmax.f32 %v476_v1, 0.0 }
 0x99c   :  { %479 = vrot.lane.b32.xlu0 %v477_v2, %s3288_s30  ;;  %v2969_v2 = vld [vmem:[%s4055_s2 + $0x18] sm:$0xff] }
 0x99d   :  { %730 = vmatpush.bf16.msra.mxu2 %v2969_v2 }
 0xa0e   :  { %v480_v3 = vpop.permute.xlu0 %479 }
 0xa0f   :  { %v482_v4 = vsel %vm69_vm0, %v480_v3, %v3423_v40  ;;  %v2968_v3 = vld [vmem:[%s4055_s2 + $0x10] sm:$0xff] }
 0xa10   :  { %v483_v5 = vpack.c.bf16 %v482_v4, %v482_v4  ;;  %731 = vmatpush.bf16.msra.mxu2 %v2968_v3  ;;  %v2967_v4 = vld [vmem:[%s4055_s2 + $0x8] sm:$0xff] }
 0xa12   :  { %2625 = vmatmul.msk.bf16.vlgmr.msrb.gmra.mxu3 %vm104_vm1, %v483_v5 }
 0xa14   :  { %732 = vmatpush.bf16.msra.mxu2 %v2967_v4 }
 0xa95   :  { %v528_v7 = vpop.f32.mrf.mxu3 }
 0xa96   :  { %v529_v8 = vadd.f32 %v528_v7, %v3394_v39 }
 0xa98   :  { %552 = vrot.lane.b32.xlu2 %v529_v8, %s3286_s15  ;;  %v2626_v11 = vmul.f32 -1.442695, %v529_v8 }
 0xa9a   :  { %3062 = vpow2.f32 %v2626_v11 }
 0xa9d   :  { %v530_v10 = vpop.f32.mrf.mxu3 }
 0xa9e   :  { %v2966_v10 = vld [vmem:[%s4055_s2] sm:$0xff] }
 0xa9f   :  { %733 = vmatpush.bf16.msra.mxu2 %v2966_v10 }
 0xaa0   :  { %v3063_v6 = vpop.eup %3062 }
 0xaa1   :  { %v535_v12 = vadd.f32 1.0, %v3063_v6 }
 0xaa3   :  { %3064 = vrcp.f32 %v535_v12  ;;  %v547_v18 = vand.u32 2147483648, %v535_v12  ;;  %vm541_vm13 = vweird.f32 %v535_v12  ;;  %v545_v19 = vand.u32 2147483647, %v535_v12 }
 0xaa5   :  { %v548_v21 = vor.u32 1.1754944e-38, %v547_v18  ;;  %vm546_vm15 = vcmp.eq.f32.partialorder %v545_v19, 8.507059e+37 }
 0xaa9   :  { %v3065_v13 = vpop.eup %3064 }
 0xaaa   :  { %v537_v14 = vmul.f32 %v3065_v13, %v535_v12  ;;  %vm542_vm12 = vweird.f32 %v3065_v13 }
 0xaab   :  { %vm543_vm14 = vmor %vm541_vm13, %vm542_vm12 }
 0xaac   :  { %v538_v15 = vsub.f32 1.0, %v537_v14  ;;  %v688_v14 = vld [vmem:[%s4053_s0 + $0x2] sm:$0x1] }
 0xaae   :  { %v539_v16 = vmul.f32 %v3065_v13, %v538_v15 }
 0xab0   :  { %v540_v17 = vadd.f32 %v3065_v13, %v539_v16 }
 0xab2   :  { %v544_v20 = vsel %vm543_vm14, %v3065_v13, %v540_v17 }
 0xab3   :  { %v549_v24 = vsel %vm546_vm15, %v548_v21, %v544_v20 }
 0xab4   :  { %v562_v34 = vsub.f32 1.0, %v549_v24  ;;  %v568_v36 = vmul.f32 %v549_v24, %v3423_v40 }
 0xaf2   :  { %v553_v23 = vpop.permute.xlu2 %552 }
 0xaf3   :  { %v555_v25 = vmul.f32 %v553_v23, %v549_v24 }
 0xaf5   :  { %557 = vrot.lane.b32.xlu2 %v555_v25, %s3283_s9  ;;  %v2970_v25 = vld [vmem:[#allocation2] sm:$0xff] }
 0xaf6   :  { %770 = vmatpush.bf16.msra.mxu3 %v2970_v25 }
 0xafd   :  { %330 = vrot.lane.b32.xlu2 %v324_v26, %s3289_s11 }
 0xb4f   :  { %v558_v29 = vpop.permute.xlu2 %557 }
 0xb50   :  { %v560_v30 = vadd.f32 %v558_v29, %v529_v8 }
 0xb52   :  { %3066 = vtanh.f32 %v560_v30  ;;  %v2965_v30 = vld [vmem:[%s4058_s5 + $0x8] sm:$0xff] }
 0xb53   :  { %660 = vmatpush.bf16.msra.mxu0 %v2965_v30 }
 0xb57   :  { %v331_v32 = vpop.permute.xlu2 %330 }
 0xb58   :  { %v3067_v33 = vpop.eup %3066  ;;  %2586 = vmatmul.msk.bf16.vlgmr.msrb.gmra.mxu1 %vm69_vm0, %v331_v32  ;;  %v2964_v32 = vld [vmem:[%s4058_s5] sm:$0xff] }
 0xb59   :  { %564 = vrot.lane.b32.xlu0 %v3067_v33, %s3289_s11  ;;  %661 = vmatpush.bf16.msra.mxu0 %v2964_v32 }
 0xbcb   :  { %v565_v35 = vpop.permute.xlu0 %564 }
 0xbcc   :  { %v567_v37 = vmul.f32 %v565_v35, %v562_v34 }
 0xbce   :  { %v569_v38 = vadd.f32 %v568_v36, %v567_v37 }
 0xbd0   :  { %v570_v41 = vmax.f32 %v569_v38, 0.0 }
 0xbd2   :  { %572 = vrot.lane.b32.xlu0 %v570_v41, %s3289_s11 }
 0xbd5   :  { %v3470_v42 = vpop.f32.mrf.mxu1 }
 0xbdd   :  { %v358_v43 = vpop.f32.mrf.mxu1 }
 0xc44   :  { %v573_v44 = vpop.permute.xlu0 %572 }
 0xc45   :  { %v575_v45 = vsel %vm69_vm0, %v573_v44, %v569_v38 }
 0xc46   :  { %v576_v46 = vpack.c.bf16 %v575_v45, %v575_v45  ;;  %v2974_v45 = vld [vmem:[%s4057_s4 + $0x18] sm:$0xff] }
 0xc47   :  { %828 = vmatpush.bf16.msrb.mxu1 %v2974_v45  ;;  %889 = vmatpush.bf16.msrb.mxu0 %v2974_v45 }
 0xc48   :  { %2627 = vmatmul.msk.bf16.vlgmr.msra.gmra.mxu1 %vm104_vm1, %v576_v46  ;;  %v2973_v46 = vld [vmem:[%s4057_s4 + $0x10] sm:$0xff] }
 0xc4b   :  { %829 = vmatpush.bf16.msrb.mxu1 %v2973_v46  ;;  %890 = vmatpush.bf16.msrb.mxu0 %v2973_v46 }
 0xcc5   :  { %v589_v47 = vpop.f32.mrf.mxu1 }
 0xcc6   :  { %v590_v48 = vadd.f32 %v589_v47, %v3394_v39  ;;  %v2972_v47 = vld [vmem:[%s4057_s4 + $0x8] sm:$0xff] }
 0xcc7   :  { %830 = vmatpush.bf16.msrb.mxu1 %v2972_v47  ;;  %891 = vmatpush.bf16.msrb.mxu0 %v2972_v47 }
 0xcc8   :  { %613 = vrot.lane.b32.xlu2 %v590_v48, %s3286_s15  ;;  %v2628_v50 = vmul.f32 -1.442695, %v590_v48 }
 0xcca   :  { %3068 = vpow2.f32 %v2628_v50 }
 0xccd   :  { %v591_v49 = vpop.f32.mrf.mxu1 }
 0xcd0   :  { %v3069_v51 = vpop.eup %3068 }
 0xcd1   :  { %v596_v52 = vadd.f32 1.0, %v3069_v51 }
 0xcd3   :  { %3070 = vrcp.f32 %v596_v52  ;;  %v608_v59 = vand.u32 2147483648, %v596_v52  ;;  %vm602_vm5 = vweird.f32 %v596_v52  ;;  %v606_v60 = vand.u32 2147483647, %v596_v52 }
 0xcd5   :  { %v609_v62 = vor.u32 1.1754944e-38, %v608_v59  ;;  %vm607_vm7 = vcmp.eq.f32.partialorder %v606_v60, 8.507059e+37 }
 0xcd9   :  { %v3071_v53 = vpop.eup %3070 }
 0xcda   :  { %v598_v54 = vmul.f32 %v3071_v53, %v596_v52  ;;  %vm603_vm4 = vweird.f32 %v3071_v53 }
 0xcdb   :  { %vm604_vm6 = vmor %vm602_vm5, %vm603_vm4 }
 0xcdc   :  { %v599_v56 = vsub.f32 1.0, %v598_v54 }
 0xcde   :  { %v600_v57 = vmul.f32 %v3071_v53, %v599_v56 }
 0xce0   :  { %v601_v58 = vadd.f32 %v3071_v53, %v600_v57 }
 0xce2   :  { %v605_v61 = vsel %vm604_vm6, %v3071_v53, %v601_v58 }
 0xce3   :  { %v610_v0 = vsel %vm607_vm7, %v609_v62, %v605_v61 }
 0xce4   :  { %v623_v11 = vsub.f32 1.0, %v610_v0  ;;  %v629_v12 = vmul.f32 %v610_v0, %v569_v38 }
 0xd22   :  { %v614_v63 = vpop.permute.xlu2 %613 }
 0xd23   :  { %v616_v1 = vmul.f32 %v614_v63, %v610_v0 }
 0xd25   :  { %618 = vrot.lane.b32.xlu1 %v616_v1, %s3283_s9 }
 0xd97   :  { %v619_v5 = vpop.permute.xlu1 %618 }
 0xd98   :  { %v621_v7 = vadd.f32 %v619_v5, %v590_v48  ;;  %v2971_v48 = vld [vmem:[%s4057_s4] sm:$0xff] }
 0xd99   :  { %831 = vmatpush.bf16.msrb.mxu1 %v2971_v48  ;;  %892 = vmatpush.bf16.msrb.mxu0 %v2971_v48 }
 0xd9a   :  { %3072 = vtanh.f32 %v621_v7 }
 0xda0   :  { %v3073_v8 = vpop.eup %3072 }
 0xda1   :  { %625 = vrot.lane.b32.xlu0 %v3073_v8, %s3289_s11 }
 0xe13   :  { %v626_v6 = vpop.permute.xlu0 %625 }
 0xe14   :  { %v628_v13 = vmul.f32 %v626_v6, %v623_v11 }
 0xe16   :  { %v3493_v15 = vadd.f32 %v629_v12, %v628_v13 }
 0xe18   :  { %v689_v16 = vsel %vm69_vm0, %v688_v14, %v3493_v15  ;;  %v631_v29 = vpack.c.bf16 %v3493_v15, %v3493_v15 }
 0xe19   :  { %v690_v17 = vpack.c.bf16 %v689_v16, %v689_v16 }
 0xe1b   :  { %2654 = vmatmul.msk.bf16.vlgmr.msra.gmra.mxu2 %vm104_vm1, %v690_v17 }
 0xe9e   :  { %v735_v18 = vpop.f32.mrf.mxu2 }
 0xe9f   :  { %v739_v19 = vadd.f32 %v735_v18, %v3363_v9 }
 0xea1   :  { %v740_v20 = vsel %vm122_vm2, %v739_v19, -inf }
 0xea2   :  { %741 = vmax.xlane.f32.xlu2 %v740_v20 }
 0xea6   :  { %v737_v21 = vpop.f32.mrf.mxu2 }
 0xf15   :  { %v742_v23 = vpop.xlane.xlu2 %741 }
 0xf16   :  { %v743_v24 = vsub.f32 %v739_v19, %v742_v23 }
 0xf18   :  { %v744_v26 = vmul.f32 1.442695, %v743_v24 }
 0xf1a   :  { %3074 = vpow2.f32 %v744_v26 }
 0xf20   :  { %v3075_v27 = vpop.eup %3074 }
 0xf21   :  { %v746_v28 = vsel %vm122_vm2, %v3075_v27, 0.0 }
 0xf22   :  { %747 = vadd.xlane.f32.xlu0 %v746_v28 }
 0xf36   :  { %637 = vrot.lane.b32.xlu0 %v631_v29, %s3289_s11 }
 0xf95   :  { %v748_v33 = vpop.xlane.xlu0 %747 }
 0xf96   :  { %3076 = vrcp.f32 %v748_v33 }
 0xf9c   :  { %v3077_v34 = vpop.eup %3076 }
 0xf9d   :  { %v3510_v35 = vmul.f32 %v3077_v34, %v3075_v27 }
 0xf9f   :  { %v751_v36 = vpack.c.bf16 %v3510_v35, %v3510_v35 }
 0xfa1   :  { %2659 = vmatmul.msk.bf16.vlgmr.msra.gmra.mxu3 %vm143_vm3, %v751_v36 }
 0xfa8   :  { %v638_v37 = vpop.permute.xlu0 %637 }
 0xfa9   :  { %2637 = vmatmul.msk.bf16.vlgmr.msra.gmra.mxu0 %vm69_vm0, %v638_v37 }
0x1024   :  { %v772_v38 = vpop.f32.mrf.mxu3 }
0x1025   :  { %777 = vrot.lane.b32.xlu1 %v772_v38, %s3287_s23 }
0x1026   :  { %v3517_v41 = vpop.f32.mrf.mxu0 }
0x102c   :  { %v774_v43 = vpop.f32.mrf.mxu3 }
0x102e   :  { %v665_v44 = vpop.f32.mrf.mxu0 }
0x1097   :  { %v778_v49 = vpop.permute.xlu1 %777 }
0x1098   :  { %v780_v50 = vadd.f32 %v778_v49, %v735_v18 }
0x109a   :  { %v781_v51 = vadd.f32 %v780_v50, %v3384_v31  ;;  %v2980_v50 = vld [vmem:[%s4055_s2 + $0x18] sm:$0xff] }
0x109b   :  { %1035 = vmatpush.bf16.msrb.mxu3 %v2980_v50 }
0x109c   :  { %v782_v52 = vmax.f32 %v781_v51, 0.0  ;;  %v2979_v51 = vld [vmem:[%s4055_s2 + $0x10] sm:$0xff] }
0x109e   :  { %784 = vrot.lane.b32.xlu1 %v782_v52, %s3288_s30  ;;  %v2978_v52 = vld [vmem:[%s4055_s2 + $0x8] sm:$0xff] }
0x109f   :  { %1036 = vmatpush.bf16.msrb.mxu3 %v2979_v51 }
0x10a3   :  { %1037 = vmatpush.bf16.msrb.mxu3 %v2978_v52 }
0x1110   :  { %v785_v53 = vpop.permute.xlu1 %784 }
0x1111   :  { %v787_v54 = vsel %vm69_vm0, %v785_v53, %v3493_v15 }
0x1112   :  { %v788_v56 = vpack.c.bf16 %v787_v54, %v787_v54 }
0x1114   :  { %2676 = vmatmul.msk.bf16.vlgmr.msrb.gmra.mxu1 %vm104_vm1, %v788_v56 }
0x1191   :  { %v833_v57 = vpop.f32.mrf.mxu1 }
0x1192   :  { %v834_v58 = vadd.f32 %v833_v57, %v3394_v39  ;;  %v2977_v57 = vld [vmem:[%s4055_s2] sm:$0xff] }
0x1193   :  { %1038 = vmatpush.bf16.msrb.mxu3 %v2977_v57 }
0x1194   :  { %857 = vrot.lane.b32.xlu1 %v834_v58, %s3286_s15  ;;  %v2677_v60 = vmul.f32 -1.442695, %v834_v58 }
0x1196   :  { %3078 = vpow2.f32 %v2677_v60 }
0x1199   :  { %v835_v59 = vpop.f32.mrf.mxu1 }
0x119c   :  { %v3079_v61 = vpop.eup %3078 }
0x119d   :  { %v840_v62 = vadd.f32 1.0, %v3079_v61 }
0x119f   :  { %3080 = vrcp.f32 %v840_v62  ;;  %v852_v4 = vand.u32 2147483648, %v840_v62  ;;  %vm846_vm9 = vweird.f32 %v840_v62  ;;  %v850_v5 = vand.u32 2147483647, %v840_v62 }
0x11a1   :  { %v853_v8 = vor.u32 1.1754944e-38, %v852_v4  ;;  %vm851_vm11 = vcmp.eq.f32.partialorder %v850_v5, 8.507059e+37 }
0x11a5   :  { %v3081_v63 = vpop.eup %3080 }
0x11a6   :  { %v842_v0 = vmul.f32 %v3081_v63, %v840_v62  ;;  %vm847_vm8 = vweird.f32 %v3081_v63  ;;  %v993_v62 = vld [vmem:[%s4053_s0 + $0x3] sm:$0x1] }
0x11a7   :  { %vm848_vm10 = vmor %vm846_vm9, %vm847_vm8 }
0x11a8   :  { %v843_v1 = vsub.f32 1.0, %v842_v0 }
0x11aa   :  { %v844_v2 = vmul.f32 %v3081_v63, %v843_v1 }
0x11ac   :  { %v845_v3 = vadd.f32 %v3081_v63, %v844_v2 }
0x11ae   :  { %v849_v7 = vsel %vm848_vm10, %v3081_v63, %v845_v3 }
0x11af   :  { %v854_v11 = vsel %vm851_vm11, %v853_v8, %v849_v7  ;;  %v2976_v8 = vld [vmem:[%s4058_s5 + $0x8] sm:$0xff] }
0x11b0   :  { %v867_v16 = vsub.f32 1.0, %v854_v11  ;;  %v873_v18 = vmul.f32 %v854_v11, %v3493_v15  ;;  %965 = vmatpush.bf16.msrb.mxu2 %v2976_v8 }
0x1206   :  { %v858_v10 = vpop.permute.xlu1 %857 }
0x1207   :  { %v860_v6 = vmul.f32 %v858_v10, %v854_v11  ;;  %v2975_v10 = vld [vmem:[%s4058_s5] sm:$0xff] }
0x1208   :  { %966 = vmatpush.bf16.msrb.mxu2 %v2975_v10 }
0x1209   :  { %862 = vrot.lane.b32.xlu2 %v860_v6, %s3283_s9 }
0x1263   :  { %v863_v12 = vpop.permute.xlu2 %862 }
0x1264   :  { %v865_v13 = vadd.f32 %v863_v12, %v834_v58 }
0x1266   :  { %3082 = vtanh.f32 %v865_v13 }
0x126c   :  { %v3083_v14 = vpop.eup %3082 }
0x126d   :  { %869 = vrot.lane.b32.xlu1 %v3083_v14, %s3289_s11 }
0x12df   :  { %v870_v17 = vpop.permute.xlu1 %869 }
0x12e0   :  { %v872_v19 = vmul.f32 %v870_v17, %v867_v16 }
0x12e2   :  { %v874_v20 = vadd.f32 %v873_v18, %v872_v19 }
0x12e4   :  { %v875_v21 = vmax.f32 %v874_v20, 0.0 }
0x12e6   :  { %877 = vrot.lane.b32.xlu1 %v875_v21, %s3289_s11 }
0x1358   :  { %v878_v23 = vpop.permute.xlu1 %877 }
0x1359   :  { %v880_v24 = vsel %vm69_vm0, %v878_v23, %v874_v20 }
0x135a   :  { %v881_v25 = vpack.c.bf16 %v880_v24, %v880_v24 }
0x135c   :  { %2678 = vmatmul.msk.bf16.vlgmr.msrb.gmra.mxu0 %vm104_vm1, %v881_v25 }
0x13d9   :  { %v894_v26 = vpop.f32.mrf.mxu0 }
0x13da   :  { %v895_v27 = vadd.f32 %v894_v26, %v3394_v39  ;;  %v2985_v26 = vld [vmem:[%s4057_s4 + $0x18] sm:$0xff] }
0x13db   :  { %1133 = vmatpush.bf16.msra.mxu0 %v2985_v26  ;;  %1194 = vmatpush.bf16.msra.mxu2 %v2985_v26 }
0x13dc   :  { %918 = vrot.lane.b32.xlu1 %v895_v27, %s3286_s15  ;;  %v2679_v29 = vmul.f32 -1.442695, %v895_v27 }
0x13de   :  { %3084 = vpow2.f32 %v2679_v29  ;;  %v2982_v29 = vld [vmem:[%s4057_s4] sm:$0xff] }
0x13e1   :  { %v896_v28 = vpop.f32.mrf.mxu0 }
0x13e2   :  { %v2983_v28 = vld [vmem:[%s4057_s4 + $0x8] sm:$0xff] }
0x13e4   :  { %v3085_v30 = vpop.eup %3084 }
0x13e5   :  { %v901_v32 = vadd.f32 1.0, %v3085_v30 }
0x13e7   :  { %3086 = vrcp.f32 %v901_v32  ;;  %v913_v43 = vand.u32 2147483648, %v901_v32  ;;  %vm907_vm13 = vweird.f32 %v901_v32  ;;  %v911_v44 = vand.u32 2147483647, %v901_v32 }
0x13e9   :  { %v914_v46 = vor.u32 1.1754944e-38, %v913_v43  ;;  %vm912_vm15 = vcmp.eq.f32.partialorder %v911_v44, 8.507059e+37 }
0x13ed   :  { %v3087_v33 = vpop.eup %3086 }
0x13ee   :  { %v903_v34 = vmul.f32 %v3087_v33, %v901_v32  ;;  %vm908_vm12 = vweird.f32 %v3087_v33 }
0x13ef   :  { %vm909_vm14 = vmor %vm907_vm13, %vm908_vm12 }
0x13f0   :  { %v904_v36 = vsub.f32 1.0, %v903_v34 }
0x13f2   :  { %v905_v37 = vmul.f32 %v3087_v33, %v904_v36 }
0x13f4   :  { %v906_v38 = vadd.f32 %v3087_v33, %v905_v37 }
0x13f6   :  { %v910_v45 = vsel %vm909_vm14, %v3087_v33, %v906_v38 }
0x13f7   :  { %v915_v48 = vsel %vm912_vm15, %v914_v46, %v910_v45 }
0x13f8   :  { %v928_v58 = vsub.f32 1.0, %v915_v48  ;;  %v934_v60 = vmul.f32 %v915_v48, %v874_v20 }
0x144e   :  { %v919_v47 = vpop.permute.xlu1 %918 }
0x144f   :  { %v921_v49 = vmul.f32 %v919_v47, %v915_v48 }
0x1451   :  { %923 = vrot.lane.b32.xlu2 %v921_v49, %s3283_s9 }
0x14ab   :  { %v924_v53 = vpop.permute.xlu2 %923 }
0x14ac   :  { %v926_v54 = vadd.f32 %v924_v53, %v895_v27  ;;  %v2984_v27 = vld [vmem:[%s4057_s4 + $0x10] sm:$0xff] }
0x14ad   :  { %1134 = vmatpush.bf16.msra.mxu0 %v2984_v27  ;;  %1195 = vmatpush.bf16.msra.mxu2 %v2984_v27 }
0x14ae   :  { %3088 = vtanh.f32 %v926_v54 }
0x14b1   :  { %1135 = vmatpush.bf16.msra.mxu0 %v2983_v28  ;;  %1196 = vmatpush.bf16.msra.mxu2 %v2983_v28 }
0x14b4   :  { %v3089_v56 = vpop.eup %3088 }
0x14b5   :  { %930 = vrot.lane.b32.xlu0 %v3089_v56, %s3289_s11  ;;  %1136 = vmatpush.bf16.msra.mxu0 %v2982_v29 }
0x14b6   :  { %1197 = vmatpush.bf16.msra.mxu2 %v2982_v29 }
0x1527   :  { %v931_v59 = vpop.permute.xlu0 %930 }
0x1528   :  { %v933_v61 = vmul.f32 %v931_v59, %v928_v58 }
0x152a   :  { %v3563_v63 = vadd.f32 %v934_v60, %v933_v61 }
0x152c   :  { %v994_v0 = vsel %vm69_vm0, %v993_v62, %v3563_v63  ;;  %v936_v7 = vpack.c.bf16 %v3563_v63, %v3563_v63 }
0x152d   :  { %v995_v1 = vpack.c.bf16 %v994_v0, %v994_v0 }
0x152f   :  { %2705 = vmatmul.msk.bf16.vlgmr.msrb.gmra.mxu3 %vm104_vm1, %v995_v1 }
0x15b2   :  { %v1040_v2 = vpop.f32.mrf.mxu3 }
0x15b3   :  { %v1044_v3 = vadd.f32 %v1040_v2, %v3363_v9  ;;  %v2981_v9 = vld [vmem:[#allocation2] sm:$0xff] }
0x15b4   :  { %1075 = vmatpush.bf16.msra.mxu1 %v2981_v9 }
0x15b5   :  { %v1045_v4 = vsel %vm122_vm2, %v1044_v3, -inf }
0x15b6   :  { %1046 = vmax.xlane.f32.xlu1 %v1045_v4 }
0x15ba   :  { %v1042_v5 = vpop.f32.mrf.mxu3 }
0x15cf   :  { %942 = vrot.lane.b32.xlu1 %v936_v7, %s3289_s11 }
0x1629   :  { %v1047_v11 = vpop.xlane.xlu1 %1046 }
0x162a   :  { %v1048_v6 = vsub.f32 %v1044_v3, %v1047_v11 }
0x162c   :  { %v1049_v12 = vmul.f32 1.442695, %v1048_v6 }
0x162e   :  { %3090 = vpow2.f32 %v1049_v12 }
0x1634   :  { %v3091_v13 = vpop.eup %3090 }
0x1635   :  { %v1051_v14 = vsel %vm122_vm2, %v3091_v13, 0.0 }
0x1636   :  { %1052 = vadd.xlane.f32.xlu2 %v1051_v14 }
0x1641   :  { %v943_v16 = vpop.permute.xlu1 %942 }
0x1642   :  { %2688 = vmatmul.msk.bf16.vlgmr.msrb.gmra.mxu2 %vm69_vm0, %v943_v16 }
0x16a9   :  { %v1053_v17 = vpop.xlane.xlu2 %1052 }
0x16aa   :  { %3092 = vrcp.f32 %v1053_v17 }
0x16b0   :  { %v3093_v18 = vpop.eup %3092 }
0x16b1   :  { %v3581_v19 = vmul.f32 %v3093_v18, %v3091_v13 }
0x16b3   :  { %v1056_v20 = vpack.c.bf16 %v3581_v19, %v3581_v19 }
0x16b5   :  { %2710 = vmatmul.msk.bf16.vlgmr.msra.gmra.mxu1 %vm143_vm3, %v1056_v20 }
0x16c5   :  { %v3586_v21 = vpop.f32.mrf.mxu2 }
0x16cd   :  { %v970_v23 = vpop.f32.mrf.mxu2 }
0x1732   :  { %v1077_v24 = vpop.f32.mrf.mxu1 }
0x1733   :  { %1082 = vrot.lane.b32.xlu0 %v1077_v24, %s3287_s23 }
0x173a   :  { %v1079_v25 = vpop.f32.mrf.mxu1 }
0x17a5   :  { %v1083_v30 = vpop.permute.xlu0 %1082 }
0x17a6   :  { %v1085_v32 = vadd.f32 %v1083_v30, %v1040_v2 }
0x17a8   :  { %v1086_v33 = vadd.f32 %v1085_v32, %v3384_v31 }
0x17aa   :  { %v1087_v34 = vmax.f32 %v1086_v33, 0.0  ;;  %v2991_v33 = vld [vmem:[%s4055_s2 + $0x18] sm:$0xff] }
0x17ab   :  { %1340 = vmatpush.bf16.msrb.mxu1 %v2991_v33 }
0x17ac   :  { %1089 = vrot.lane.b32.xlu0 %v1087_v34, %s3288_s30  ;;  %v2990_v34 = vld [vmem:[%s4055_s2 + $0x10] sm:$0xff] }
0x17af   :  { %1341 = vmatpush.bf16.msrb.mxu1 %v2990_v34 }
0x181e   :  { %v1090_v36 = vpop.permute.xlu0 %1089 }
0x181f   :  { %v1092_v37 = vsel %vm69_vm0, %v1090_v36, %v3563_v63  ;;  %v2989_v36 = vld [vmem:[%s4055_s2 + $0x8] sm:$0xff] }
0x1820   :  { %v1093_v38 = vpack.c.bf16 %v1092_v37, %v1092_v37  ;;  %1342 = vmatpush.bf16.msrb.mxu1 %v2989_v36 }
0x1822   :  { %2727 = vmatmul.msk.bf16.vlgmr.msra.gmra.mxu0 %vm104_vm1, %v1093_v38 }
0x189f   :  { %v1138_v43 = vpop.f32.mrf.mxu0 }
0x18a0   :  { %v1139_v44 = vadd.f32 %v1138_v43, %v3394_v39 }
0x18a2   :  { %1162 = vrot.lane.b32.xlu0 %v1139_v44, %s3286_s15  ;;  %v2728_v46 = vmul.f32 -1.442695, %v1139_v44 }
0x18a4   :  { %3094 = vpow2.f32 %v2728_v46 }
0x18a7   :  { %v1140_v45 = vpop.f32.mrf.mxu0 }
0x18aa   :  { %v3095_v47 = vpop.eup %3094 }
0x18ab   :  { %v1145_v48 = vadd.f32 1.0, %v3095_v47 }
0x18ad   :  { %3096 = vrcp.f32 %v1145_v48  ;;  %v1157_v54 = vand.u32 2147483648, %v1145_v48  ;;  %vm1151_vm5 = vweird.f32 %v1145_v48  ;;  %v1155_v56 = vand.u32 2147483647, %v1145_v48 }
0x18af   :  { %v1158_v58 = vor.u32 1.1754944e-38, %v1157_v54  ;;  %vm1156_vm7 = vcmp.eq.f32.partialorder %v1155_v56, 8.507059e+37  ;;  %v3638_v54 = vld [vmem:[#allocation5] sm:$0x1] }
0x18b3   :  { %v3097_v49 = vpop.eup %3096 }
0x18b4   :  { %v1147_v50 = vmul.f32 %v3097_v49, %v1145_v48  ;;  %vm1152_vm4 = vweird.f32 %v3097_v49 }
0x18b5   :  { %vm1153_vm6 = vmor %vm1151_vm5, %vm1152_vm4 }
0x18b6   :  { %v1148_v51 = vsub.f32 1.0, %v1147_v50 }
0x18b8   :  { %v1149_v52 = vmul.f32 %v3097_v49, %v1148_v51 }
0x18ba   :  { %v1150_v53 = vadd.f32 %v3097_v49, %v1149_v52 }
0x18bc   :  { %v1154_v57 = vsel %vm1153_vm6, %v3097_v49, %v1150_v53  ;;  %v1298_v49 = vld [vmem:[%s4053_s0 + $0x4] sm:$0x1] }
0x18bd   :  { %v1159_v60 = vsel %vm1156_vm7, %v1158_v58, %v1154_v57 }
0x18be   :  { %v1172_v2 = vsub.f32 1.0, %v1159_v60  ;;  %v1178_v4 = vmul.f32 %v1159_v60, %v3563_v63 }
0x1914   :  { %v1163_v59 = vpop.permute.xlu0 %1162 }
0x1915   :  { %v1165_v61 = vmul.f32 %v1163_v59, %v1159_v60  ;;  %v2987_v60 = vld [vmem:[%s4058_s5 + $0x8] sm:$0xff] }
0x1916   :  { %1270 = vmatpush.bf16.msra.mxu3 %v2987_v60 }
0x1917   :  { %1167 = vrot.lane.b32.xlu0 %v1165_v61, %s3283_s9  ;;  %v2986_v61 = vld [vmem:[%s4058_s5] sm:$0xff] }
0x191a   :  { %1271 = vmatpush.bf16.msra.mxu3 %v2986_v61 }
0x1989   :  { %v1168_v62 = vpop.permute.xlu0 %1167 }
0x198a   :  { %v1170_v0 = vadd.f32 %v1168_v62, %v1139_v44  ;;  %v2988_v44 = vld [vmem:[%s4055_s2] sm:$0xff] }
0x198b   :  { %1343 = vmatpush.bf16.msrb.mxu1 %v2988_v44  ;;  %v2992_v62 = vld [vmem:[#allocation2] sm:$0xff] }
0x198c   :  { %3098 = vtanh.f32 %v1170_v0  ;;  %1380 = vmatpush.bf16.msrb.mxu0 %v2992_v62 }
0x1992   :  { %v3099_v1 = vpop.eup %3098 }
0x1993   :  { %1174 = vrot.lane.b32.xlu0 %v3099_v1, %s3289_s11 }
0x1a05   :  { %v1175_v3 = vpop.permute.xlu0 %1174 }
0x1a06   :  { %v1177_v5 = vmul.f32 %v1175_v3, %v1172_v2 }
0x1a08   :  { %v1179_v7 = vadd.f32 %v1178_v4, %v1177_v5 }
0x1a0a   :  { %v1180_v8 = vmax.f32 %v1179_v7, 0.0 }
0x1a0c   :  { %1182 = vrot.lane.b32.xlu2 %v1180_v8, %s3289_s11 }
0x1a66   :  { %v1183_v10 = vpop.permute.xlu2 %1182 }
0x1a67   :  { %v1185_v9 = vsel %vm69_vm0, %v1183_v10, %v1179_v7 }
0x1a68   :  { %v1186_v11 = vpack.c.bf16 %v1185_v9, %v1185_v9 }
0x1a6a   :  { %2729 = vmatmul.msk.bf16.vlgmr.msra.gmra.mxu2 %vm104_vm1, %v1186_v11 }
0x1aed   :  { %v1199_v6 = vpop.f32.mrf.mxu2 }
0x1aee   :  { %v1200_v12 = vadd.f32 %v1199_v6, %v3394_v39 }
0x1af0   :  { %1223 = vrot.lane.b32.xlu0 %v1200_v12, %s3286_s15  ;;  %v2730_v14 = vmul.f32 -1.442695, %v1200_v12 }
0x1af2   :  { %3100 = vpow2.f32 %v2730_v14  ;;  %v2996_v14 = vld [vmem:[%s4057_s4 + $0x18] sm:$0xff] }
0x1af3   :  { %1438 = vmatpush.bf16.msrb.mxu2 %v2996_v14  ;;  %1499 = vmatpush.bf16.msrb.mxu3 %v2996_v14 }
0x1af5   :  { %v1201_v13 = vpop.f32.mrf.mxu2 }
0x1af8   :  { %v3101_v16 = vpop.eup %3100 }
0x1af9   :  { %v1206_v17 = vadd.f32 1.0, %v3101_v16  ;;  %v2995_v16 = vld [vmem:[%s4057_s4 + $0x10] sm:$0xff] }
0x1afa   :  { %1439 = vmatpush.bf16.msrb.mxu2 %v2995_v16  ;;  %1500 = vmatpush.bf16.msrb.mxu3 %v2995_v16 }
0x1afb   :  { %3102 = vrcp.f32 %v1206_v17  ;;  %v1218_v26 = vand.u32 2147483648, %v1206_v17  ;;  %vm1212_vm9 = vweird.f32 %v1206_v17  ;;  %v1216_v27 = vand.u32 2147483647, %v1206_v17 }
0x1afd   :  { %v1219_v39 = vor.u32 1.1754944e-38, %v1218_v26  ;;  %vm1217_vm11 = vcmp.eq.f32.partialorder %v1216_v27, 8.507059e+37 }
0x1b01   :  { %v3103_v18 = vpop.eup %3102 }
0x1b02   :  { %v1208_v20 = vmul.f32 %v3103_v18, %v1206_v17  ;;  %vm1213_vm8 = vweird.f32 %v3103_v18  ;;  %v2994_v17 = vld [vmem:[%s4057_s4 + $0x8] sm:$0xff] }
0x1b03   :  { %vm1214_vm10 = vmor %vm1212_vm9, %vm1213_vm8  ;;  %1440 = vmatpush.bf16.msrb.mxu2 %v2994_v17  ;;  %1501 = vmatpush.bf16.msrb.mxu3 %v2994_v17 }
0x1b04   :  { %v1209_v23 = vsub.f32 1.0, %v1208_v20 }
0x1b06   :  { %v1210_v24 = vmul.f32 %v3103_v18, %v1209_v23 }
0x1b08   :  { %v1211_v25 = vadd.f32 %v3103_v18, %v1210_v24 }
0x1b0a   :  { %v1215_v28 = vsel %vm1214_vm10, %v3103_v18, %v1211_v25  ;;  %v2993_v18 = vld [vmem:[%s4057_s4] sm:$0xff] }
0x1b0b   :  { %v1220_v30 = vsel %vm1217_vm11, %v1219_v39, %v1215_v28  ;;  %1441 = vmatpush.bf16.msrb.mxu2 %v2993_v18  ;;  %1502 = vmatpush.bf16.msrb.mxu3 %v2993_v18 }
0x1b0c   :  { %v1233_v45 = vsub.f32 1.0, %v1220_v30  ;;  %v1239_v47 = vmul.f32 %v1220_v30, %v1179_v7 }
0x1b62   :  { %v1224_v29 = vpop.permute.xlu0 %1223 }
0x1b63   :  { %v1226_v32 = vmul.f32 %v1224_v29, %v1220_v30  ;;  %v3678_v29 = vld [vmem:[#allocation5 + $0x2] sm:$0x1] }
0x1b65   :  { %1228 = vrot.lane.b32.xlu0 %v1226_v32, %s3283_s9 }
0x1bd7   :  { %v1229_v37 = vpop.permute.xlu0 %1228 }
0x1bd8   :  { %v1231_v38 = vadd.f32 %v1229_v37, %v1200_v12 }
0x1bda   :  { %3104 = vtanh.f32 %v1231_v38 }
0x1be0   :  { %v3105_v43 = vpop.eup %3104 }
0x1be1   :  { %1235 = vrot.lane.b32.xlu0 %v3105_v43, %s3289_s11 }
0x1c53   :  { %v1236_v46 = vpop.permute.xlu0 %1235 }
0x1c54   :  { %v1238_v48 = vmul.f32 %v1236_v46, %v1233_v45 }
0x1c56   :  { %v3633_v50 = vadd.f32 %v1239_v47, %v1238_v48 }
0x1c58   :  { %v1299_v51 = vsel %vm69_vm0, %v1298_v49, %v3633_v50  ;;  %v1241_v59 = vpack.c.bf16 %v3633_v50, %v3633_v50 }
0x1c59   :  { %v1300_v52 = vpack.c.bf16 %v1299_v51, %v1299_v51 }
0x1c5b   :  { %2756 = vmatmul.msk.bf16.vlgmr.msrb.gmra.mxu1 %vm104_vm1, %v1300_v52 }
0x1cd8   :  { %v1345_v53 = vpop.f32.mrf.mxu1 }
0x1cd9   :  { %v1349_v56 = vadd.f32 %v3638_v54, %v1345_v53 }
0x1cdb   :  { %v1350_v57 = vsel %vm122_vm2, %v1349_v56, -inf }
0x1cdc   :  { %1351 = vmax.xlane.f32.xlu1 %v1350_v57 }
0x1ce0   :  { %v1347_v58 = vpop.f32.mrf.mxu1 }
0x1cf5   :  { %1247 = vrot.lane.b32.xlu1 %v1241_v59, %s3289_s11 }
0x1d4f   :  { %v1352_v0 = vpop.xlane.xlu1 %1351 }
0x1d50   :  { %v1353_v1 = vsub.f32 %v1349_v56, %v1352_v0 }
0x1d52   :  { %v1354_v2 = vmul.f32 1.442695, %v1353_v1 }
0x1d54   :  { %3106 = vpow2.f32 %v1354_v2 }
0x1d5a   :  { %v3107_v3 = vpop.eup %3106 }
0x1d5b   :  { %v1356_v4 = vsel %vm122_vm2, %v3107_v3, 0.0 }
0x1d5c   :  { %1357 = vadd.xlane.f32.xlu2 %v1356_v4 }
0x1d67   :  { %v1248_v5 = vpop.permute.xlu1 %1247 }
0x1d68   :  { %2739 = vmatmul.msk.bf16.vlgmr.msra.gmra.mxu3 %vm69_vm0, %v1248_v5 }
0x1dcf   :  { %v1358_v7 = vpop.xlane.xlu2 %1357 }
0x1dd0   :  { %3108 = vrcp.f32 %v1358_v7 }
0x1dd6   :  { %v3109_v8 = vpop.eup %3108 }
0x1dd7   :  { %v3653_v10 = vmul.f32 %v3109_v8, %v3107_v3 }
0x1dd9   :  { %v1361_v9 = vpack.c.bf16 %v3653_v10, %v3653_v10 }
0x1ddb   :  { %2761 = vmatmul.msk.bf16.vlgmr.msrb.gmra.mxu0 %vm143_vm3, %v1361_v9 }
0x1deb   :  { %v3658_v11 = vpop.f32.mrf.mxu3 }
0x1df3   :  { %v1275_v6 = vpop.f32.mrf.mxu3 }
0x1e58   :  { %v1382_v12 = vpop.f32.mrf.mxu0 }
0x1e59   :  { %1387 = vrot.lane.b32.xlu0 %v1382_v12, %s3287_s23 }
0x1e60   :  { %v1384_v13 = vpop.f32.mrf.mxu0 }
0x1ecb   :  { %v1388_v20 = vpop.permute.xlu0 %1387 }
0x1ecc   :  { %v1390_v23 = vadd.f32 %v1388_v20, %v1345_v53 }
0x1ece   :  { %v1391_v24 = vadd.f32 %v1390_v23, %v3384_v31 }
0x1ed0   :  { %v1392_v25 = vmax.f32 %v1391_v24, 0.0 }
0x1ed2   :  { %1394 = vrot.lane.b32.xlu0 %v1392_v25, %s3288_s30 }
0x1f44   :  { %v1395_v26 = vpop.permute.xlu0 %1394 }
0x1f45   :  { %v1397_v27 = vsel %vm69_vm0, %v1395_v26, %v3633_v50 }
0x1f46   :  { %v1398_v28 = vpack.c.bf16 %v1397_v27, %v1397_v27 }
0x1f48   :  { %2778 = vmatmul.msk.bf16.vlgmr.msrb.gmra.mxu2 %vm104_vm1, %v1398_v28 }
0x1fcb   :  { %v1443_v39 = vpop.f32.mrf.mxu2 }
0x1fcc   :  { %v1444_v30 = vadd.f32 %v3678_v29, %v1443_v39  ;;  %v3002_v39 = vld [vmem:[%s4055_s2 + $0x18] sm:$0xff] }
0x1fcd   :  { %1645 = vmatpush.bf16.msra.mxu0 %v3002_v39 }
0x1fce   :  { %1467 = vrot.lane.b32.xlu0 %v1444_v30, %s3286_s15  ;;  %v2779_v33 = vmul.f32 -1.442695, %v1444_v30 }
0x1fd0   :  { %3110 = vpow2.f32 %v2779_v33 }
0x1fd3   :  { %v1445_v32 = vpop.f32.mrf.mxu2 }
0x1fd4   :  { %v3000_v32 = vld [vmem:[%s4055_s2 + $0x8] sm:$0xff] }
0x1fd6   :  { %v3111_v34 = vpop.eup %3110 }
0x1fd7   :  { %v1450_v36 = vadd.f32 1.0, %v3111_v34 }
0x1fd9   :  { %3112 = vrcp.f32 %v1450_v36  ;;  %v1462_v46 = vand.u32 2147483648, %v1450_v36  ;;  %vm1456_vm13 = vweird.f32 %v1450_v36  ;;  %v1460_v47 = vand.u32 2147483647, %v1450_v36 }
0x1fdb   :  { %v1463_v49 = vor.u32 1.1754944e-38, %v1462_v46  ;;  %vm1461_vm15 = vcmp.eq.f32.partialorder %v1460_v47, 8.507059e+37  ;;  %v1603_v46 = vld [vmem:[%s4053_s0 + $0x5] sm:$0x1] }
0x1fdf   :  { %v3113_v37 = vpop.eup %3112 }
0x1fe0   :  { %v1452_v38 = vmul.f32 %v3113_v37, %v1450_v36  ;;  %vm1457_vm12 = vweird.f32 %v3113_v37 }
0x1fe1   :  { %vm1458_vm14 = vmor %vm1456_vm13, %vm1457_vm12 }
0x1fe2   :  { %v1453_v43 = vsub.f32 1.0, %v1452_v38 }
0x1fe4   :  { %v1454_v44 = vmul.f32 %v3113_v37, %v1453_v43 }
0x1fe6   :  { %v1455_v45 = vadd.f32 %v3113_v37, %v1454_v44 }
0x1fe8   :  { %v1459_v48 = vsel %vm1458_vm14, %v3113_v37, %v1455_v45  ;;  %v2999_v37 = vld [vmem:[%s4055_s2] sm:$0xff] }
0x1fe9   :  { %v1464_v52 = vsel %vm1461_vm15, %v1463_v49, %v1459_v48 }
0x1fea   :  { %v1477_v59 = vsub.f32 1.0, %v1464_v52  ;;  %v1483_v61 = vmul.f32 %v1464_v52, %v3633_v50 }
0x2040   :  { %v1468_v51 = vpop.permute.xlu0 %1467 }
0x2041   :  { %v1470_v53 = vmul.f32 %v1468_v51, %v1464_v52 }
0x2043   :  { %1472 = vrot.lane.b32.xlu0 %v1470_v53, %s3283_s9 }
0x20b5   :  { %v1473_v56 = vpop.permute.xlu0 %1472 }
0x20b6   :  { %v1475_v57 = vadd.f32 %v1473_v56, %v1444_v30  ;;  %v3001_v30 = vld [vmem:[%s4055_s2 + $0x10] sm:$0xff] }
0x20b7   :  { %1646 = vmatpush.bf16.msra.mxu0 %v3001_v30 }
0x20b8   :  { %3114 = vtanh.f32 %v1475_v57  ;;  %v3003_v57 = vld [vmem:[#allocation2] sm:$0xff] }
0x20b9   :  { %1685 = vmatpush.bf16.msra.mxu2 %v3003_v57 }
0x20bb   :  { %1647 = vmatpush.bf16.msra.mxu0 %v3000_v32 }
0x20be   :  { %v3115_v58 = vpop.eup %3114 }
0x20bf   :  { %1479 = vrot.lane.b32.xlu0 %v3115_v58, %s3289_s11  ;;  %1648 = vmatpush.bf16.msra.mxu0 %v2999_v37 }
0x2131   :  { %v1480_v60 = vpop.permute.xlu0 %1479 }
0x2132   :  { %v1482_v62 = vmul.f32 %v1480_v60, %v1477_v59 }
0x2134   :  { %v1484_v0 = vadd.f32 %v1483_v61, %v1482_v62 }
0x2136   :  { %v1485_v1 = vmax.f32 %v1484_v0, 0.0 }
0x2138   :  { %1487 = vrot.lane.b32.xlu2 %v1485_v1, %s3289_s11 }
0x2192   :  { %v1488_v2 = vpop.permute.xlu2 %1487 }
0x2193   :  { %v1490_v3 = vsel %vm69_vm0, %v1488_v2, %v1484_v0 }
0x2194   :  { %v1491_v4 = vpack.c.bf16 %v1490_v3, %v1490_v3 }
0x2196   :  { %2780 = vmatmul.msk.bf16.vlgmr.msrb.gmra.mxu3 %vm104_vm1, %v1491_v4 }
0x2219   :  { %v1504_v5 = vpop.f32.mrf.mxu3 }
0x221a   :  { %v1505_v7 = vadd.f32 %v3678_v29, %v1504_v5 }
0x221c   :  { %1528 = vrot.lane.b32.xlu0 %v1505_v7, %s3286_s15  ;;  %v2781_v9 = vmul.f32 -1.442695, %v1505_v7 }
0x221e   :  { %3116 = vpow2.f32 %v2781_v9  ;;  %v3005_v9 = vld [vmem:[%s4057_s4 + $0x8] sm:$0xff] }
0x2221   :  { %v1506_v8 = vpop.f32.mrf.mxu3 }
0x2222   :  { %v3006_v8 = vld [vmem:[%s4057_s4 + $0x10] sm:$0xff] }
0x2224   :  { %v3117_v6 = vpop.eup %3116 }
0x2225   :  { %v1511_v12 = vadd.f32 1.0, %v3117_v6  ;;  %v3004_v6 = vld [vmem:[%s4057_s4] sm:$0xff] }
0x2227   :  { %3118 = vrcp.f32 %v1511_v12  ;;  %v1523_v20 = vand.u32 2147483648, %v1511_v12  ;;  %vm1517_vm5 = vweird.f32 %v1511_v12  ;;  %v1521_v23 = vand.u32 2147483647, %v1511_v12 }
0x2229   :  { %v1524_v25 = vor.u32 1.1754944e-38, %v1523_v20  ;;  %vm1522_vm7 = vcmp.eq.f32.partialorder %v1521_v23, 8.507059e+37 }
0x222d   :  { %v3119_v13 = vpop.eup %3118 }
0x222e   :  { %v1513_v14 = vmul.f32 %v3119_v13, %v1511_v12  ;;  %vm1518_vm4 = vweird.f32 %v3119_v13 }
0x222f   :  { %vm1519_vm6 = vmor %vm1517_vm5, %vm1518_vm4 }
0x2230   :  { %v1514_v16 = vsub.f32 1.0, %v1513_v14 }
0x2232   :  { %v1515_v17 = vmul.f32 %v3119_v13, %v1514_v16 }
0x2234   :  { %v1516_v18 = vadd.f32 %v3119_v13, %v1515_v17 }
0x2236   :  { %v1520_v24 = vsel %vm1519_vm6, %v3119_v13, %v1516_v18 }
0x2237   :  { %v1525_v27 = vsel %vm1522_vm7, %v1524_v25, %v1520_v24 }
0x2238   :  { %v1538_v38 = vsub.f32 1.0, %v1525_v27  ;;  %v1544_v44 = vmul.f32 %v1525_v27, %v1484_v0 }
0x228e   :  { %v1529_v26 = vpop.permute.xlu0 %1528 }
0x228f   :  { %v1531_v28 = vmul.f32 %v1529_v26, %v1525_v27 }
0x2291   :  { %1533 = vrot.lane.b32.xlu0 %v1531_v28, %s3283_s9 }
0x2303   :  { %v1534_v33 = vpop.permute.xlu0 %1533 }
0x2304   :  { %v1536_v34 = vadd.f32 %v1534_v33, %v1505_v7  ;;  %v3007_v7 = vld [vmem:[%s4057_s4 + $0x18] sm:$0xff] }
0x2305   :  { %1743 = vmatpush.bf16.msra.mxu3 %v3007_v7 }
0x2306   :  { %3120 = vtanh.f32 %v1536_v34 }
0x2309   :  { %1744 = vmatpush.bf16.msra.mxu3 %v3006_v8 }
0x230c   :  { %v3121_v36 = vpop.eup %3120 }
0x230d   :  { %1540 = vrot.lane.b32.xlu0 %v3121_v36, %s3289_s11  ;;  %1745 = vmatpush.bf16.msra.mxu3 %v3005_v9 }
0x2311   :  { %1746 = vmatpush.bf16.msra.mxu3 %v3004_v6 }
0x237f   :  { %v1541_v43 = vpop.permute.xlu0 %1540 }
0x2380   :  { %v1543_v45 = vmul.f32 %v1541_v43, %v1538_v38 }
0x2382   :  { %v3707_v47 = vadd.f32 %v1544_v44, %v1543_v45 }
0x2384   :  { %v1604_v48 = vsel %vm69_vm0, %v1603_v46, %v3707_v47 }
0x2385   :  { %v1605_v49 = vpack.c.bf16 %v1604_v48, %v1604_v48 }
0x2387   :  { %2807 = vmatmul.msk.bf16.vlgmr.msra.gmra.mxu0 %vm104_vm1, %v1605_v49 }
0x2404   :  { %v1650_v51 = vpop.f32.mrf.mxu0 }
0x2405   :  { %v1654_v52 = vadd.f32 %v3638_v54, %v1650_v51 }
0x2407   :  { %v1655_v53 = vsel %vm122_vm2, %v1654_v52, -inf }
0x2408   :  { %1656 = vmax.xlane.f32.xlu1 %v1655_v53  ;;  %v2998_v53 = vld [vmem:[%s4058_s5 + $0x8] sm:$0xff] }
0x2409   :  { %1575 = vmatpush.bf16.msra.mxu1 %v2998_v53 }
0x240c   :  { %v1652_v56 = vpop.f32.mrf.mxu0 }
0x240d   :  { %v2997_v56 = vld [vmem:[%s4058_s5] sm:$0xff] }
0x240e   :  { %1576 = vmatpush.bf16.msra.mxu1 %v2997_v56 }
0x2412   :  { %1804 = vmatpush.bf16.msrb.mxu1 %v3007_v7 }
0x2416   :  { %1805 = vmatpush.bf16.msrb.mxu1 %v3006_v8 }
0x241a   :  { %1806 = vmatpush.bf16.msrb.mxu1 %v3005_v9 }
0x241e   :  { %1807 = vmatpush.bf16.msrb.mxu1 %v3004_v6 }
0x247b   :  { %v1657_v58 = vpop.xlane.xlu1 %1656 }
0x247c   :  { %v1658_v59 = vsub.f32 %v1654_v52, %v1657_v58  ;;  %v1546_v52 = vpack.c.bf16 %v3707_v47, %v3707_v47 }
0x247e   :  { %v1659_v60 = vmul.f32 1.442695, %v1658_v59 }
0x2480   :  { %3122 = vpow2.f32 %v1659_v60 }
0x2486   :  { %v3123_v61 = vpop.eup %3122 }
0x2487   :  { %v1661_v62 = vsel %vm122_vm2, %v3123_v61, 0.0 }
0x2488   :  { %1662 = vadd.xlane.f32.xlu2 %v1661_v62 }
0x24fb   :  { %v1663_v0 = vpop.xlane.xlu2 %1662 }
0x24fc   :  { %3124 = vrcp.f32 %v1663_v0 }
0x2502   :  { %v3125_v1 = vpop.eup %3124 }
0x2503   :  { %v3715_v2 = vmul.f32 %v3125_v1, %v3123_v61 }
0x2505   :  { %v1666_v3 = vpack.c.bf16 %v3715_v2, %v3715_v2 }
0x2507   :  { %2812 = vmatmul.msk.bf16.vlgmr.msra.gmra.mxu2 %vm143_vm3, %v1666_v3 }
0x258a   :  { %v1687_v4 = vpop.f32.mrf.mxu2 }
0x258b   :  { %1692 = vrot.lane.b32.xlu0 %v1687_v4, %s3287_s23 }
0x2592   :  { %v1689_v5 = vpop.f32.mrf.mxu2 }
0x25fd   :  { %v1693_v12 = vpop.permute.xlu0 %1692 }
0x25fe   :  { %v1695_v13 = vadd.f32 %v1693_v12, %v1650_v51 }
0x2600   :  { %v1696_v14 = vadd.f32 %v1695_v13, %v3384_v31 }
0x2602   :  { %v1697_v16 = vmax.f32 %v1696_v14, 0.0 }
0x2604   :  { %1699 = vrot.lane.b32.xlu0 %v1697_v16, %s3288_s30 }
0x2676   :  { %v1700_v17 = vpop.permute.xlu0 %1699 }
0x2677   :  { %v1702_v18 = vsel %vm69_vm0, %v1700_v17, %v3707_v47 }
0x2678   :  { %v1703_v20 = vpack.c.bf16 %v1702_v18, %v1702_v18 }
0x267a   :  { %2829 = vmatmul.msk.bf16.vlgmr.msra.gmra.mxu3 %vm104_vm1, %v1703_v20 }
0x26fd   :  { %v1748_v23 = vpop.f32.mrf.mxu3 }
0x26fe   :  { %v1749_v24 = vadd.f32 %v3678_v29, %v1748_v23 }
0x2700   :  { %1772 = vrot.lane.b32.xlu0 %v1749_v24, %s3286_s15  ;;  %v2830_v26 = vmul.f32 -1.442695, %v1749_v24 }
0x2702   :  { %3126 = vpow2.f32 %v2830_v26 }
0x2705   :  { %v1750_v25 = vpop.f32.mrf.mxu3 }
0x2708   :  { %v3127_v27 = vpop.eup %3126 }
0x2709   :  { %v1755_v28 = vadd.f32 1.0, %v3127_v27 }
0x270b   :  { %3128 = vrcp.f32 %v1755_v28  ;;  %v1767_v36 = vand.u32 2147483648, %v1755_v28  ;;  %vm1761_vm9 = vweird.f32 %v1755_v28  ;;  %v1765_v37 = vand.u32 2147483647, %v1755_v28 }
0x270d   :  { %v1768_v43 = vor.u32 1.1754944e-38, %v1767_v36  ;;  %vm1766_vm11 = vcmp.eq.f32.partialorder %v1765_v37, 8.507059e+37 }
0x2711   :  { %v3129_v39 = vpop.eup %3128 }
0x2712   :  { %v1757_v30 = vmul.f32 %v3129_v39, %v1755_v28  ;;  %vm1762_vm8 = vweird.f32 %v3129_v39 }
0x2713   :  { %vm1763_vm10 = vmor %vm1761_vm9, %vm1762_vm8 }
0x2714   :  { %v1758_v32 = vsub.f32 1.0, %v1757_v30 }
0x2716   :  { %v1759_v33 = vmul.f32 %v3129_v39, %v1758_v32  ;;  %v3013_v32 = vld [vmem:[%s4055_s2 + $0x18] sm:$0xff] }
0x2717   :  { %1950 = vmatpush.bf16.msrb.mxu2 %v3013_v32 }
0x2718   :  { %v1760_v34 = vadd.f32 %v3129_v39, %v1759_v33  ;;  %v3012_v33 = vld [vmem:[%s4055_s2 + $0x10] sm:$0xff] }
0x271a   :  { %v1764_v38 = vsel %vm1763_vm10, %v3129_v39, %v1760_v34  ;;  %v3011_v34 = vld [vmem:[%s4055_s2 + $0x8] sm:$0xff] }
0x271b   :  { %v1769_v45 = vsel %vm1766_vm11, %v1768_v43, %v1764_v38  ;;  %1951 = vmatpush.bf16.msrb.mxu2 %v3012_v33  ;;  %v3010_v43 = vld [vmem:[%s4055_s2] sm:$0xff] }
0x271c   :  { %v1782_v57 = vsub.f32 1.0, %v1769_v45  ;;  %v1788_v59 = vmul.f32 %v1769_v45, %v3707_v47 }
0x271f   :  { %1952 = vmatpush.bf16.msrb.mxu2 %v3011_v34 }
0x2723   :  { %1953 = vmatpush.bf16.msrb.mxu2 %v3010_v43 }
0x2772   :  { %v1773_v44 = vpop.permute.xlu0 %1772 }
0x2773   :  { %v1775_v46 = vmul.f32 %v1773_v44, %v1769_v45 }
0x2775   :  { %1777 = vrot.lane.b32.xlu0 %v1775_v46, %s3283_s9 }
0x27e7   :  { %v1778_v48 = vpop.permute.xlu0 %1777 }
0x27e8   :  { %v1780_v49 = vadd.f32 %v1778_v48, %v1749_v24 }
0x27ea   :  { %3130 = vtanh.f32 %v1780_v49  ;;  %v1908_v49 = vld [vmem:[%s4053_s0 + $0x6] sm:$0x1] }
0x27f0   :  { %v3131_v51 = vpop.eup %3130 }
0x27f1   :  { %1784 = vrot.lane.b32.xlu0 %v3131_v51, %s3289_s11 }
0x27f9   :  { %1552 = vrot.lane.b32.xlu0 %v1546_v52, %s3289_s11 }
0x2863   :  { %v1785_v58 = vpop.permute.xlu0 %1784 }
0x2864   :  { %v1787_v60 = vmul.f32 %v1785_v58, %v1782_v57 }
0x2866   :  { %v1789_v61 = vadd.f32 %v1788_v59, %v1787_v60  ;;  %v3014_v60 = vld [vmem:[#allocation2] sm:$0xff] }
0x2867   :  { %1990 = vmatpush.bf16.msrb.mxu3 %v3014_v60 }
0x2868   :  { %v1790_v62 = vmax.f32 %v1789_v61, 0.0 }
0x286a   :  { %1792 = vrot.lane.b32.xlu1 %v1790_v62, %s3289_s11 }
0x286b   :  { %v1553_v0 = vpop.permute.xlu0 %1552 }
0x286c   :  { %2790 = vmatmul.msk.bf16.vlgmr.msra.gmra.mxu1 %vm69_vm0, %v1553_v0 }
0x28dc   :  { %v1793_v1 = vpop.permute.xlu1 %1792 }
0x28dd   :  { %v1795_v3 = vsel %vm69_vm0, %v1793_v1, %v1789_v61 }
0x28de   :  { %v1796_v4 = vpack.c.bf16 %v1795_v3, %v1795_v3 }
0x28e0   :  { %2831 = vmatmul.msk.bf16.vlgmr.msrb.gmra.mxu1 %vm104_vm1, %v1796_v4 }
0x28e9   :  { %v3756_v5 = vpop.f32.mrf.mxu1 }
0x28f1   :  { %v1580_v7 = vpop.f32.mrf.mxu1 }
0x295d   :  { %v1809_v8 = vpop.f32.mrf.mxu1 }
0x295e   :  { %v1810_v9 = vadd.f32 %v3678_v29, %v1809_v8 }
0x2960   :  { %1833 = vrot.lane.b32.xlu2 %v1810_v9, %s3286_s15  ;;  %v2832_v12 = vmul.f32 -1.442695, %v1810_v9 }
0x2962   :  { %3132 = vpow2.f32 %v2832_v12 }
0x2965   :  { %v1811_v6 = vpop.f32.mrf.mxu1 }
0x2968   :  { %v3133_v13 = vpop.eup %3132 }
0x2969   :  { %v1816_v14 = vadd.f32 1.0, %v3133_v13  ;;  %v3018_v13 = vld [vmem:[%s4057_s4 + $0x18] sm:$0xff] }
0x296a   :  { %2048 = vmatpush.bf16.msra.mxu1 %v3018_v13 }
0x296b   :  { %3134 = vrcp.f32 %v1816_v14  ;;  %v1828_v24 = vand.u32 2147483648, %v1816_v14  ;;  %vm1822_vm13 = vweird.f32 %v1816_v14  ;;  %v1826_v25 = vand.u32 2147483647, %v1816_v14 }
0x296d   :  { %v1829_v27 = vor.u32 1.1754944e-38, %v1828_v24  ;;  %vm1827_vm15 = vcmp.eq.f32.partialorder %v1826_v25, 8.507059e+37 }
0x2971   :  { %v3135_v16 = vpop.eup %3134 }
0x2972   :  { %v1818_v17 = vmul.f32 %v3135_v16, %v1816_v14  ;;  %vm1823_vm12 = vweird.f32 %v3135_v16  ;;  %v3017_v14 = vld [vmem:[%s4057_s4 + $0x10] sm:$0xff] }
0x2973   :  { %vm1824_vm14 = vmor %vm1822_vm13, %vm1823_vm12  ;;  %2049 = vmatpush.bf16.msra.mxu1 %v3017_v14 }
0x2974   :  { %v1819_v18 = vsub.f32 1.0, %v1818_v17  ;;  %v3015_v17 = vld [vmem:[%s4057_s4] sm:$0xff] }
0x2976   :  { %v1820_v20 = vmul.f32 %v3135_v16, %v1819_v18 }
0x2978   :  { %v1821_v23 = vadd.f32 %v3135_v16, %v1820_v20 }
0x297a   :  { %v1825_v26 = vsel %vm1824_vm14, %v3135_v16, %v1821_v23  ;;  %v3016_v16 = vld [vmem:[%s4057_s4 + $0x8] sm:$0xff]  ;;  %vm360_vm14 = vcmask 253952  }
0x297b   :  { %v1830_v39 = vsel %vm1827_vm15, %v1829_v27, %v1825_v26  ;;  %2050 = vmatpush.bf16.msra.mxu1 %v3016_v16 }
0x297c   :  { %v1843_v44 = vsub.f32 1.0, %v1830_v39  ;;  %v1849_v46 = vmul.f32 %v1830_v39, %v1789_v61 }
0x297f   :  { %2051 = vmatpush.bf16.msra.mxu1 %v3015_v17 }
0x29ba   :  { %v1834_v28 = vpop.permute.xlu2 %1833 }
0x29bb   :  { %v1836_v30 = vmul.f32 %v1834_v28, %v1830_v39 }
0x29bd   :  { %1838 = vrot.lane.b32.xlu0 %v1836_v30, %s3283_s9 }
0x2a2f   :  { %v1839_v36 = vpop.permute.xlu0 %1838 }
0x2a30   :  { %v1841_v37 = vadd.f32 %v1839_v36, %v1810_v9 }
0x2a32   :  { %3136 = vtanh.f32 %v1841_v37 }
0x2a38   :  { %v3137_v38 = vpop.eup %3136 }
0x2a39   :  { %1845 = vrot.lane.b32.xlu0 %v3137_v38, %s3289_s11 }
0x2aab   :  { %v1846_v45 = vpop.permute.xlu0 %1845 }
0x2aac   :  { %v1848_v48 = vmul.f32 %v1846_v45, %v1843_v44 }
0x2aae   :  { %v3777_v51 = vadd.f32 %v1849_v46, %v1848_v48 }
0x2ab0   :  { %v1909_v52 = vsel %vm69_vm0, %v1908_v49, %v3777_v51  ;;  %v1851_v60 = vpack.c.bf16 %v3777_v51, %v3777_v51 }
0x2ab1   :  { %v1910_v53 = vpack.c.bf16 %v1909_v52, %v1909_v52 }
0x2ab3   :  { %2858 = vmatmul.msk.bf16.vlgmr.msrb.gmra.mxu2 %vm104_vm1, %v1910_v53 }
0x2b36   :  { %v1955_v56 = vpop.f32.mrf.mxu2 }
0x2b37   :  { %v1959_v57 = vadd.f32 %v3638_v54, %v1955_v56 }
0x2b39   :  { %v1960_v58 = vsel %vm122_vm2, %v1959_v57, -inf }
0x2b3a   :  { %1961 = vmax.xlane.f32.xlu0 %v1960_v58 }
0x2b3e   :  { %v1957_v59 = vpop.f32.mrf.mxu2 }
0x2bad   :  { %v1962_v61 = vpop.xlane.xlu0 %1961 }
0x2bae   :  { %v1963_v62 = vsub.f32 %v1959_v57, %v1962_v61  ;;  %v3009_v61 = vld [vmem:[%s4058_s5 + $0x8] sm:$0xff] }
0x2baf   :  { %1880 = vmatpush.bf16.msrb.mxu0 %v3009_v61  ;;  %v2213_v61 = vld [vmem:[%s4053_s0 + $0x7] sm:$0x1] }
0x2bb0   :  { %v1964_v0 = vmul.f32 1.442695, %v1963_v62  ;;  %v3008_v62 = vld [vmem:[%s4058_s5] sm:$0xff] }
0x2bb2   :  { %3138 = vpow2.f32 %v1964_v0 }
0x2bb3   :  { %1881 = vmatpush.bf16.msrb.mxu0 %v3008_v62 }
0x2bb7   :  { %2109 = vmatpush.bf16.msra.mxu0 %v3018_v13 }
0x2bb8   :  { %v3139_v1 = vpop.eup %3138 }
0x2bb9   :  { %v1966_v3 = vsel %vm122_vm2, %v3139_v1, 0.0 }
0x2bba   :  { %1967 = vadd.xlane.f32.xlu2 %v1966_v3 }
0x2bbb   :  { %2110 = vmatpush.bf16.msra.mxu0 %v3017_v14 }
0x2bbf   :  { %2111 = vmatpush.bf16.msra.mxu0 %v3016_v16 }
0x2bc3   :  { %2112 = vmatpush.bf16.msra.mxu0 %v3015_v17 }
0x2c2d   :  { %v1968_v4 = vpop.xlane.xlu2 %1967 }
0x2c2e   :  { %3140 = vrcp.f32 %v1968_v4 }
0x2c34   :  { %v3141_v7 = vpop.eup %3140 }
0x2c35   :  { %v3785_v8 = vmul.f32 %v3141_v7, %v3139_v1 }
0x2c37   :  { %v1971_v9 = vpack.c.bf16 %v3785_v8, %v3785_v8 }
0x2c39   :  { %2863 = vmatmul.msk.bf16.vlgmr.msrb.gmra.mxu3 %vm143_vm3, %v1971_v9 }
0x2cbc   :  { %v1992_v6 = vpop.f32.mrf.mxu3 }
0x2cbd   :  { %1997 = vrot.lane.b32.xlu1 %v1992_v6, %s3287_s23 }
0x2cc4   :  { %v1994_v12 = vpop.f32.mrf.mxu3 }
0x2d2f   :  { %v1998_v18 = vpop.permute.xlu1 %1997 }
0x2d30   :  { %v2000_v20 = vadd.f32 %v1998_v18, %v1955_v56 }
0x2d32   :  { %v2001_v23 = vadd.f32 %v2000_v20, %v3384_v31 }
0x2d34   :  { %v2002_v24 = vmax.f32 %v2001_v23, 0.0 }
0x2d36   :  { %2004 = vrot.lane.b32.xlu1 %v2002_v24, %s3288_s30 }
0x2da8   :  { %v2005_v25 = vpop.permute.xlu1 %2004 }
0x2da9   :  { %v2007_v26 = vsel %vm69_vm0, %v2005_v25, %v3777_v51 }
0x2daa   :  { %v2008_v27 = vpack.c.bf16 %v2007_v26, %v2007_v26 }
0x2dac   :  { %2880 = vmatmul.msk.bf16.vlgmr.msra.gmra.mxu1 %vm104_vm1, %v2008_v27 }
0x2e29   :  { %v2053_v28 = vpop.f32.mrf.mxu1 }
0x2e2a   :  { %v2054_v39 = vadd.f32 %v3678_v29, %v2053_v28 }
0x2e2c   :  { %2077 = vrot.lane.b32.xlu1 %v2054_v39, %s3286_s15  ;;  %v2881_v32 = vmul.f32 -1.442695, %v2054_v39 }
0x2e2e   :  { %3142 = vpow2.f32 %v2881_v32 }
0x2e31   :  { %v2055_v30 = vpop.f32.mrf.mxu1 }
0x2e34   :  { %v3143_v33 = vpop.eup %3142 }
0x2e35   :  { %v2060_v34 = vadd.f32 1.0, %v3143_v33 }
0x2e37   :  { %3144 = vrcp.f32 %v2060_v34  ;;  %v2072_v45 = vand.u32 2147483648, %v2060_v34  ;;  %vm2066_vm5 = vweird.f32 %v2060_v34  ;;  %v2070_v46 = vand.u32 2147483647, %v2060_v34 }
0x2e39   :  { %v2073_v49 = vor.u32 1.1754944e-38, %v2072_v45  ;;  %vm2071_vm7 = vcmp.eq.f32.partialorder %v2070_v46, 8.507059e+37  ;;  %v3024_v45 = vld [vmem:[%s4055_s2 + $0x18] sm:$0xff]  ;;  %v3023_v46 = vld [vmem:[%s4055_s2 + $0x10] sm:$0xff] }
0x2e3a   :  { %2255 = vmatpush.bf16.msra.mxu3 %v3024_v45 }
0x2e3d   :  { %v3145_v36 = vpop.eup %3144 }
0x2e3e   :  { %v2062_v37 = vmul.f32 %v3145_v36, %v2060_v34  ;;  %vm2067_vm4 = vweird.f32 %v3145_v36  ;;  %2256 = vmatpush.bf16.msra.mxu3 %v3023_v46 }
0x2e3f   :  { %vm2068_vm6 = vmor %vm2066_vm5, %vm2067_vm4 }
0x2e40   :  { %v2063_v38 = vsub.f32 1.0, %v2062_v37 }
0x2e42   :  { %v2064_v43 = vmul.f32 %v3145_v36, %v2063_v38 }
0x2e44   :  { %v2065_v44 = vadd.f32 %v3145_v36, %v2064_v43 }
0x2e46   :  { %v2069_v48 = vsel %vm2068_vm6, %v3145_v36, %v2065_v44 }
0x2e47   :  { %v2074_v53 = vsel %vm2071_vm7, %v2073_v49, %v2069_v48  ;;  %v3022_v48 = vld [vmem:[%s4055_s2 + $0x8] sm:$0xff]  ;;  %vm380_vm7 = vcmask 654336  }
0x2e48   :  { %v2087_v0 = vsub.f32 1.0, %v2074_v53  ;;  %v2093_v3 = vmul.f32 %v2074_v53, %v3777_v51  ;;  %2257 = vmatpush.bf16.msra.mxu3 %v3022_v48 }
0x2e9e   :  { %v2078_v52 = vpop.permute.xlu1 %2077 }
0x2e9f   :  { %v2080_v56 = vmul.f32 %v2078_v52, %v2074_v53 }
0x2ea1   :  { %2082 = vrot.lane.b32.xlu1 %v2080_v56, %s3283_s9  ;;  %v3021_v56 = vld [vmem:[%s4055_s2] sm:$0xff] }
0x2ea2   :  { %2258 = vmatpush.bf16.msra.mxu3 %v3021_v56 }
0x2f13   :  { %v2083_v57 = vpop.permute.xlu1 %2082 }
0x2f14   :  { %v2085_v58 = vadd.f32 %v2083_v57, %v2054_v39 }
0x2f16   :  { %3146 = vtanh.f32 %v2085_v58 }
0x2f1c   :  { %v3147_v59 = vpop.eup %3146 }
0x2f1d   :  { %2089 = vrot.lane.b32.xlu1 %v3147_v59, %s3289_s11 }
0x2f25   :  { %1857 = vrot.lane.b32.xlu1 %v1851_v60, %s3289_s11 }
0x2f8f   :  { %v2090_v1 = vpop.permute.xlu1 %2089 }
0x2f90   :  { %v2092_v4 = vmul.f32 %v2090_v1, %v2087_v0 }
0x2f92   :  { %v2094_v7 = vadd.f32 %v2093_v3, %v2092_v4 }
0x2f94   :  { %v2095_v9 = vmax.f32 %v2094_v7, 0.0 }
0x2f96   :  { %2097 = vrot.lane.b32.xlu2 %v2095_v9, %s3289_s11 }
0x2f97   :  { %v1858_v6 = vpop.permute.xlu1 %1857 }
0x2f98   :  { %2841 = vmatmul.msk.bf16.vlgmr.msrb.gmra.mxu0 %vm69_vm0, %v1858_v6 }
0x2ff0   :  { %v2098_v12 = vpop.permute.xlu2 %2097 }
0x2ff1   :  { %v2100_v18 = vsel %vm69_vm0, %v2098_v12, %v2094_v7  ;;  %v3020_v12 = vld [vmem:[%s4058_s5 + $0x8] sm:$0xff] }
0x2ff2   :  { %v2101_v20 = vpack.c.bf16 %v2100_v18, %v2100_v18  ;;  %2185 = vmatpush.bf16.msra.mxu2 %v3020_v12  ;;  %v3019_v18 = vld [vmem:[%s4058_s5] sm:$0xff] }
0x2ff4   :  { %2882 = vmatmul.msk.bf16.vlgmr.msra.gmra.mxu0 %vm104_vm1, %v2101_v20 }
0x2ff6   :  { %2186 = vmatpush.bf16.msra.mxu2 %v3019_v18 }
0x3015   :  { %v3826_v13 = vpop.f32.mrf.mxu0 }
0x301d   :  { %v1885_v14 = vpop.f32.mrf.mxu0 }
0x3071   :  { %v2114_v16 = vpop.f32.mrf.mxu0 }
0x3072   :  { %v2115_v17 = vadd.f32 %v3678_v29, %v2114_v16 }
0x3074   :  { %2138 = vrot.lane.b32.xlu0 %v2115_v17, %s3286_s15  ;;  %v2883_v24 = vmul.f32 -1.442695, %v2115_v17 }
0x3076   :  { %3148 = vpow2.f32 %v2883_v24 }
0x3079   :  { %v2116_v23 = vpop.f32.mrf.mxu0 }
0x307c   :  { %v3149_v25 = vpop.eup %3148 }
0x307d   :  { %v2121_v26 = vadd.f32 1.0, %v3149_v25 }
0x307f   :  { %3150 = vrcp.f32 %v2121_v26  ;;  %v2133_v33 = vand.u32 2147483648, %v2121_v26  ;;  %vm2127_vm9 = vweird.f32 %v2121_v26  ;;  %v2131_v34 = vand.u32 2147483647, %v2121_v26 }
0x3081   :  { %v2134_v37 = vor.u32 1.1754944e-38, %v2133_v33  ;;  %vm2132_vm11 = vcmp.eq.f32.partialorder %v2131_v34, 8.507059e+37  ;;  %v3029_v34 = vld [vmem:[%s4057_s4 + $0x18] sm:$0xff] }
0x3082   :  { %2353 = vmatpush.bf16.msrb.mxu0 %v3029_v34  ;;  %2414 = vmatpush.bf16.msrb.mxu2 %v3029_v34 }
0x3085   :  { %v3151_v27 = vpop.eup %3150 }
0x3086   :  { %v2123_v28 = vmul.f32 %v3151_v27, %v2121_v26  ;;  %vm2128_vm8 = vweird.f32 %v3151_v27 }
0x3087   :  { %vm2129_vm10 = vmor %vm2127_vm9, %vm2128_vm8 }
0x3088   :  { %v2124_v39 = vsub.f32 1.0, %v2123_v28 }
0x308a   :  { %v2125_v30 = vmul.f32 %v3151_v27, %v2124_v39 }
0x308c   :  { %v2126_v32 = vadd.f32 %v3151_v27, %v2125_v30 }
0x308e   :  { %v2130_v36 = vsel %vm2129_vm10, %v3151_v27, %v2126_v32 }
0x308f   :  { %v2135_v43 = vsel %vm2132_vm11, %v2134_v37, %v2130_v36  ;;  %v3028_v36 = vld [vmem:[%s4057_s4 + $0x10] sm:$0xff]  ;;  %v3027_v37 = vld [vmem:[%s4057_s4 + $0x8] sm:$0xff] }
0x3090   :  { %v2148_v57 = vsub.f32 1.0, %v2135_v43  ;;  %v2154_v59 = vmul.f32 %v2135_v43, %v2094_v7  ;;  %2354 = vmatpush.bf16.msrb.mxu0 %v3028_v36  ;;  %2415 = vmatpush.bf16.msrb.mxu2 %v3028_v36 }
0x3094   :  { %2355 = vmatpush.bf16.msrb.mxu0 %v3027_v37  ;;  %2416 = vmatpush.bf16.msrb.mxu2 %v3027_v37 }
0x30e6   :  { %v2139_v38 = vpop.permute.xlu0 %2138 }
0x30e7   :  { %v2141_v44 = vmul.f32 %v2139_v38, %v2135_v43  ;;  %v3026_v38 = vld [vmem:[%s4057_s4] sm:$0xff] }
0x30e8   :  { %2356 = vmatpush.bf16.msrb.mxu0 %v3026_v38  ;;  %2417 = vmatpush.bf16.msrb.mxu2 %v3026_v38  ;;  %v3902_v38 = vld [vmem:[#allocation5 + $0x3] sm:$0x1] }
0x30e9   :  { %2143 = vrot.lane.b32.xlu1 %v2141_v44, %s3283_s9 }
0x315b   :  { %v2144_v49 = vpop.permute.xlu1 %2143 }
0x315c   :  { %v2146_v52 = vadd.f32 %v2144_v49, %v2115_v17 }
0x315e   :  { %3152 = vtanh.f32 %v2146_v52 }
0x3164   :  { %v3153_v53 = vpop.eup %3152 }
0x3165   :  { %2150 = vrot.lane.b32.xlu1 %v3153_v53, %s3289_s11 }
0x31d7   :  { %v2151_v58 = vpop.permute.xlu1 %2150 }
0x31d8   :  { %v2153_v60 = vmul.f32 %v2151_v58, %v2148_v57 }
0x31da   :  { %v3847_v62 = vadd.f32 %v2154_v59, %v2153_v60 }
0x31dc   :  { %v2214_v0 = vsel %vm69_vm0, %v2213_v61, %v3847_v62  ;;  %v2156_v6 = vpack.c.bf16 %v3847_v62, %v3847_v62 }
0x31dd   :  { %v2215_v1 = vpack.c.bf16 %v2214_v0, %v2214_v0 }
0x31df   :  { %2909 = vmatmul.msk.bf16.vlgmr.msra.gmra.mxu3 %vm104_vm1, %v2215_v1 }
0x3262   :  { %v2260_v3 = vpop.f32.mrf.mxu3 }
0x3263   :  { %v2264_v4 = vadd.f32 %v3638_v54, %v2260_v3  ;;  %v3025_v54 = vld [vmem:[#allocation2] sm:$0xff] }
0x3264   :  { %2295 = vmatpush.bf16.msrb.mxu1 %v3025_v54 }
0x3265   :  { %v2265_v9 = vsel %vm122_vm2, %v2264_v4, -inf }
0x3266   :  { %2266 = vmax.xlane.f32.xlu0 %v2265_v9 }
0x326a   :  { %v2262_v7 = vpop.f32.mrf.mxu3 }
0x327a   :  { %2162 = vrot.lane.b32.xlu0 %v2156_v6, %s3289_s11 }
0x32d9   :  { %v2267_v20 = vpop.xlane.xlu0 %2266 }
0x32da   :  { %v2268_v14 = vsub.f32 %v2264_v4, %v2267_v20 }
0x32dc   :  { %v2269_v16 = vmul.f32 1.442695, %v2268_v14 }
0x32de   :  { %3154 = vpow2.f32 %v2269_v16 }
0x32e4   :  { %v3155_v17 = vpop.eup %3154 }
0x32e5   :  { %v2271_v23 = vsel %vm122_vm2, %v3155_v17, 0.0 }
0x32e6   :  { %2272 = vadd.xlane.f32.xlu1 %v2271_v23 }
0x32ec   :  { %v2163_v24 = vpop.permute.xlu0 %2162 }
0x32ed   :  { %2892 = vmatmul.msk.bf16.vlgmr.msra.gmra.mxu2 %vm69_vm0, %v2163_v24 }
0x3359   :  { %v2273_v25 = vpop.xlane.xlu1 %2272 }
0x335a   :  { %3156 = vrcp.f32 %v2273_v25 }
0x3360   :  { %v3157_v26 = vpop.eup %3156 }
0x3361   :  { %v3865_v27 = vmul.f32 %v3157_v26, %v3155_v17 }
0x3363   :  { %v2276_v28 = vpack.c.bf16 %v3865_v27, %v3865_v27 }
0x3365   :  { %2914 = vmatmul.msk.bf16.vlgmr.msrb.gmra.mxu1 %vm143_vm3, %v2276_v28 }
0x3370   :  { %v3870_v39 = vpop.f32.mrf.mxu2 }
0x3378   :  { %v2190_v30 = vpop.f32.mrf.mxu2 }
0x33e2   :  { %v2297_v32 = vpop.f32.mrf.mxu1 }
0x33e3   :  { %2302 = vrot.lane.b32.xlu2 %v2297_v32, %s3287_s23 }
0x33ea   :  { %v2299_v33 = vpop.f32.mrf.mxu1 }
0x343d   :  { %v2303_v43 = vpop.permute.xlu2 %2302 }
0x343e   :  { %v2305_v44 = vadd.f32 %v2303_v43, %v2260_v3  ;;  %v3906_v43 = vadd.f32 %v3517_v41, %v3902_v38 }
0x3440   :  { %v2306_v45 = vadd.f32 %v2305_v44, %v3384_v31  ;;  %v667_v44 = vsel %vm360_vm14, %v3906_v43, -inf }
0x3442   :  { %v2307_v46 = vmax.f32 %v2306_v45, 0.0 }
0x3444   :  { %2309 = vrot.lane.b32.xlu2 %v2307_v46, %s3288_s30 }
0x349e   :  { %v2310_v48 = vpop.permute.xlu2 %2309 }
0x349f   :  { %v2312_v49 = vsel %vm69_vm0, %v2310_v48, %v3847_v62 }
0x34a0   :  { %v2313_v52 = vpack.c.bf16 %v2312_v49, %v2312_v49 }
0x34a2   :  { %2931 = vmatmul.msk.bf16.vlgmr.msrb.gmra.mxu0 %vm104_vm1, %v2313_v52 }
0x351f   :  { %v2358_v53 = vpop.f32.mrf.mxu0 }
0x3520   :  { %v2359_v56 = vadd.f32 %v3678_v29, %v2358_v53 }
0x3522   :  { %2382 = vrot.lane.b32.xlu2 %v2359_v56, %s3286_s15  ;;  %v2932_v58 = vmul.f32 -1.442695, %v2359_v56 }
0x3524   :  { %3158 = vpow2.f32 %v2932_v58 }
0x3527   :  { %v2360_v57 = vpop.f32.mrf.mxu0 }
0x352a   :  { %v3159_v59 = vpop.eup %3158 }
0x352b   :  { %v2365_v31 = vadd.f32 1.0, %v3159_v59 }
0x352d   :  { %3160 = vrcp.f32 %v2365_v31  ;;  %v2377_v4 = vand.u32 2147483648, %v2365_v31  ;;  %vm2371_vm3 = vweird.f32 %v2365_v31  ;;  %v2375_v9 = vand.u32 2147483647, %v2365_v31 }
0x352f   :  { %v2378_v6 = vor.u32 1.1754944e-38, %v2377_v4  ;;  %vm2376_vm13 = vcmp.eq.f32.partialorder %v2375_v9, 8.507059e+37 }
0x3533   :  { %v3161_v60 = vpop.eup %3160 }
0x3534   :  { %v2367_v61 = vmul.f32 %v3161_v60, %v2365_v31  ;;  %vm2372_vm2 = vweird.f32 %v3161_v60 }
0x3535   :  { %vm2373_vm12 = vmor %vm2371_vm3, %vm2372_vm2 }
0x3536   :  { %v2368_v0 = vsub.f32 1.0, %v2367_v61 }
0x3538   :  { %v2369_v1 = vmul.f32 %v3161_v60, %v2368_v0 }
0x353a   :  { %v2370_v3 = vadd.f32 %v3161_v60, %v2369_v1 }
0x353c   :  { %v2374_v7 = vsel %vm2373_vm12, %v3161_v60, %v2370_v3 }
0x353d   :  { %v2379_v18 = vsel %vm2376_vm13, %v2378_v6, %v2374_v7  ;;  %v3920_v6 = vadd.f32 %v3470_v42, %v3902_v38 }
0x353e   :  { %v2392_v17 = vsub.f32 1.0, %v2379_v18  ;;  %v2398_v24 = vmul.f32 %v2379_v18, %v3847_v62 }
0x357c   :  { %v2383_v12 = vpop.permute.xlu2 %2382 }
0x357d   :  { %v2385_v54 = vmul.f32 %v2383_v12, %v2379_v18  ;;  %v361_v12 = vsel %vm360_vm14, %v3920_v6, -inf }
0x357f   :  { %2387 = vrot.lane.b32.xlu2 %v2385_v54, %s3283_s9 }
0x35d9   :  { %v2388_v20 = vpop.permute.xlu2 %2387 }
0x35da   :  { %v2390_v14 = vadd.f32 %v2388_v20, %v2359_v56  ;;  %v3927_v20 = vadd.f32 %v3586_v21, %v3902_v38 }
0x35dc   :  { %3162 = vtanh.f32 %v2390_v14  ;;  %v972_v14 = vsel %vm360_vm14, %v3927_v20, -inf }
0x35e2   :  { %v3163_v16 = vpop.eup %3162 }
0x35e3   :  { %2394 = vrot.lane.b32.xlu2 %v3163_v16, %s3289_s11 }
0x363d   :  { %v2395_v23 = vpop.permute.xlu2 %2394 }
0x363e   :  { %v2397_v25 = vmul.f32 %v2395_v23, %v2392_v17 }
0x3640   :  { %v2399_v26 = vadd.f32 %v2398_v24, %v2397_v25 }
0x3642   :  { %v2400_v28 = vmax.f32 %v2399_v26, 0.0 }
0x3644   :  { %2402 = vrot.lane.b32.xlu2 %v2400_v28, %s3289_s11 }
0x369e   :  { %v2403_v30 = vpop.permute.xlu2 %2402 }
0x369f   :  { %v2405_v32 = vsel %vm69_vm0, %v2403_v30, %v2399_v26 }
0x36a0   :  { %v2406_v33 = vpack.c.bf16 %v2405_v32, %v2405_v32 }
0x36a2   :  { %2933 = vmatmul.msk.bf16.vlgmr.msrb.gmra.mxu2 %vm104_vm1, %v2406_v33 }
0x3725   :  { %v2419_v34 = vpop.f32.mrf.mxu2 }
0x3726   :  { %v2420_v36 = vadd.f32 %v3678_v29, %v2419_v34  ;;  %v3030_v34 = vld [vmem:[%s4058_s5] sm:$0xff] }
0x3728   :  { %2443 = vrot.lane.b32.xlu1 %v2420_v36, %s3286_s15  ;;  %v2934_v45 = vmul.f32 -1.442695, %v2420_v36 }
0x372a   :  { %3164 = vpow2.f32 %v2934_v45 }
0x372d   :  { %v2421_v37 = vpop.f32.mrf.mxu2 }
0x3730   :  { %375 = vrot.lane.b32.xlu1 %v3368_v22, %s3283_s9  ;;  %v3165_v29 = vpop.eup %3164 }
0x3731   :  { %v2426_v46 = vadd.f32 1.0, %v3165_v29 }
0x3733   :  { %3166 = vrcp.f32 %v2426_v46  ;;  %v2438_v56 = vand.u32 2147483648, %v2426_v46  ;;  %vm2432_vm4 = vweird.f32 %v2426_v46  ;;  %v2436_v41 = vand.u32 2147483647, %v2426_v46 }
0x3735   :  { %v2439_v58 = vor.u32 1.1754944e-38, %v2438_v56  ;;  %vm2437_vm6 = vcmp.eq.f32.partialorder %v2436_v41, 8.507059e+37 }
0x3739   :  { %v3167_v48 = vpop.eup %3166 }
0x373a   :  { %v2428_v49 = vmul.f32 %v3167_v48, %v2426_v46  ;;  %vm2433_vm15 = vweird.f32 %v3167_v48  ;;  %v3950_v46 = vadd.f32 %v3658_v11, %v3902_v38 }
0x373b   :  { %vm2434_vm5 = vmor %vm2432_vm4, %vm2433_vm15 }
0x373c   :  { %v2429_v52 = vsub.f32 1.0, %v2428_v49  ;;  %v3958_v49 = vadd.f32 %v3826_v13, %v3902_v38 }
0x373e   :  { %v2430_v22 = vmul.f32 %v3167_v48, %v2429_v52  ;;  %v1887_v52 = vsel %vm360_vm14, %v3958_v49, -inf }
0x3740   :  { %v2431_v53 = vadd.f32 %v3167_v48, %v2430_v22  ;;  %v3964_v22 = vadd.f32 %v3870_v39, %v3902_v38 }
0x3742   :  { %v2435_v57 = vsel %vm2434_vm5, %v3167_v48, %v2431_v53  ;;  %v1277_v48 = vsel %vm360_vm14, %v3950_v46, -inf  ;;  %v2192_v11 = vsel %vm360_vm14, %v3964_v22, -inf  ;;  %v3971_v53 = vadd.f32 %v3756_v5, %v3902_v38 }
0x3743   :  { %v2440_v31 = vsel %vm2437_vm6, %v2439_v58, %v2435_v57 }
0x3744   :  { %v2453_v42 = vsub.f32 1.0, %v2440_v31  ;;  %v2459_v17 = vmul.f32 %v2440_v31, %v2399_v26  ;;  %v1582_v13 = vsel %vm360_vm14, %v3971_v53, -inf }
0x375a   :  { %668 = vmax.xlane.f32.xlu1 %v667_v44 }
0x379a   :  { %v2444_v59 = vpop.permute.xlu1 %2443 }
0x379b   :  { %v2446_v60 = vmul.f32 %v2444_v59, %v2440_v31 }
0x379d   :  { %2448 = vrot.lane.b32.xlu2 %v2446_v60, %s3283_s9 }
0x37a2   :  { %v3912_v3 = vpop.permute.xlu1 %375 }
0x37cd   :  { %v3914_v4 = vpop.xlane.xlu1 %668 }
0x37ce   :  { %v670_v9 = vsub.f32 %v3906_v43, %v3914_v4 }
0x37d0   :  { %v671_v7 = vmul.f32 1.442695, %v670_v9 }
0x37f7   :  { %v2449_v61 = vpop.permute.xlu2 %2448 }
0x37f8   :  { %v2451_v0 = vadd.f32 %v2449_v61, %v2420_v36 }
0x37fa   :  { %3168 = vtanh.f32 %v2451_v0 }
0x37fb   :  { %3170 = vpow2.f32 %v671_v7 }
0x3800   :  { %v3169_v1 = vpop.eup %3168 }
0x3801   :  { %2455 = vrot.lane.b32.xlu2 %v3169_v1, %s3289_s11  ;;  %v3171_v18 = vpop.eup %3170 }
0x3802   :  { %v673_v54 = vsel %vm360_vm14, %v3171_v18, 0.0 }
0x382a   :  { %362 = vmax.xlane.f32.xlu2 %v361_v12 }
0x3832   :  { %674 = vadd.xlane.f32.xlu2 %v673_v54 }
0x383a   :  { %973 = vmax.xlane.f32.xlu2 %v972_v14 }
0x3852   :  { %986 = vrot.lane.b32.xlu2 %v3510_v35, %s3283_s9  ;;  %v3031_v35 = vld [vmem:[%s4058_s5 + $0x8] sm:$0xff]  ;;  %s3290_s5 = smov [#allocation7]  }
0x3853   :  { %2490 = vmatpush.bf16.msrb.mxu3 %v3031_v35 }
0x3857   :  { %2491 = vmatpush.bf16.msrb.mxu3 %v3030_v34 }
0x385b   :  { %v2456_v16 = vpop.permute.xlu2 %2455 }
0x385c   :  { %v2458_v23 = vmul.f32 %v2456_v16, %v2453_v42 }
0x385e   :  { %v3933_v24 = vadd.f32 %v2459_v17, %v2458_v23 }
0x3860   :  { %v2461_v25 = vpack.c.bf16 %v3933_v24, %v3933_v24 }
0x3862   :  { %2467 = vrot.lane.b32.xlu0 %v2461_v25, %s3289_s11 }
0x389d   :  { %v363_v21 = vpop.xlane.xlu2 %362 }
0x389e   :  { %v364_v28 = vsub.f32 %v3920_v6, %v363_v21 }
0x38a0   :  { %v365_v30 = vmul.f32 1.442695, %v364_v28 }
0x38a2   :  { %3172 = vpow2.f32 %v365_v30 }
0x38a5   :  { %v675_v32 = vpop.xlane.xlu2 %674 }
0x38a8   :  { %v3173_v26 = vpop.eup %3172 }
0x38a9   :  { %v367_v33 = vsel %vm360_vm14, %v3173_v26, 0.0 }
0x38aa   :  { %368 = vadd.xlane.f32.xlu0 %v367_v33 }
0x38ad   :  { %v974_v36 = vpop.xlane.xlu2 %973 }
0x38ae   :  { %v975_v37 = vsub.f32 %v3927_v20, %v974_v36 }
0x38b0   :  { %v976_v44 = vmul.f32 1.442695, %v975_v37 }
0x38b2   :  { %3174 = vpow2.f32 %v976_v44 }
0x38b3   :  { %3176 = vlog2.f32 %v675_v32 }
0x38b5   :  { %v987_v16 = vpop.permute.xlu2 %986 }
0x38b8   :  { %v3175_v45 = vpop.eup %3174 }
0x38b9   :  { %v978_v29 = vsel %vm360_vm14, %v3175_v45, 0.0  ;;  %v3177_v39 = vpop.eup %3176 }
0x38ba   :  { %979 = vadd.xlane.f32.xlu1 %v978_v29  ;;  %v677_v57 = vmul.f32 0.6931472, %v3177_v39 }
0x38bc   :  { %v678_v31 = vadd.f32 %v677_v57, %v3914_v4 }
0x38be   :  { %681 = vrot.lane.b32.xlu0 %v3431_v55, %s3283_s9  ;;  %v679_v61 = vsub.f32 %v3906_v43, %v678_v31 }
0x38c0   :  { %v684_v4 = vsel %vm69_vm0, %v679_v61, %v3493_v15 }
0x38c2   :  { %1278 = vmax.xlane.f32.xlu1 %v1277_v48 }
0x38ca   :  { %1888 = vmax.xlane.f32.xlu1 %v1887_v52 }
0x38d2   :  { %2193 = vmax.xlane.f32.xlu1 %v2192_v11 }
0x38d4   :  { %v2468_v55 = vpop.permute.xlu0 %2467 }
0x38d5   :  { %2943 = vmatmul.msk.bf16.vlgmr.msrb.gmra.mxu3 %vm69_vm0, %v2468_v55 }
0x38e8   :  { %1583 = vmax.xlane.f32.xlu0 %v1582_v13 }
0x391d   :  { %v369_v56 = vpop.xlane.xlu0 %368 }
0x391e   :  { %3178 = vlog2.f32 %v369_v56 }
0x3924   :  { %v3179_v41 = vpop.eup %3178 }
0x3925   :  { %v371_v58 = vmul.f32 0.6931472, %v3179_v41 }
0x3927   :  { %v372_v59 = vadd.f32 %v371_v58, %v363_v21 }
0x3929   :  { %v373_v60 = vsub.f32 %v3920_v6, %v372_v59 }
0x392b   :  { %v378_v5 = vsel %vm69_vm0, %v373_v60, %v3423_v40 }
0x392c   :  { %v379_v0 = vsel %vm104_vm1, %v378_v5, %v3912_v3 }
0x392d   :  { %v381_v1 = vsel %vm380_vm7, %v379_v0, 0.0  ;;  %v980_v9 = vpop.xlane.xlu1 %979 }
0x392e   :  { %382 = vst [vmem:[#allocation7] sm:$0x1] %v381_v1  ;;  %3180 = vlog2.f32 %v980_v9 }
0x3930   :  { %v682_v7 = vpop.permute.xlu0 %681 }
0x3931   :  { %v685_v6 = vsel %vm104_vm1, %v684_v4, %v682_v7 }
0x3932   :  { %v686_v12 = vsel %vm380_vm7, %v685_v6, 0.0 }
0x3933   :  { %687 = vst [vmem:[#allocation7 + $0x1] sm:$0x1] %v686_v12 }
0x3934   :  { %v3181_v40 = vpop.eup %3180 }
0x3935   :  { %v982_v18 = vmul.f32 0.6931472, %v3181_v40  ;;  %v1279_v43 = vpop.xlane.xlu1 %1278 }
0x3936   :  { %v1280_v54 = vsub.f32 %v3950_v46, %v1279_v43 }
0x3937   :  { %v983_v3 = vadd.f32 %v982_v18, %v974_v36 }
0x3938   :  { %v1281_v14 = vmul.f32 1.442695, %v1280_v54 }
0x3939   :  { %v984_v42 = vsub.f32 %v3927_v20, %v983_v3 }
0x393a   :  { %3182 = vpow2.f32 %v1281_v14 }
0x393b   :  { %v989_v17 = vsel %vm69_vm0, %v984_v42, %v3563_v63 }
0x393c   :  { %v990_v15 = vsel %vm104_vm1, %v989_v17, %v987_v16 }
0x393d   :  { %v991_v23 = vsel %vm380_vm7, %v990_v15, 0.0  ;;  %v3994_v28 = vpop.xlane.xlu1 %1888 }
0x393e   :  { %992 = vst [vmem:[#allocation7 + $0x2] sm:$0x1] %v991_v23 }
0x3940   :  { %v3183_v25 = vpop.eup %3182 }
0x3941   :  { %v1283_v21 = vsel %vm360_vm14, %v3183_v25, 0.0 }
0x3942   :  { %1284 = vadd.xlane.f32.xlu1 %v1283_v21 }
0x3945   :  { %v3996_v30 = vpop.xlane.xlu1 %2193 }
0x3946   :  { %v2195_v20 = vsub.f32 %v3964_v22, %v3996_v30 }
0x3948   :  { %v2196_v35 = vmul.f32 1.442695, %v2195_v20 }
0x394a   :  { %3184 = vpow2.f32 %v2196_v35 }
0x3950   :  { %v3185_v37 = vpop.eup %3184 }
0x3951   :  { %v2198_v45 = vsel %vm360_vm14, %v3185_v37, 0.0 }
0x3958   :  { %v2493_v32 = vpop.f32.mrf.mxu3 }
0x3959   :  { %v4001_v63 = vadd.f32 %v2493_v32, %v3902_v38 }
0x395b   :  { %v1584_v26 = vpop.xlane.xlu0 %1583  ;;  %1291 = vrot.lane.b32.xlu1 %v3581_v19, %s3283_s9  ;;  %v2497_v33 = vsel %vm360_vm14, %v4001_v63, -inf  ;;  %v1890_v19 = vsub.f32 %v3958_v49, %v3994_v28 }
0x395c   :  { %v1585_v34 = vsub.f32 %v3971_v53, %v1584_v26  ;;  %2498 = vmax.xlane.f32.xlu2 %v2497_v33 }
0x395d   :  { %v1891_v48 = vmul.f32 1.442695, %v1890_v19 }
0x395e   :  { %v1586_v36 = vmul.f32 1.442695, %v1585_v34 }
0x3960   :  { %3186 = vpow2.f32 %v1586_v36  ;;  %v2495_v44 = vpop.f32.mrf.mxu3 }
0x3961   :  { %3188 = vpow2.f32 %v1891_v48 }
0x3964   :  { %2199 = vadd.xlane.f32.xlu2 %v2198_v45 }
0x3966   :  { %v3187_v38 = vpop.eup %3186 }
0x3967   :  { %v1588_v29 = vsel %vm360_vm14, %v3187_v38, 0.0  ;;  %v3189_v52 = vpop.eup %3188 }
0x3968   :  { %1589 = vadd.xlane.f32.xlu0 %v1588_v29  ;;  %v1893_v11 = vsel %vm360_vm14, %v3189_v52, 0.0 }
0x397c   :  { %1596 = vrot.lane.b32.xlu0 %v3653_v10, %s3283_s9 }
0x3984   :  { %1901 = vrot.lane.b32.xlu0 %v3715_v2, %s3283_s9 }
0x3985   :  { %1894 = vadd.xlane.f32.xlu1 %v1893_v11 }
0x398c   :  { %2511 = vrot.lane.b32.xlu0 %v3865_v27, %s3283_s9 }
0x39b5   :  { %v1285_v55 = vpop.xlane.xlu1 %1284 }
0x39b6   :  { %3190 = vlog2.f32 %v1285_v55 }
0x39bc   :  { %v3191_v13 = vpop.eup %3190 }
0x39bd   :  { %v1287_v56 = vmul.f32 0.6931472, %v3191_v13 }
0x39bf   :  { %v1288_v39 = vadd.f32 %v1287_v56, %v1279_v43 }
0x39c1   :  { %v1289_v41 = vsub.f32 %v3950_v46, %v1288_v39 }
0x39c3   :  { %v1294_v10 = vsel %vm69_vm0, %v1289_v41, %v3633_v50 }
0x39cd   :  { %v1292_v57 = vpop.permute.xlu1 %1291 }
0x39ce   :  { %v1295_v58 = vsel %vm104_vm1, %v1294_v10, %v1292_v57 }
0x39cf   :  { %v1296_v2 = vsel %vm380_vm7, %v1295_v58, 0.0  ;;  %v2499_v59 = vpop.xlane.xlu2 %2498 }
0x39d0   :  { %1297 = vst [vmem:[#allocation7 + $0x3] sm:$0x1] %v1296_v2  ;;  %v2500_v31 = vsub.f32 %v4001_v63, %v2499_v59 }
0x39d2   :  { %v2501_v27 = vmul.f32 1.442695, %v2500_v31 }
0x39d4   :  { %3192 = vpow2.f32 %v2501_v27 }
0x39d7   :  { %v2200_v42 = vpop.xlane.xlu2 %2199 }
0x39da   :  { %v3193_v60 = vpop.eup %3192 }
0x39db   :  { %v1590_v5 = vpop.xlane.xlu0 %1589  ;;  %v2503_v61 = vsel %vm360_vm14, %v3193_v60, 0.0 }
0x39dc   :  { %3194 = vlog2.f32 %v1590_v5  ;;  %2504 = vadd.xlane.f32.xlu2 %v2503_v61 }
0x39e2   :  { %v3195_v46 = vpop.eup %3194 }
0x39e3   :  { %v1592_v0 = vmul.f32 0.6931472, %v3195_v46 }
0x39e5   :  { %v1593_v50 = vadd.f32 %v1592_v0, %v1584_v26 }
0x39e7   :  { %v1594_v1 = vsub.f32 %v3971_v53, %v1593_v50 }
0x39e9   :  { %v1599_v9 = vsel %vm69_vm0, %v1594_v1, %v3707_v47 }
0x39ee   :  { %v1597_v7 = vpop.permute.xlu0 %1596 }
0x39ef   :  { %v1600_v4 = vsel %vm104_vm1, %v1599_v9, %v1597_v7 }
0x39f0   :  { %v1601_v6 = vsel %vm380_vm7, %v1600_v4, 0.0 }
0x39f1   :  { %1602 = vst [vmem:[#allocation7 + $0x4] sm:$0x1] %v1601_v6 }
0x39f4   :  { %2206 = vrot.lane.b32.xlu2 %v3785_v8, %s3283_s9  ;;  %s2523_s9 = sshll.u32 %s3290_s5, 4  ;;  %s2524_s9 = int_to_ptr.vmem [resolvable:$true] %s2523_s9 }
0x39f6   :  { %v1902_v54 = vpop.permute.xlu0 %1901 }
0x39f8   :  { %v1895_v12 = vpop.xlane.xlu1 %1894 }
0x39f9   :  { %3196 = vlog2.f32 %v1895_v12 }
0x39fa   :  { %3198 = vlog2.f32 %v2200_v42 }
0x39ff   :  { %v3197_v40 = vpop.eup %3196 }
0x3a00   :  { %v1897_v18 = vmul.f32 0.6931472, %v3197_v40  ;;  %v3199_v8 = vpop.eup %3198 }
0x3a01   :  { %v2202_v16 = vmul.f32 0.6931472, %v3199_v8 }
0x3a02   :  { %v1898_v43 = vadd.f32 %v1897_v18, %v3994_v28 }
0x3a03   :  { %v2203_v17 = vadd.f32 %v2202_v16, %v3996_v30 }
0x3a04   :  { %v1899_v53 = vsub.f32 %v3958_v49, %v1898_v43 }
0x3a05   :  { %v2204_v23 = vsub.f32 %v3964_v22, %v2203_v17  ;;  %v2512_v22 = vpop.permute.xlu0 %2511 }
0x3a06   :  { %v1904_v47 = vsel %vm69_vm0, %v1899_v53, %v3777_v51 }
0x3a07   :  { %v1905_v3 = vsel %vm104_vm1, %v1904_v47, %v1902_v54  ;;  %v2209_v51 = vsel %vm69_vm0, %v2204_v23, %v3847_v62 }
0x3a08   :  { %v1906_v14 = vsel %vm380_vm7, %v1905_v3, 0.0 }
0x3a09   :  { %1907 = vst [vmem:[#allocation7 + $0x5] sm:$0x1] %v1906_v14 }
0x3a4f   :  { %v2505_v15 = vpop.xlane.xlu2 %2504 }
0x3a50   :  { %3200 = vlog2.f32 %v2505_v15 }
0x3a56   :  { %v3201_v49 = vpop.eup %3200 }
0x3a57   :  { %v2507_v25 = vmul.f32 0.6931472, %v3201_v49  ;;  %v2207_v21 = vpop.permute.xlu2 %2206 }
0x3a58   :  { %v2210_v28 = vsel %vm104_vm1, %v2209_v51, %v2207_v21 }
0x3a59   :  { %v2508_v20 = vadd.f32 %v2507_v25, %v2499_v59  ;;  %v2211_v35 = vsel %vm380_vm7, %v2210_v28, 0.0 }
0x3a5a   :  { %2212 = vst [vmem:[#allocation7 + $0x6] sm:$0x1] %v2211_v35 }
0x3a5b   :  { %v2509_v32 = vsub.f32 %v4001_v63, %v2508_v20 }
0x3a5d   :  { %v2514_v30 = vsel %vm69_vm0, %v2509_v32, %v3933_v24 }
0x3a5e   :  { %v2515_v62 = vsel %vm104_vm1, %v2514_v30, %v2512_v22 }
0x3a5f   :  { %v2516_v26 = vsel %vm380_vm7, %v2515_v62, 0.0 }
0x3a60   :  { %2517 = vst [vmem:[#allocation7 + $0x7] sm:$0x1] %v2516_v26 }
0x3a61   :  { %2528 = dma.vmem_to_hbm [thread:$0]  %s2524_s9, 128, %s2526_s17, [#allocation4]  }
0x3a62   :  { %3280 = dma.done.wait [#allocation4], 128  }
0x3a63   :  { %3281 = vsyncadd [#allocation4], 4294967168 }
0x3a64   :  { %2533 = vsyncpa [#allocation3], 1 }
0x3a65   :  { %2534 = vsyncpa [#allocation6], 1 }
0x3a66   :  { %2535 = vsyncpa [#allocation4], 1 }

</bundles_post_ra>
